<compile_context>
chip_gen: v7x
topology: tpu7x:2x2x1
jax: 0.10.0
libtpu: 0.0.40
codegen_flags: <defaults>
</compile_context>

<pallas_src>
import jax
import jax.numpy as jnp
from jax.experimental import pallas as pl
from jax.experimental.pallas import tpu as pltpu


# ---------------------------------------------------------------------------
# Fused SAM kernel: one batch element per grid step.
# ---------------------------------------------------------------------------
def _sam_kernel(x_ref, w_ref, b_ref, o_ref):
    # x_ref : (1, C, Hp, Wp)  spatially zero-padded input tile (VMEM)
    # w_ref : (2*KH*KW,)      conv weight, [in_ch, kh, kw] flattened (SMEM)
    # b_ref : (1,)            conv bias (SMEM)
    # o_ref : (1, C, H, W)    gated output tile (VMEM)
    _, C, Hp, Wp = x_ref.shape
    _, _, H, W = o_ref.shape
    KH = Hp - H + 1
    KW = Wp - W + 1
    pad = (KH - 1) // 2

    xp = x_ref[0]                                  # (C, Hp, Wp)

    # Channel-wise max / mean (halo positions are all-zero -> reduce to 0,
    # which matches the conv's zero padding of the y maps).
    y_max = jnp.max(xp, axis=0)                    # (Hp, Wp)
    y_mean = jnp.mean(xp, axis=0)                  # (Hp, Wp)

    # 7x7 conv over the 2-channel (max, mean) map: 49 shifted taps, VPU MACs.
    acc = jnp.zeros((H, W), dtype=jnp.float32)
    for kh in range(KH):
        for kw in range(KW):
            w_mx = w_ref[kh * KW + kw]             # weight[0, 0, kh, kw] (max map)
            w_mn = w_ref[KH * KW + kh * KW + kw]   # weight[0, 1, kh, kw] (mean map)
            acc = acc \
                + w_mx * y_max[kh:kh + H, kw:kw + W] \
                + w_mn * y_mean[kh:kh + H, kw:kw + W]
    acc = acc + b_ref[0]

    # Sigmoid (exp goes to the EUP slot).
    att = 1.0 / (1.0 + jnp.exp(-acc))              # (H, W)

    # Gate the (interior of the) input by the attention map and write out.
    x_int = xp[:, pad:pad + H, pad:pad + W]        # (C, H, W)
    o_ref[...] = (x_int * att[None, :, :]).astype(o_ref.dtype)[None]


# ---------------------------------------------------------------------------
# Wrapper: pad halo, flatten conv params, launch the fused kernel.
# ---------------------------------------------------------------------------
def sam_forward(x, conv_weight, conv_bias):
    """
    x           : [N, C, H, W]        (float32)
    conv_weight : [1, 2, 7, 7]        (nn.Conv2d(2, 1, 7, 1, 3) weight)
    conv_bias   : [1]
    returns     : [N, C, H, W]  == x * sigmoid(conv(cat(max_c(x), mean_c(x))))
    """
    N, C, H, W = x.shape
    OC, IC, KH, KW = conv_weight.shape
    pad = (KH - 1) // 2
    Hp, Wp = H + 2 * pad, W + 2 * pad

    # Small halo pad (only wrapper-side data movement; no im2col / transposes).
    x_pad = jnp.pad(x, ((0, 0), (0, 0), (pad, pad), (pad, pad)))

    w_flat = conv_weight.reshape(IC * KH * KW).astype(jnp.float32)   # (98,)
    b_flat = conv_bias.reshape(OC).astype(jnp.float32)               # (1,)

    out = pl.pallas_call(
        _sam_kernel,
        out_shape=jax.ShapeDtypeStruct((N, C, H, W), x.dtype),
        grid_spec=pltpu.PrefetchScalarGridSpec(
            num_scalar_prefetch=0,
            grid=(N,),
            in_specs=[
                pl.BlockSpec((1, C, Hp, Wp), lambda n: (n, 0, 0, 0)),
                pl.BlockSpec(memory_space=pltpu.MemorySpace.SMEM),
                pl.BlockSpec(memory_space=pltpu.MemorySpace.SMEM),
            ],
            out_specs=pl.BlockSpec((1, C, H, W), lambda n: (n, 0, 0, 0)),
        ),
        compiler_params=pltpu.CompilerParams(
            dimension_semantics=("parallel",),
        ),
    )(x_pad, w_flat, b_flat)
    return out


# ---------------------------------------------------------------------------
# Pure-JAX reference (mirrors the PyTorch module exactly).
# ---------------------------------------------------------------------------
def sam_reference(x, conv_weight, conv_bias):
    y1 = jnp.max(x, axis=1, keepdims=True)
    y2 = jnp.mean(x, axis=1, keepdims=True)
    y = jnp.concatenate([y1, y2], axis=1)
    conv = jax.lax.conv_general_dilated(
        y, conv_weight, window_strides=(1, 1), padding=((3, 3), (3, 3)),
        dimension_numbers=("NCHW", "OIHW", "NCHW"),
    ) + conv_bias.reshape(1, -1, 1, 1)
    att = jax.nn.sigmoid(conv)
    return x * att


if __name__ == "__main__":
    # Small shapes consistent with the module: x [2, 4, 16, 16].
    N, C, H, W = 2, 4, 16, 16
    OC, IC, K = 1, 2, 7

    key = jax.random.PRNGKey(0)
    k_w, k_b, k_x = jax.random.split(key, 3)

    # Deterministic params (PyTorch Conv2d default-init scale: +-1/sqrt(fan_in)).
    fan_in = IC * K * K
    bound = 1.0 / (fan_in ** 0.5)
    conv_weight = jax.random.uniform(
        k_w, (OC, IC, K, K), minval=-bound, maxval=bound, dtype=jnp.float32)
    conv_bias = jax.random.uniform(
        k_b, (OC,), minval=-bound, maxval=bound, dtype=jnp.float32)
    x = jax.random.normal(k_x, (N, C, H, W), dtype=jnp.float32)

    fwd = jax.jit(sam_forward)
    y = fwd(x, conv_weight, conv_bias)
    jax.block_until_ready(y)

    ref = sam_reference(x, conv_weight, conv_bias)
    assert y.shape == ref.shape
    max_err = float(jnp.max(jnp.abs(y - ref)))
    assert jnp.allclose(y, ref, atol=1e-5, rtol=1e-5), f"max abs err = {max_err}"

    print("KERNEL_OK")
</pallas_src>

<mosaic_0001>
module attributes {stable_mosaic.version = 11 : i64} {
  func.func @_sam_kernel(%arg0: i32, %arg1: memref<1x4x22x22xf32, #tpu.memory_space<vmem>>, %arg2: memref<98xf32, #tpu.memory_space<smem>>, %arg3: memref<1xf32, #tpu.memory_space<smem>>, %arg4: memref<1x4x16x16xf32, #tpu.memory_space<vmem>>) attributes {dimension_semantics = [#tpu.dimension_semantics<parallel>], iteration_bounds = array<i64: 2>, scalar_prefetch = 0 : i64, scratch_operands = 0 : i64, tpu.core_type = #tpu.core_type<tc>, window_params = [{transform_indices = @transform_0, window_bounds = array<i64: 1, 4, 22, 22>}, {transform_indices = @transform_1, window_bounds = array<i64: 98>}, {transform_indices = @transform_2, window_bounds = array<i64: 1>}, {transform_indices = @transform_3, window_bounds = array<i64: 1, 4, 16, 16>}]} {
    %c0 = arith.constant 0 : index
    %c0_0 = arith.constant 0 : index
    %c0_1 = arith.constant 0 : index
    %c0_2 = arith.constant 0 : index
    %0 = vector.load %arg1[%c0, %c0_0, %c0_1, %c0_2] : memref<1x4x22x22xf32, #tpu.memory_space<vmem>>, vector<1x4x22x22xf32>
    %1 = vector.shape_cast %0 : vector<1x4x22x22xf32> to vector<4x22x22xf32>
    %cst = arith.constant dense<0xFF800000> : vector<22x22xf32>
    %2 = vector.multi_reduction <maximumf>, %1, %cst [0] : vector<4x22x22xf32> to vector<22x22xf32>
    %cst_3 = arith.constant dense<0.000000e+00> : vector<22x22xf32>
    %3 = vector.multi_reduction <add>, %1, %cst_3 [0] : vector<4x22x22xf32> to vector<22x22xf32>
    %cst_4 = arith.constant 4.000000e+00 : f32
    %4 = vector.broadcast %cst_4 : f32 to vector<22x22xf32>
    %5 = arith.divf %3, %4 : vector<22x22xf32>
    %cst_5 = arith.constant 0.000000e+00 : f32
    %6 = vector.broadcast %cst_5 : f32 to vector<16x16xf32>
    %c0_6 = arith.constant 0 : index
    %7 = memref.load %arg2[%c0_6] : memref<98xf32, #tpu.memory_space<smem>>
    %c49 = arith.constant 49 : index
    %8 = memref.load %arg2[%c49] : memref<98xf32, #tpu.memory_space<smem>>
    %9 = vector.extract_strided_slice %2 {offsets = [0, 0], sizes = [16, 16], strides = [1, 1]} : vector<22x22xf32> to vector<16x16xf32>
    %10 = vector.broadcast %7 : f32 to vector<16x16xf32>
    %11 = arith.mulf %10, %9 : vector<16x16xf32>
    %12 = arith.addf %6, %11 : vector<16x16xf32>
    %13 = vector.extract_strided_slice %5 {offsets = [0, 0], sizes = [16, 16], strides = [1, 1]} : vector<22x22xf32> to vector<16x16xf32>
    %14 = vector.broadcast %8 : f32 to vector<16x16xf32>
    %15 = arith.mulf %14, %13 : vector<16x16xf32>
    %16 = arith.addf %12, %15 : vector<16x16xf32>
    %c1 = arith.constant 1 : index
    %17 = memref.load %arg2[%c1] : memref<98xf32, #tpu.memory_space<smem>>
    %c50 = arith.constant 50 : index
    %18 = memref.load %arg2[%c50] : memref<98xf32, #tpu.memory_space<smem>>
    %19 = vector.extract_strided_slice %2 {offsets = [0, 1], sizes = [16, 16], strides = [1, 1]} : vector<22x22xf32> to vector<16x16xf32>
    %20 = vector.broadcast %17 : f32 to vector<16x16xf32>
    %21 = arith.mulf %20, %19 : vector<16x16xf32>
    %22 = arith.addf %16, %21 : vector<16x16xf32>
    %23 = vector.extract_strided_slice %5 {offsets = [0, 1], sizes = [16, 16], strides = [1, 1]} : vector<22x22xf32> to vector<16x16xf32>
    %24 = vector.broadcast %18 : f32 to vector<16x16xf32>
    %25 = arith.mulf %24, %23 : vector<16x16xf32>
    %26 = arith.addf %22, %25 : vector<16x16xf32>
    %c2 = arith.constant 2 : index
    %27 = memref.load %arg2[%c2] : memref<98xf32, #tpu.memory_space<smem>>
    %c51 = arith.constant 51 : index
    %28 = memref.load %arg2[%c51] : memref<98xf32, #tpu.memory_space<smem>>
    %29 = vector.extract_strided_slice %2 {offsets = [0, 2], sizes = [16, 16], strides = [1, 1]} : vector<22x22xf32> to vector<16x16xf32>
    %30 = vector.broadcast %27 : f32 to vector<16x16xf32>
    %31 = arith.mulf %30, %29 : vector<16x16xf32>
    %32 = arith.addf %26, %31 : vector<16x16xf32>
    %33 = vector.extract_strided_slice %5 {offsets = [0, 2], sizes = [16, 16], strides = [1, 1]} : vector<22x22xf32> to vector<16x16xf32>
    %34 = vector.broadcast %28 : f32 to vector<16x16xf32>
    %35 = arith.mulf %34, %33 : vector<16x16xf32>
    %36 = arith.addf %32, %35 : vector<16x16xf32>
    %c3 = arith.constant 3 : index
    %37 = memref.load %arg2[%c3] : memref<98xf32, #tpu.memory_space<smem>>
    %c52 = arith.constant 52 : index
    %38 = memref.load %arg2[%c52] : memref<98xf32, #tpu.memory_space<smem>>
    %39 = vector.extract_strided_slice %2 {offsets = [0, 3], sizes = [16, 16], strides = [1, 1]} : vector<22x22xf32> to vector<16x16xf32>
    %40 = vector.broadcast %37 : f32 to vector<16x16xf32>
    %41 = arith.mulf %40, %39 : vector<16x16xf32>
    %42 = arith.addf %36, %41 : vector<16x16xf32>
    %43 = vector.extract_strided_slice %5 {offsets = [0, 3], sizes = [16, 16], strides = [1, 1]} : vector<22x22xf32> to vector<16x16xf32>
    %44 = vector.broadcast %38 : f32 to vector<16x16xf32>
    %45 = arith.mulf %44, %43 : vector<16x16xf32>
    %46 = arith.addf %42, %45 : vector<16x16xf32>
    %c4 = arith.constant 4 : index
    %47 = memref.load %arg2[%c4] : memref<98xf32, #tpu.memory_space<smem>>
    %c53 = arith.constant 53 : index
    %48 = memref.load %arg2[%c53] : memref<98xf32, #tpu.memory_space<smem>>
    %49 = vector.extract_strided_slice %2 {offsets = [0, 4], sizes = [16, 16], strides = [1, 1]} : vector<22x22xf32> to vector<16x16xf32>
    %50 = vector.broadcast %47 : f32 to vector<16x16xf32>
    %51 = arith.mulf %50, %49 : vector<16x16xf32>
    %52 = arith.addf %46, %51 : vector<16x16xf32>
    %53 = vector.extract_strided_slice %5 {offsets = [0, 4], sizes = [16, 16], strides = [1, 1]} : vector<22x22xf32> to vector<16x16xf32>
    %54 = vector.broadcast %48 : f32 to vector<16x16xf32>
    %55 = arith.mulf %54, %53 : vector<16x16xf32>
    %56 = arith.addf %52, %55 : vector<16x16xf32>
    %c5 = arith.constant 5 : index
    %57 = memref.load %arg2[%c5] : memref<98xf32, #tpu.memory_space<smem>>
    %c54 = arith.constant 54 : index
    %58 = memref.load %arg2[%c54] : memref<98xf32, #tpu.memory_space<smem>>
    %59 = vector.extract_strided_slice %2 {offsets = [0, 5], sizes = [16, 16], strides = [1, 1]} : vector<22x22xf32> to vector<16x16xf32>
    %60 = vector.broadcast %57 : f32 to vector<16x16xf32>
    %61 = arith.mulf %60, %59 : vector<16x16xf32>
    %62 = arith.addf %56, %61 : vector<16x16xf32>
    %63 = vector.extract_strided_slice %5 {offsets = [0, 5], sizes = [16, 16], strides = [1, 1]} : vector<22x22xf32> to vector<16x16xf32>
    %64 = vector.broadcast %58 : f32 to vector<16x16xf32>
    %65 = arith.mulf %64, %63 : vector<16x16xf32>
    %66 = arith.addf %62, %65 : vector<16x16xf32>
    %c6 = arith.constant 6 : index
    %67 = memref.load %arg2[%c6] : memref<98xf32, #tpu.memory_space<smem>>
    %c55 = arith.constant 55 : index
    %68 = memref.load %arg2[%c55] : memref<98xf32, #tpu.memory_space<smem>>
    %69 = vector.extract_strided_slice %2 {offsets = [0, 6], sizes = [16, 16], strides = [1, 1]} : vector<22x22xf32> to vector<16x16xf32>
    %70 = vector.broadcast %67 : f32 to vector<16x16xf32>
    %71 = arith.mulf %70, %69 : vector<16x16xf32>
    %72 = arith.addf %66, %71 : vector<16x16xf32>
    %73 = vector.extract_strided_slice %5 {offsets = [0, 6], sizes = [16, 16], strides = [1, 1]} : vector<22x22xf32> to vector<16x16xf32>
    %74 = vector.broadcast %68 : f32 to vector<16x16xf32>
    %75 = arith.mulf %74, %73 : vector<16x16xf32>
    %76 = arith.addf %72, %75 : vector<16x16xf32>
    %c7 = arith.constant 7 : index
    %77 = memref.load %arg2[%c7] : memref<98xf32, #tpu.memory_space<smem>>
    %c56 = arith.constant 56 : index
    %78 = memref.load %arg2[%c56] : memref<98xf32, #tpu.memory_space<smem>>
    %79 = vector.extract_strided_slice %2 {offsets = [1, 0], sizes = [16, 16], strides = [1, 1]} : vector<22x22xf32> to vector<16x16xf32>
    %80 = vector.broadcast %77 : f32 to vector<16x16xf32>
    %81 = arith.mulf %80, %79 : vector<16x16xf32>
    %82 = arith.addf %76, %81 : vector<16x16xf32>
    %83 = vector.extract_strided_slice %5 {offsets = [1, 0], sizes = [16, 16], strides = [1, 1]} : vector<22x22xf32> to vector<16x16xf32>
    %84 = vector.broadcast %78 : f32 to vector<16x16xf32>
    %85 = arith.mulf %84, %83 : vector<16x16xf32>
    %86 = arith.addf %82, %85 : vector<16x16xf32>
    %c8 = arith.constant 8 : index
    %87 = memref.load %arg2[%c8] : memref<98xf32, #tpu.memory_space<smem>>
    %c57 = arith.constant 57 : index
    %88 = memref.load %arg2[%c57] : memref<98xf32, #tpu.memory_space<smem>>
    %89 = vector.extract_strided_slice %2 {offsets = [1, 1], sizes = [16, 16], strides = [1, 1]} : vector<22x22xf32> to vector<16x16xf32>
    %90 = vector.broadcast %87 : f32 to vector<16x16xf32>
    %91 = arith.mulf %90, %89 : vector<16x16xf32>
    %92 = arith.addf %86, %91 : vector<16x16xf32>
    %93 = vector.extract_strided_slice %5 {offsets = [1, 1], sizes = [16, 16], strides = [1, 1]} : vector<22x22xf32> to vector<16x16xf32>
    %94 = vector.broadcast %88 : f32 to vector<16x16xf32>
    %95 = arith.mulf %94, %93 : vector<16x16xf32>
    %96 = arith.addf %92, %95 : vector<16x16xf32>
    %c9 = arith.constant 9 : index
    %97 = memref.load %arg2[%c9] : memref<98xf32, #tpu.memory_space<smem>>
    %c58 = arith.constant 58 : index
    %98 = memref.load %arg2[%c58] : memref<98xf32, #tpu.memory_space<smem>>
    %99 = vector.extract_strided_slice %2 {offsets = [1, 2], sizes = [16, 16], strides = [1, 1]} : vector<22x22xf32> to vector<16x16xf32>
    %100 = vector.broadcast %97 : f32 to vector<16x16xf32>
    %101 = arith.mulf %100, %99 : vector<16x16xf32>
    %102 = arith.addf %96, %101 : vector<16x16xf32>
    %103 = vector.extract_strided_slice %5 {offsets = [1, 2], sizes = [16, 16], strides = [1, 1]} : vector<22x22xf32> to vector<16x16xf32>
    %104 = vector.broadcast %98 : f32 to vector<16x16xf32>
    %105 = arith.mulf %104, %103 : vector<16x16xf32>
    %106 = arith.addf %102, %105 : vector<16x16xf32>
    %c10 = arith.constant 10 : index
    %107 = memref.load %arg2[%c10] : memref<98xf32, #tpu.memory_space<smem>>
    %c59 = arith.constant 59 : index
    %108 = memref.load %arg2[%c59] : memref<98xf32, #tpu.memory_space<smem>>
    %109 = vector.extract_strided_slice %2 {offsets = [1, 3], sizes = [16, 16], strides = [1, 1]} : vector<22x22xf32> to vector<16x16xf32>
    %110 = vector.broadcast %107 : f32 to vector<16x16xf32>
    %111 = arith.mulf %110, %109 : vector<16x16xf32>
    %112 = arith.addf %106, %111 : vector<16x16xf32>
    %113 = vector.extract_strided_slice %5 {offsets = [1, 3], sizes = [16, 16], strides = [1, 1]} : vector<22x22xf32> to vector<16x16xf32>
    %114 = vector.broadcast %108 : f32 to vector<16x16xf32>
    %115 = arith.mulf %114, %113 : vector<16x16xf32>
    %116 = arith.addf %112, %115 : vector<16x16xf32>
    %c11 = arith.constant 11 : index
    %117 = memref.load %arg2[%c11] : memref<98xf32, #tpu.memory_space<smem>>
    %c60 = arith.constant 60 : index
    %118 = memref.load %arg2[%c60] : memref<98xf32, #tpu.memory_space<smem>>
    %119 = vector.extract_strided_slice %2 {offsets = [1, 4], sizes = [16, 16], strides = [1, 1]} : vector<22x22xf32> to vector<16x16xf32>
    %120 = vector.broadcast %117 : f32 to vector<16x16xf32>
    %121 = arith.mulf %120, %119 : vector<16x16xf32>
    %122 = arith.addf %116, %121 : vector<16x16xf32>
    %123 = vector.extract_strided_slice %5 {offsets = [1, 4], sizes = [16, 16], strides = [1, 1]} : vector<22x22xf32> to vector<16x16xf32>
    %124 = vector.broadcast %118 : f32 to vector<16x16xf32>
    %125 = arith.mulf %124, %123 : vector<16x16xf32>
    %126 = arith.addf %122, %125 : vector<16x16xf32>
    %c12 = arith.constant 12 : index
    %127 = memref.load %arg2[%c12] : memref<98xf32, #tpu.memory_space<smem>>
    %c61 = arith.constant 61 : index
    %128 = memref.load %arg2[%c61] : memref<98xf32, #tpu.memory_space<smem>>
    %129 = vector.extract_strided_slice %2 {offsets = [1, 5], sizes = [16, 16], strides = [1, 1]} : vector<22x22xf32> to vector<16x16xf32>
    %130 = vector.broadcast %127 : f32 to vector<16x16xf32>
    %131 = arith.mulf %130, %129 : vector<16x16xf32>
    %132 = arith.addf %126, %131 : vector<16x16xf32>
    %133 = vector.extract_strided_slice %5 {offsets = [1, 5], sizes = [16, 16], strides = [1, 1]} : vector<22x22xf32> to vector<16x16xf32>
    %134 = vector.broadcast %128 : f32 to vector<16x16xf32>
    %135 = arith.mulf %134, %133 : vector<16x16xf32>
    %136 = arith.addf %132, %135 : vector<16x16xf32>
    %c13 = arith.constant 13 : index
    %137 = memref.load %arg2[%c13] : memref<98xf32, #tpu.memory_space<smem>>
    %c62 = arith.constant 62 : index
    %138 = memref.load %arg2[%c62] : memref<98xf32, #tpu.memory_space<smem>>
    %139 = vector.extract_strided_slice %2 {offsets = [1, 6], sizes = [16, 16], strides = [1, 1]} : vector<22x22xf32> to vector<16x16xf32>
    %140 = vector.broadcast %137 : f32 to vector<16x16xf32>
    %141 = arith.mulf %140, %139 : vector<16x16xf32>
    %142 = arith.addf %136, %141 : vector<16x16xf32>
    %143 = vector.extract_strided_slice %5 {offsets = [1, 6], sizes = [16, 16], strides = [1, 1]} : vector<22x22xf32> to vector<16x16xf32>
    %144 = vector.broadcast %138 : f32 to vector<16x16xf32>
    %145 = arith.mulf %144, %143 : vector<16x16xf32>
    %146 = arith.addf %142, %145 : vector<16x16xf32>
    %c14 = arith.constant 14 : index
    %147 = memref.load %arg2[%c14] : memref<98xf32, #tpu.memory_space<smem>>
    %c63 = arith.constant 63 : index
    %148 = memref.load %arg2[%c63] : memref<98xf32, #tpu.memory_space<smem>>
    %149 = vector.extract_strided_slice %2 {offsets = [2, 0], sizes = [16, 16], strides = [1, 1]} : vector<22x22xf32> to vector<16x16xf32>
    %150 = vector.broadcast %147 : f32 to vector<16x16xf32>
    %151 = arith.mulf %150, %149 : vector<16x16xf32>
    %152 = arith.addf %146, %151 : vector<16x16xf32>
    %153 = vector.extract_strided_slice %5 {offsets = [2, 0], sizes = [16, 16], strides = [1, 1]} : vector<22x22xf32> to vector<16x16xf32>
    %154 = vector.broadcast %148 : f32 to vector<16x16xf32>
    %155 = arith.mulf %154, %153 : vector<16x16xf32>
    %156 = arith.addf %152, %155 : vector<16x16xf32>
    %c15 = arith.constant 15 : index
    %157 = memref.load %arg2[%c15] : memref<98xf32, #tpu.memory_space<smem>>
    %c64 = arith.constant 64 : index
    %158 = memref.load %arg2[%c64] : memref<98xf32, #tpu.memory_space<smem>>
    %159 = vector.extract_strided_slice %2 {offsets = [2, 1], sizes = [16, 16], strides = [1, 1]} : vector<22x22xf32> to vector<16x16xf32>
    %160 = vector.broadcast %157 : f32 to vector<16x16xf32>
    %161 = arith.mulf %160, %159 : vector<16x16xf32>
    %162 = arith.addf %156, %161 : vector<16x16xf32>
    %163 = vector.extract_strided_slice %5 {offsets = [2, 1], sizes = [16, 16], strides = [1, 1]} : vector<22x22xf32> to vector<16x16xf32>
    %164 = vector.broadcast %158 : f32 to vector<16x16xf32>
    %165 = arith.mulf %164, %163 : vector<16x16xf32>
    %166 = arith.addf %162, %165 : vector<16x16xf32>
    %c16 = arith.constant 16 : index
    %167 = memref.load %arg2[%c16] : memref<98xf32, #tpu.memory_space<smem>>
    %c65 = arith.constant 65 : index
    %168 = memref.load %arg2[%c65] : memref<98xf32, #tpu.memory_space<smem>>
    %169 = vector.extract_strided_slice %2 {offsets = [2, 2], sizes = [16, 16], strides = [1, 1]} : vector<22x22xf32> to vector<16x16xf32>
    %170 = vector.broadcast %167 : f32 to vector<16x16xf32>
    %171 = arith.mulf %170, %169 : vector<16x16xf32>
    %172 = arith.addf %166, %171 : vector<16x16xf32>
    %173 = vector.extract_strided_slice %5 {offsets = [2, 2], sizes = [16, 16], strides = [1, 1]} : vector<22x22xf32> to vector<16x16xf32>
    %174 = vector.broadcast %168 : f32 to vector<16x16xf32>
    %175 = arith.mulf %174, %173 : vector<16x16xf32>
    %176 = arith.addf %172, %175 : vector<16x16xf32>
    %c17 = arith.constant 17 : index
    %177 = memref.load %arg2[%c17] : memref<98xf32, #tpu.memory_space<smem>>
    %c66 = arith.constant 66 : index
    %178 = memref.load %arg2[%c66] : memref<98xf32, #tpu.memory_space<smem>>
    %179 = vector.extract_strided_slice %2 {offsets = [2, 3], sizes = [16, 16], strides = [1, 1]} : vector<22x22xf32> to vector<16x16xf32>
    %180 = vector.broadcast %177 : f32 to vector<16x16xf32>
    %181 = arith.mulf %180, %179 : vector<16x16xf32>
    %182 = arith.addf %176, %181 : vector<16x16xf32>
    %183 = vector.extract_strided_slice %5 {offsets = [2, 3], sizes = [16, 16], strides = [1, 1]} : vector<22x22xf32> to vector<16x16xf32>
    %184 = vector.broadcast %178 : f32 to vector<16x16xf32>
    %185 = arith.mulf %184, %183 : vector<16x16xf32>
    %186 = arith.addf %182, %185 : vector<16x16xf32>
    %c18 = arith.constant 18 : index
    %187 = memref.load %arg2[%c18] : memref<98xf32, #tpu.memory_space<smem>>
    %c67 = arith.constant 67 : index
    %188 = memref.load %arg2[%c67] : memref<98xf32, #tpu.memory_space<smem>>
    %189 = vector.extract_strided_slice %2 {offsets = [2, 4], sizes = [16, 16], strides = [1, 1]} : vector<22x22xf32> to vector<16x16xf32>
    %190 = vector.broadcast %187 : f32 to vector<16x16xf32>
    %191 = arith.mulf %190, %189 : vector<16x16xf32>
    %192 = arith.addf %186, %191 : vector<16x16xf32>
    %193 = vector.extract_strided_slice %5 {offsets = [2, 4], sizes = [16, 16], strides = [1, 1]} : vector<22x22xf32> to vector<16x16xf32>
    %194 = vector.broadcast %188 : f32 to vector<16x16xf32>
    %195 = arith.mulf %194, %193 : vector<16x16xf32>
    %196 = arith.addf %192, %195 : vector<16x16xf32>
    %c19 = arith.constant 19 : index
    %197 = memref.load %arg2[%c19] : memref<98xf32, #tpu.memory_space<smem>>
    %c68 = arith.constant 68 : index
    %198 = memref.load %arg2[%c68] : memref<98xf32, #tpu.memory_space<smem>>
    %199 = vector.extract_strided_slice %2 {offsets = [2, 5], sizes = [16, 16], strides = [1, 1]} : vector<22x22xf32> to vector<16x16xf32>
    %200 = vector.broadcast %197 : f32 to vector<16x16xf32>
    %201 = arith.mulf %200, %199 : vector<16x16xf32>
    %202 = arith.addf %196, %201 : vector<16x16xf32>
    %203 = vector.extract_strided_slice %5 {offsets = [2, 5], sizes = [16, 16], strides = [1, 1]} : vector<22x22xf32> to vector<16x16xf32>
    %204 = vector.broadcast %198 : f32 to vector<16x16xf32>
    %205 = arith.mulf %204, %203 : vector<16x16xf32>
    %206 = arith.addf %202, %205 : vector<16x16xf32>
    %c20 = arith.constant 20 : index
    %207 = memref.load %arg2[%c20] : memref<98xf32, #tpu.memory_space<smem>>
    %c69 = arith.constant 69 : index
    %208 = memref.load %arg2[%c69] : memref<98xf32, #tpu.memory_space<smem>>
    %209 = vector.extract_strided_slice %2 {offsets = [2, 6], sizes = [16, 16], strides = [1, 1]} : vector<22x22xf32> to vector<16x16xf32>
    %210 = vector.broadcast %207 : f32 to vector<16x16xf32>
    %211 = arith.mulf %210, %209 : vector<16x16xf32>
    %212 = arith.addf %206, %211 : vector<16x16xf32>
    %213 = vector.extract_strided_slice %5 {offsets = [2, 6], sizes = [16, 16], strides = [1, 1]} : vector<22x22xf32> to vector<16x16xf32>
    %214 = vector.broadcast %208 : f32 to vector<16x16xf32>
    %215 = arith.mulf %214, %213 : vector<16x16xf32>
    %216 = arith.addf %212, %215 : vector<16x16xf32>
    %c21 = arith.constant 21 : index
    %217 = memref.load %arg2[%c21] : memref<98xf32, #tpu.memory_space<smem>>
    %c70 = arith.constant 70 : index
    %218 = memref.load %arg2[%c70] : memref<98xf32, #tpu.memory_space<smem>>
    %219 = vector.extract_strided_slice %2 {offsets = [3, 0], sizes = [16, 16], strides = [1, 1]} : vector<22x22xf32> to vector<16x16xf32>
    %220 = vector.broadcast %217 : f32 to vector<16x16xf32>
    %221 = arith.mulf %220, %219 : vector<16x16xf32>
    %222 = arith.addf %216, %221 : vector<16x16xf32>
    %223 = vector.extract_strided_slice %5 {offsets = [3, 0], sizes = [16, 16], strides = [1, 1]} : vector<22x22xf32> to vector<16x16xf32>
    %224 = vector.broadcast %218 : f32 to vector<16x16xf32>
    %225 = arith.mulf %224, %223 : vector<16x16xf32>
    %226 = arith.addf %222, %225 : vector<16x16xf32>
    %c22 = arith.constant 22 : index
    %227 = memref.load %arg2[%c22] : memref<98xf32, #tpu.memory_space<smem>>
    %c71 = arith.constant 71 : index
    %228 = memref.load %arg2[%c71] : memref<98xf32, #tpu.memory_space<smem>>
    %229 = vector.extract_strided_slice %2 {offsets = [3, 1], sizes = [16, 16], strides = [1, 1]} : vector<22x22xf32> to vector<16x16xf32>
    %230 = vector.broadcast %227 : f32 to vector<16x16xf32>
    %231 = arith.mulf %230, %229 : vector<16x16xf32>
    %232 = arith.addf %226, %231 : vector<16x16xf32>
    %233 = vector.extract_strided_slice %5 {offsets = [3, 1], sizes = [16, 16], strides = [1, 1]} : vector<22x22xf32> to vector<16x16xf32>
    %234 = vector.broadcast %228 : f32 to vector<16x16xf32>
    %235 = arith.mulf %234, %233 : vector<16x16xf32>
    %236 = arith.addf %232, %235 : vector<16x16xf32>
    %c23 = arith.constant 23 : index
    %237 = memref.load %arg2[%c23] : memref<98xf32, #tpu.memory_space<smem>>
    %c72 = arith.constant 72 : index
    %238 = memref.load %arg2[%c72] : memref<98xf32, #tpu.memory_space<smem>>
    %239 = vector.extract_strided_slice %2 {offsets = [3, 2], sizes = [16, 16], strides = [1, 1]} : vector<22x22xf32> to vector<16x16xf32>
    %240 = vector.broadcast %237 : f32 to vector<16x16xf32>
    %241 = arith.mulf %240, %239 : vector<16x16xf32>
    %242 = arith.addf %236, %241 : vector<16x16xf32>
    %243 = vector.extract_strided_slice %5 {offsets = [3, 2], sizes = [16, 16], strides = [1, 1]} : vector<22x22xf32> to vector<16x16xf32>
    %244 = vector.broadcast %238 : f32 to vector<16x16xf32>
    %245 = arith.mulf %244, %243 : vector<16x16xf32>
    %246 = arith.addf %242, %245 : vector<16x16xf32>
    %c24 = arith.constant 24 : index
    %247 = memref.load %arg2[%c24] : memref<98xf32, #tpu.memory_space<smem>>
    %c73 = arith.constant 73 : index
    %248 = memref.load %arg2[%c73] : memref<98xf32, #tpu.memory_space<smem>>
    %249 = vector.extract_strided_slice %2 {offsets = [3, 3], sizes = [16, 16], strides = [1, 1]} : vector<22x22xf32> to vector<16x16xf32>
    %250 = vector.broadcast %247 : f32 to vector<16x16xf32>
    %251 = arith.mulf %250, %249 : vector<16x16xf32>
    %252 = arith.addf %246, %251 : vector<16x16xf32>
    %253 = vector.extract_strided_slice %5 {offsets = [3, 3], sizes = [16, 16], strides = [1, 1]} : vector<22x22xf32> to vector<16x16xf32>
    %254 = vector.broadcast %248 : f32 to vector<16x16xf32>
    %255 = arith.mulf %254, %253 : vector<16x16xf32>
    %256 = arith.addf %252, %255 : vector<16x16xf32>
    %c25 = arith.constant 25 : index
    %257 = memref.load %arg2[%c25] : memref<98xf32, #tpu.memory_space<smem>>
    %c74 = arith.constant 74 : index
    %258 = memref.load %arg2[%c74] : memref<98xf32, #tpu.memory_space<smem>>
    %259 = vector.extract_strided_slice %2 {offsets = [3, 4], sizes = [16, 16], strides = [1, 1]} : vector<22x22xf32> to vector<16x16xf32>
    %260 = vector.broadcast %257 : f32 to vector<16x16xf32>
    %261 = arith.mulf %260, %259 : vector<16x16xf32>
    %262 = arith.addf %256, %261 : vector<16x16xf32>
    %263 = vector.extract_strided_slice %5 {offsets = [3, 4], sizes = [16, 16], strides = [1, 1]} : vector<22x22xf32> to vector<16x16xf32>
    %264 = vector.broadcast %258 : f32 to vector<16x16xf32>
    %265 = arith.mulf %264, %263 : vector<16x16xf32>
    %266 = arith.addf %262, %265 : vector<16x16xf32>
    %c26 = arith.constant 26 : index
    %267 = memref.load %arg2[%c26] : memref<98xf32, #tpu.memory_space<smem>>
    %c75 = arith.constant 75 : index
    %268 = memref.load %arg2[%c75] : memref<98xf32, #tpu.memory_space<smem>>
    %269 = vector.extract_strided_slice %2 {offsets = [3, 5], sizes = [16, 16], strides = [1, 1]} : vector<22x22xf32> to vector<16x16xf32>
    %270 = vector.broadcast %267 : f32 to vector<16x16xf32>
    %271 = arith.mulf %270, %269 : vector<16x16xf32>
    %272 = arith.addf %266, %271 : vector<16x16xf32>
    %273 = vector.extract_strided_slice %5 {offsets = [3, 5], sizes = [16, 16], strides = [1, 1]} : vector<22x22xf32> to vector<16x16xf32>
    %274 = vector.broadcast %268 : f32 to vector<16x16xf32>
    %275 = arith.mulf %274, %273 : vector<16x16xf32>
    %276 = arith.addf %272, %275 : vector<16x16xf32>
    %c27 = arith.constant 27 : index
    %277 = memref.load %arg2[%c27] : memref<98xf32, #tpu.memory_space<smem>>
    %c76 = arith.constant 76 : index
    %278 = memref.load %arg2[%c76] : memref<98xf32, #tpu.memory_space<smem>>
    %279 = vector.extract_strided_slice %2 {offsets = [3, 6], sizes = [16, 16], strides = [1, 1]} : vector<22x22xf32> to vector<16x16xf32>
    %280 = vector.broadcast %277 : f32 to vector<16x16xf32>
    %281 = arith.mulf %280, %279 : vector<16x16xf32>
    %282 = arith.addf %276, %281 : vector<16x16xf32>
    %283 = vector.extract_strided_slice %5 {offsets = [3, 6], sizes = [16, 16], strides = [1, 1]} : vector<22x22xf32> to vector<16x16xf32>
    %284 = vector.broadcast %278 : f32 to vector<16x16xf32>
    %285 = arith.mulf %284, %283 : vector<16x16xf32>
    %286 = arith.addf %282, %285 : vector<16x16xf32>
    %c28 = arith.constant 28 : index
    %287 = memref.load %arg2[%c28] : memref<98xf32, #tpu.memory_space<smem>>
    %c77 = arith.constant 77 : index
    %288 = memref.load %arg2[%c77] : memref<98xf32, #tpu.memory_space<smem>>
    %289 = vector.extract_strided_slice %2 {offsets = [4, 0], sizes = [16, 16], strides = [1, 1]} : vector<22x22xf32> to vector<16x16xf32>
    %290 = vector.broadcast %287 : f32 to vector<16x16xf32>
    %291 = arith.mulf %290, %289 : vector<16x16xf32>
    %292 = arith.addf %286, %291 : vector<16x16xf32>
    %293 = vector.extract_strided_slice %5 {offsets = [4, 0], sizes = [16, 16], strides = [1, 1]} : vector<22x22xf32> to vector<16x16xf32>
    %294 = vector.broadcast %288 : f32 to vector<16x16xf32>
    %295 = arith.mulf %294, %293 : vector<16x16xf32>
    %296 = arith.addf %292, %295 : vector<16x16xf32>
    %c29 = arith.constant 29 : index
    %297 = memref.load %arg2[%c29] : memref<98xf32, #tpu.memory_space<smem>>
    %c78 = arith.constant 78 : index
    %298 = memref.load %arg2[%c78] : memref<98xf32, #tpu.memory_space<smem>>
    %299 = vector.extract_strided_slice %2 {offsets = [4, 1], sizes = [16, 16], strides = [1, 1]} : vector<22x22xf32> to vector<16x16xf32>
    %300 = vector.broadcast %297 : f32 to vector<16x16xf32>
    %301 = arith.mulf %300, %299 : vector<16x16xf32>
    %302 = arith.addf %296, %301 : vector<16x16xf32>
    %303 = vector.extract_strided_slice %5 {offsets = [4, 1], sizes = [16, 16], strides = [1, 1]} : vector<22x22xf32> to vector<16x16xf32>
    %304 = vector.broadcast %298 : f32 to vector<16x16xf32>
    %305 = arith.mulf %304, %303 : vector<16x16xf32>
    %306 = arith.addf %302, %305 : vector<16x16xf32>
    %c30 = arith.constant 30 : index
    %307 = memref.load %arg2[%c30] : memref<98xf32, #tpu.memory_space<smem>>
    %c79 = arith.constant 79 : index
    %308 = memref.load %arg2[%c79] : memref<98xf32, #tpu.memory_space<smem>>
    %309 = vector.extract_strided_slice %2 {offsets = [4, 2], sizes = [16, 16], strides = [1, 1]} : vector<22x22xf32> to vector<16x16xf32>
    %310 = vector.broadcast %307 : f32 to vector<16x16xf32>
    %311 = arith.mulf %310, %309 : vector<16x16xf32>
    %312 = arith.addf %306, %311 : vector<16x16xf32>
    %313 = vector.extract_strided_slice %5 {offsets = [4, 2], sizes = [16, 16], strides = [1, 1]} : vector<22x22xf32> to vector<16x16xf32>
    %314 = vector.broadcast %308 : f32 to vector<16x16xf32>
    %315 = arith.mulf %314, %313 : vector<16x16xf32>
    %316 = arith.addf %312, %315 : vector<16x16xf32>
    %c31 = arith.constant 31 : index
    %317 = memref.load %arg2[%c31] : memref<98xf32, #tpu.memory_space<smem>>
    %c80 = arith.constant 80 : index
    %318 = memref.load %arg2[%c80] : memref<98xf32, #tpu.memory_space<smem>>
    %319 = vector.extract_strided_slice %2 {offsets = [4, 3], sizes = [16, 16], strides = [1, 1]} : vector<22x22xf32> to vector<16x16xf32>
    %320 = vector.broadcast %317 : f32 to vector<16x16xf32>
    %321 = arith.mulf %320, %319 : vector<16x16xf32>
    %322 = arith.addf %316, %321 : vector<16x16xf32>
    %323 = vector.extract_strided_slice %5 {offsets = [4, 3], sizes = [16, 16], strides = [1, 1]} : vector<22x22xf32> to vector<16x16xf32>
    %324 = vector.broadcast %318 : f32 to vector<16x16xf32>
    %325 = arith.mulf %324, %323 : vector<16x16xf32>
    %326 = arith.addf %322, %325 : vector<16x16xf32>
    %c32 = arith.constant 32 : index
    %327 = memref.load %arg2[%c32] : memref<98xf32, #tpu.memory_space<smem>>
    %c81 = arith.constant 81 : index
    %328 = memref.load %arg2[%c81] : memref<98xf32, #tpu.memory_space<smem>>
    %329 = vector.extract_strided_slice %2 {offsets = [4, 4], sizes = [16, 16], strides = [1, 1]} : vector<22x22xf32> to vector<16x16xf32>
    %330 = vector.broadcast %327 : f32 to vector<16x16xf32>
    %331 = arith.mulf %330, %329 : vector<16x16xf32>
    %332 = arith.addf %326, %331 : vector<16x16xf32>
    %333 = vector.extract_strided_slice %5 {offsets = [4, 4], sizes = [16, 16], strides = [1, 1]} : vector<22x22xf32> to vector<16x16xf32>
    %334 = vector.broadcast %328 : f32 to vector<16x16xf32>
    %335 = arith.mulf %334, %333 : vector<16x16xf32>
    %336 = arith.addf %332, %335 : vector<16x16xf32>
    %c33 = arith.constant 33 : index
    %337 = memref.load %arg2[%c33] : memref<98xf32, #tpu.memory_space<smem>>
    %c82 = arith.constant 82 : index
    %338 = memref.load %arg2[%c82] : memref<98xf32, #tpu.memory_space<smem>>
    %339 = vector.extract_strided_slice %2 {offsets = [4, 5], sizes = [16, 16], strides = [1, 1]} : vector<22x22xf32> to vector<16x16xf32>
    %340 = vector.broadcast %337 : f32 to vector<16x16xf32>
    %341 = arith.mulf %340, %339 : vector<16x16xf32>
    %342 = arith.addf %336, %341 : vector<16x16xf32>
    %343 = vector.extract_strided_slice %5 {offsets = [4, 5], sizes = [16, 16], strides = [1, 1]} : vector<22x22xf32> to vector<16x16xf32>
    %344 = vector.broadcast %338 : f32 to vector<16x16xf32>
    %345 = arith.mulf %344, %343 : vector<16x16xf32>
    %346 = arith.addf %342, %345 : vector<16x16xf32>
    %c34 = arith.constant 34 : index
    %347 = memref.load %arg2[%c34] : memref<98xf32, #tpu.memory_space<smem>>
    %c83 = arith.constant 83 : index
    %348 = memref.load %arg2[%c83] : memref<98xf32, #tpu.memory_space<smem>>
    %349 = vector.extract_strided_slice %2 {offsets = [4, 6], sizes = [16, 16], strides = [1, 1]} : vector<22x22xf32> to vector<16x16xf32>
    %350 = vector.broadcast %347 : f32 to vector<16x16xf32>
    %351 = arith.mulf %350, %349 : vector<16x16xf32>
    %352 = arith.addf %346, %351 : vector<16x16xf32>
    %353 = vector.extract_strided_slice %5 {offsets = [4, 6], sizes = [16, 16], strides = [1, 1]} : vector<22x22xf32> to vector<16x16xf32>
    %354 = vector.broadcast %348 : f32 to vector<16x16xf32>
    %355 = arith.mulf %354, %353 : vector<16x16xf32>
    %356 = arith.addf %352, %355 : vector<16x16xf32>
    %c35 = arith.constant 35 : index
    %357 = memref.load %arg2[%c35] : memref<98xf32, #tpu.memory_space<smem>>
    %c84 = arith.constant 84 : index
    %358 = memref.load %arg2[%c84] : memref<98xf32, #tpu.memory_space<smem>>
    %359 = vector.extract_strided_slice %2 {offsets = [5, 0], sizes = [16, 16], strides = [1, 1]} : vector<22x22xf32> to vector<16x16xf32>
    %360 = vector.broadcast %357 : f32 to vector<16x16xf32>
    %361 = arith.mulf %360, %359 : vector<16x16xf32>
    %362 = arith.addf %356, %361 : vector<16x16xf32>
    %363 = vector.extract_strided_slice %5 {offsets = [5, 0], sizes = [16, 16], strides = [1, 1]} : vector<22x22xf32> to vector<16x16xf32>
    %364 = vector.broadcast %358 : f32 to vector<16x16xf32>
    %365 = arith.mulf %364, %363 : vector<16x16xf32>
    %366 = arith.addf %362, %365 : vector<16x16xf32>
    %c36 = arith.constant 36 : index
    %367 = memref.load %arg2[%c36] : memref<98xf32, #tpu.memory_space<smem>>
    %c85 = arith.constant 85 : index
    %368 = memref.load %arg2[%c85] : memref<98xf32, #tpu.memory_space<smem>>
    %369 = vector.extract_strided_slice %2 {offsets = [5, 1], sizes = [16, 16], strides = [1, 1]} : vector<22x22xf32> to vector<16x16xf32>
    %370 = vector.broadcast %367 : f32 to vector<16x16xf32>
    %371 = arith.mulf %370, %369 : vector<16x16xf32>
    %372 = arith.addf %366, %371 : vector<16x16xf32>
    %373 = vector.extract_strided_slice %5 {offsets = [5, 1], sizes = [16, 16], strides = [1, 1]} : vector<22x22xf32> to vector<16x16xf32>
    %374 = vector.broadcast %368 : f32 to vector<16x16xf32>
    %375 = arith.mulf %374, %373 : vector<16x16xf32>
    %376 = arith.addf %372, %375 : vector<16x16xf32>
    %c37 = arith.constant 37 : index
    %377 = memref.load %arg2[%c37] : memref<98xf32, #tpu.memory_space<smem>>
    %c86 = arith.constant 86 : index
    %378 = memref.load %arg2[%c86] : memref<98xf32, #tpu.memory_space<smem>>
    %379 = vector.extract_strided_slice %2 {offsets = [5, 2], sizes = [16, 16], strides = [1, 1]} : vector<22x22xf32> to vector<16x16xf32>
    %380 = vector.broadcast %377 : f32 to vector<16x16xf32>
    %381 = arith.mulf %380, %379 : vector<16x16xf32>
    %382 = arith.addf %376, %381 : vector<16x16xf32>
    %383 = vector.extract_strided_slice %5 {offsets = [5, 2], sizes = [16, 16], strides = [1, 1]} : vector<22x22xf32> to vector<16x16xf32>
    %384 = vector.broadcast %378 : f32 to vector<16x16xf32>
    %385 = arith.mulf %384, %383 : vector<16x16xf32>
    %386 = arith.addf %382, %385 : vector<16x16xf32>
    %c38 = arith.constant 38 : index
    %387 = memref.load %arg2[%c38] : memref<98xf32, #tpu.memory_space<smem>>
    %c87 = arith.constant 87 : index
    %388 = memref.load %arg2[%c87] : memref<98xf32, #tpu.memory_space<smem>>
    %389 = vector.extract_strided_slice %2 {offsets = [5, 3], sizes = [16, 16], strides = [1, 1]} : vector<22x22xf32> to vector<16x16xf32>
    %390 = vector.broadcast %387 : f32 to vector<16x16xf32>
    %391 = arith.mulf %390, %389 : vector<16x16xf32>
    %392 = arith.addf %386, %391 : vector<16x16xf32>
    %393 = vector.extract_strided_slice %5 {offsets = [5, 3], sizes = [16, 16], strides = [1, 1]} : vector<22x22xf32> to vector<16x16xf32>
    %394 = vector.broadcast %388 : f32 to vector<16x16xf32>
    %395 = arith.mulf %394, %393 : vector<16x16xf32>
    %396 = arith.addf %392, %395 : vector<16x16xf32>
    %c39 = arith.constant 39 : index
    %397 = memref.load %arg2[%c39] : memref<98xf32, #tpu.memory_space<smem>>
    %c88 = arith.constant 88 : index
    %398 = memref.load %arg2[%c88] : memref<98xf32, #tpu.memory_space<smem>>
    %399 = vector.extract_strided_slice %2 {offsets = [5, 4], sizes = [16, 16], strides = [1, 1]} : vector<22x22xf32> to vector<16x16xf32>
    %400 = vector.broadcast %397 : f32 to vector<16x16xf32>
    %401 = arith.mulf %400, %399 : vector<16x16xf32>
    %402 = arith.addf %396, %401 : vector<16x16xf32>
    %403 = vector.extract_strided_slice %5 {offsets = [5, 4], sizes = [16, 16], strides = [1, 1]} : vector<22x22xf32> to vector<16x16xf32>
    %404 = vector.broadcast %398 : f32 to vector<16x16xf32>
    %405 = arith.mulf %404, %403 : vector<16x16xf32>
    %406 = arith.addf %402, %405 : vector<16x16xf32>
    %c40 = arith.constant 40 : index
    %407 = memref.load %arg2[%c40] : memref<98xf32, #tpu.memory_space<smem>>
    %c89 = arith.constant 89 : index
    %408 = memref.load %arg2[%c89] : memref<98xf32, #tpu.memory_space<smem>>
    %409 = vector.extract_strided_slice %2 {offsets = [5, 5], sizes = [16, 16], strides = [1, 1]} : vector<22x22xf32> to vector<16x16xf32>
    %410 = vector.broadcast %407 : f32 to vector<16x16xf32>
    %411 = arith.mulf %410, %409 : vector<16x16xf32>
    %412 = arith.addf %406, %411 : vector<16x16xf32>
    %413 = vector.extract_strided_slice %5 {offsets = [5, 5], sizes = [16, 16], strides = [1, 1]} : vector<22x22xf32> to vector<16x16xf32>
    %414 = vector.broadcast %408 : f32 to vector<16x16xf32>
    %415 = arith.mulf %414, %413 : vector<16x16xf32>
    %416 = arith.addf %412, %415 : vector<16x16xf32>
    %c41 = arith.constant 41 : index
    %417 = memref.load %arg2[%c41] : memref<98xf32, #tpu.memory_space<smem>>
    %c90 = arith.constant 90 : index
    %418 = memref.load %arg2[%c90] : memref<98xf32, #tpu.memory_space<smem>>
    %419 = vector.extract_strided_slice %2 {offsets = [5, 6], sizes = [16, 16], strides = [1, 1]} : vector<22x22xf32> to vector<16x16xf32>
    %420 = vector.broadcast %417 : f32 to vector<16x16xf32>
    %421 = arith.mulf %420, %419 : vector<16x16xf32>
    %422 = arith.addf %416, %421 : vector<16x16xf32>
    %423 = vector.extract_strided_slice %5 {offsets = [5, 6], sizes = [16, 16], strides = [1, 1]} : vector<22x22xf32> to vector<16x16xf32>
    %424 = vector.broadcast %418 : f32 to vector<16x16xf32>
    %425 = arith.mulf %424, %423 : vector<16x16xf32>
    %426 = arith.addf %422, %425 : vector<16x16xf32>
    %c42 = arith.constant 42 : index
    %427 = memref.load %arg2[%c42] : memref<98xf32, #tpu.memory_space<smem>>
    %c91 = arith.constant 91 : index
    %428 = memref.load %arg2[%c91] : memref<98xf32, #tpu.memory_space<smem>>
    %429 = vector.extract_strided_slice %2 {offsets = [6, 0], sizes = [16, 16], strides = [1, 1]} : vector<22x22xf32> to vector<16x16xf32>
    %430 = vector.broadcast %427 : f32 to vector<16x16xf32>
    %431 = arith.mulf %430, %429 : vector<16x16xf32>
    %432 = arith.addf %426, %431 : vector<16x16xf32>
    %433 = vector.extract_strided_slice %5 {offsets = [6, 0], sizes = [16, 16], strides = [1, 1]} : vector<22x22xf32> to vector<16x16xf32>
    %434 = vector.broadcast %428 : f32 to vector<16x16xf32>
    %435 = arith.mulf %434, %433 : vector<16x16xf32>
    %436 = arith.addf %432, %435 : vector<16x16xf32>
    %c43 = arith.constant 43 : index
    %437 = memref.load %arg2[%c43] : memref<98xf32, #tpu.memory_space<smem>>
    %c92 = arith.constant 92 : index
    %438 = memref.load %arg2[%c92] : memref<98xf32, #tpu.memory_space<smem>>
    %439 = vector.extract_strided_slice %2 {offsets = [6, 1], sizes = [16, 16], strides = [1, 1]} : vector<22x22xf32> to vector<16x16xf32>
    %440 = vector.broadcast %437 : f32 to vector<16x16xf32>
    %441 = arith.mulf %440, %439 : vector<16x16xf32>
    %442 = arith.addf %436, %441 : vector<16x16xf32>
    %443 = vector.extract_strided_slice %5 {offsets = [6, 1], sizes = [16, 16], strides = [1, 1]} : vector<22x22xf32> to vector<16x16xf32>
    %444 = vector.broadcast %438 : f32 to vector<16x16xf32>
    %445 = arith.mulf %444, %443 : vector<16x16xf32>
    %446 = arith.addf %442, %445 : vector<16x16xf32>
    %c44 = arith.constant 44 : index
    %447 = memref.load %arg2[%c44] : memref<98xf32, #tpu.memory_space<smem>>
    %c93 = arith.constant 93 : index
    %448 = memref.load %arg2[%c93] : memref<98xf32, #tpu.memory_space<smem>>
    %449 = vector.extract_strided_slice %2 {offsets = [6, 2], sizes = [16, 16], strides = [1, 1]} : vector<22x22xf32> to vector<16x16xf32>
    %450 = vector.broadcast %447 : f32 to vector<16x16xf32>
    %451 = arith.mulf %450, %449 : vector<16x16xf32>
    %452 = arith.addf %446, %451 : vector<16x16xf32>
    %453 = vector.extract_strided_slice %5 {offsets = [6, 2], sizes = [16, 16], strides = [1, 1]} : vector<22x22xf32> to vector<16x16xf32>
    %454 = vector.broadcast %448 : f32 to vector<16x16xf32>
    %455 = arith.mulf %454, %453 : vector<16x16xf32>
    %456 = arith.addf %452, %455 : vector<16x16xf32>
    %c45 = arith.constant 45 : index
    %457 = memref.load %arg2[%c45] : memref<98xf32, #tpu.memory_space<smem>>
    %c94 = arith.constant 94 : index
    %458 = memref.load %arg2[%c94] : memref<98xf32, #tpu.memory_space<smem>>
    %459 = vector.extract_strided_slice %2 {offsets = [6, 3], sizes = [16, 16], strides = [1, 1]} : vector<22x22xf32> to vector<16x16xf32>
    %460 = vector.broadcast %457 : f32 to vector<16x16xf32>
    %461 = arith.mulf %460, %459 : vector<16x16xf32>
    %462 = arith.addf %456, %461 : vector<16x16xf32>
    %463 = vector.extract_strided_slice %5 {offsets = [6, 3], sizes = [16, 16], strides = [1, 1]} : vector<22x22xf32> to vector<16x16xf32>
    %464 = vector.broadcast %458 : f32 to vector<16x16xf32>
    %465 = arith.mulf %464, %463 : vector<16x16xf32>
    %466 = arith.addf %462, %465 : vector<16x16xf32>
    %c46 = arith.constant 46 : index
    %467 = memref.load %arg2[%c46] : memref<98xf32, #tpu.memory_space<smem>>
    %c95 = arith.constant 95 : index
    %468 = memref.load %arg2[%c95] : memref<98xf32, #tpu.memory_space<smem>>
    %469 = vector.extract_strided_slice %2 {offsets = [6, 4], sizes = [16, 16], strides = [1, 1]} : vector<22x22xf32> to vector<16x16xf32>
    %470 = vector.broadcast %467 : f32 to vector<16x16xf32>
    %471 = arith.mulf %470, %469 : vector<16x16xf32>
    %472 = arith.addf %466, %471 : vector<16x16xf32>
    %473 = vector.extract_strided_slice %5 {offsets = [6, 4], sizes = [16, 16], strides = [1, 1]} : vector<22x22xf32> to vector<16x16xf32>
    %474 = vector.broadcast %468 : f32 to vector<16x16xf32>
    %475 = arith.mulf %474, %473 : vector<16x16xf32>
    %476 = arith.addf %472, %475 : vector<16x16xf32>
    %c47 = arith.constant 47 : index
    %477 = memref.load %arg2[%c47] : memref<98xf32, #tpu.memory_space<smem>>
    %c96 = arith.constant 96 : index
    %478 = memref.load %arg2[%c96] : memref<98xf32, #tpu.memory_space<smem>>
    %479 = vector.extract_strided_slice %2 {offsets = [6, 5], sizes = [16, 16], strides = [1, 1]} : vector<22x22xf32> to vector<16x16xf32>
    %480 = vector.broadcast %477 : f32 to vector<16x16xf32>
    %481 = arith.mulf %480, %479 : vector<16x16xf32>
    %482 = arith.addf %476, %481 : vector<16x16xf32>
    %483 = vector.extract_strided_slice %5 {offsets = [6, 5], sizes = [16, 16], strides = [1, 1]} : vector<22x22xf32> to vector<16x16xf32>
    %484 = vector.broadcast %478 : f32 to vector<16x16xf32>
    %485 = arith.mulf %484, %483 : vector<16x16xf32>
    %486 = arith.addf %482, %485 : vector<16x16xf32>
    %c48 = arith.constant 48 : index
    %487 = memref.load %arg2[%c48] : memref<98xf32, #tpu.memory_space<smem>>
    %c97 = arith.constant 97 : index
    %488 = memref.load %arg2[%c97] : memref<98xf32, #tpu.memory_space<smem>>
    %489 = vector.extract_strided_slice %2 {offsets = [6, 6], sizes = [16, 16], strides = [1, 1]} : vector<22x22xf32> to vector<16x16xf32>
    %490 = vector.broadcast %487 : f32 to vector<16x16xf32>
    %491 = arith.mulf %490, %489 : vector<16x16xf32>
    %492 = arith.addf %486, %491 : vector<16x16xf32>
    %493 = vector.extract_strided_slice %5 {offsets = [6, 6], sizes = [16, 16], strides = [1, 1]} : vector<22x22xf32> to vector<16x16xf32>
    %494 = vector.broadcast %488 : f32 to vector<16x16xf32>
    %495 = arith.mulf %494, %493 : vector<16x16xf32>
    %496 = arith.addf %492, %495 : vector<16x16xf32>
    %c0_7 = arith.constant 0 : index
    %497 = memref.load %arg3[%c0_7] : memref<1xf32, #tpu.memory_space<smem>>
    %498 = vector.broadcast %497 : f32 to vector<16x16xf32>
    %499 = arith.addf %496, %498 : vector<16x16xf32>
    %cst_8 = arith.constant 0.000000e+00 : f32
    %500 = vector.broadcast %cst_8 : f32 to vector<16x16xf32>
    %501 = arith.subf %500, %499 : vector<16x16xf32>
    %502 = math.exp %501 : vector<16x16xf32>
    %cst_9 = arith.constant 1.000000e+00 : f32
    %503 = vector.broadcast %cst_9 : f32 to vector<16x16xf32>
    %504 = arith.addf %503, %502 : vector<16x16xf32>
    %cst_10 = arith.constant 1.000000e+00 : f32
    %505 = vector.broadcast %cst_10 : f32 to vector<16x16xf32>
    %506 = arith.divf %505, %504 : vector<16x16xf32>
    %507 = vector.extract_strided_slice %1 {offsets = [0, 3, 3], sizes = [4, 16, 16], strides = [1, 1, 1]} : vector<4x22x22xf32> to vector<4x16x16xf32>
    %508 = vector.shape_cast %506 : vector<16x16xf32> to vector<1x16x16xf32>
    %509 = vector.broadcast %508 : vector<1x16x16xf32> to vector<4x16x16xf32>
    %510 = arith.mulf %507, %509 : vector<4x16x16xf32>
    %511 = vector.shape_cast %510 : vector<4x16x16xf32> to vector<1x4x16x16xf32>
    %c0_11 = arith.constant 0 : index
    %c0_12 = arith.constant 0 : index
    %c0_13 = arith.constant 0 : index
    %c0_14 = arith.constant 0 : index
    %512 = vector.load %arg4[%c0_11, %c0_12, %c0_13, %c0_14] : memref<1x4x16x16xf32, #tpu.memory_space<vmem>>, vector<1x4x16x16xf32>
    tpu.vector_store %arg4[%c0_11, %c0_12, %c0_13, %c0_14], %511 {strides = array<i32>} : memref<1x4x16x16xf32, #tpu.memory_space<vmem>>, vector<1x4x16x16xf32>,
    return
  }
  func.func @transform_0(%arg0: i32) -> (i32, i32, i32, i32) {
    %c0_i32 = arith.constant 0 : i32
    %c0_i32_0 = arith.constant 0 : i32
    %c0_i32_1 = arith.constant 0 : i32
    %c0_i32_2 = arith.constant 0 : i32
    return %arg0, %c0_i32, %c0_i32_0, %c0_i32_1 : i32, i32, i32, i32
  }
  func.func @transform_1(%arg0: i32) -> i32 {
    %c0_i32 = arith.constant 0 : i32
    %c0_i32_0 = arith.constant 0 : i32
    return %c0_i32 : i32
  }
  func.func @transform_2(%arg0: i32) -> i32 {
    %c0_i32 = arith.constant 0 : i32
    %c0_i32_0 = arith.constant 0 : i32
    return %c0_i32 : i32
  }
  func.func @transform_3(%arg0: i32) -> (i32, i32, i32, i32) {
    %c0_i32 = arith.constant 0 : i32
    %c0_i32_0 = arith.constant 0 : i32
    %c0_i32_1 = arith.constant 0 : i32
    %c0_i32_2 = arith.constant 0 : i32
    return %arg0, %c0_i32, %c0_i32_0, %c0_i32_1 : i32, i32, i32, i32
  }
}

</mosaic_0001>

<bundles_post_ra>
// kernel: sam_forward.1
= control target key start
LH: loop header
LB: loop body
LE: loop exit
PB: predicated region body
PF: predicated region fallthrough
CT: control target
= control target key end

     0   :  { %s3939_s0 = inlined_call_operand.vmem [shape: f32[2,4,22,22], index: 0, kind: input, shape index: {}]   ;;  %s3940_s1 = inlined_call_operand.vmem [shape: f32[98], index: 1, kind: input, shape index: {}]   ;;  %s3941_s2 = inlined_call_operand.<no memory space> [shape: f32[1], index: 2, kind: input, shape index: {}]   ;;  %s3942_s3 = inlined_call_operand.hbm [shape: f32[2,4,16,16], index: 3, kind: output, shape index: {}]  }
   0x1   :  { %8 = sst [smem:[#allocation2]] %s3941_s2 }
   0x2   :  { %9 = vsyncpa [#allocation5], 0 }
   0x3   :  { %10 = vsyncpa [#allocation4], 0 }
   0x4   :  { %12 = vsyncpa [#allocation4 + $0x1], 0  ;;  %s2647_s14 = smov 0   ;;  %s2649_s15 = smov 0  }
   0x5   :  { %s2651_s16 = smov 0   ;;  %s2653_s17 = smov 0  }
   0x6 LB: > { %s2668_s2 = sadd.s32 4294967295, %s2611_s17   ;;  %s2339_s18 = sadd.s32 4294967294, %s2611_s17   ;;  %s2611_s17 = sphi %s2653_s17, %s3949_s17   ;;  %s2607_s16 = sphi %s2651_s16, %s3948_s16   ;;  %s2603_s15 = sphi %s2649_s15, %s3947_s15   ;;  %s2599_s14 = sphi %s2647_s14, %s3946_s14  }
   0x7   : > { %s2672_s19 = sadd.s32 1, %s2611_s17   ;;  %s93_s20 = sadd.s32 1, %s2607_s16 }
   0x8   : > { %s90_s21 = ssub.s32 %s2611_s17, %s2672_s19  ;;  %p103_p0 = scmp.ne.s32.totalorder %s2607_s16, %s2603_s15 }
   0x9   : > { %p91_p1 = scmp.eq.s32.totalorder %s90_s21, 0  ;;  %p104_p2 = scmp.eq.s32.totalorder %s2668_s2, 1 }
   0xa   : > { %p109_p3 = scmp.ne.s32.totalorder %s2603_s15, %s2599_s14  ;;  %p110_p4 = scmp.eq.s32.totalorder %s2339_s18, 1 }
   0xb   : > { %s2683_s22 = scalar_select %p91_p1, %s2607_s16, %s93_s20  }
   0xc   : > { %p2685_p5 = por %p104_p2, %p103_p0  ;;  %p2689_p6 = por %p110_p4, %p109_p3 }
   0xd   : > { %p2340_p7 = scmp.ge.s32.totalorder %s2611_s17, 1  ;;  %p117_p8 = scmp.lt.s32.totalorder %s2611_s17, 3 }
   0xe   : > { %p2465_p9 = scmp.eq.s32.totalorder %s2668_s2, 0  ;;  %s130_s28 = sshll.u32 %s3940_s1, 4  ;;  %s131_s28 = int_to_ptr.vmem [resolvable:$true] %s130_s28 }
   0xf   : > { %p2696_p10 = pnand %p2340_p7, %p117_p8  ;;  %s2530_s29 = scalar_lea.vmem %s131_s28, 16 }
  0x10   : > { %p2531_p13 = scmp.ne.s32.totalorder %s131_s28, %s2530_s29  ;;  %p2538_p3 = scmp.lt.s32.totalorder %s131_s28, %s131_s28 }
  0x11   : > { %p2457_p11 = pneg %p2696_p10  ;;  %p2539_p4 = scmp.lt.s32.totalorder %s2530_s29, %s2530_s29 }
  0x13   : > { %p2458_p12 = pnand %p2465_p9, %p2457_p11  ;;  %p2540_p7 = por %p2539_p4, %p2538_p3 }
  0x15   : > { %p2532_p0 = pneg %p2458_p12 }
  0x17   : > { %p2533_p1 = pnand %p2532_p0, %p2531_p13 }
  0x19   : > { %p2534_p2 = pneg %p2533_p1 }
  0x1b   : > { %p2541_p8 = pnand %p2540_p7, %p2534_p2 }
  0x1d   : > { %2544 = shalt.err (!%p2541_p8)
}
  0x1e   : > { %s2613_s30 = smov [#allocation3]   ;;  %154 = sbr.rel (%p2696_p10) target bundleno = 807 (0x327), region = 32 }
  0x1f   : > { %2460 = dma.vmem_to_smem (!%p2458_p12), %s131_s28, 16, %s2613_s30, [#allocation5]  }
  0x25   : > { %2590 = dma.done.wait (%p2465_p9), [#allocation5], 16  }
  0x26   : > { %2592 = vsyncadd (%p2465_p9), [#allocation5], 4294967280 }
  0x27   : > { %160 = sfence }
  0x28   : > { %p179_p11 = scmp.lt.s32.totalorder %s2668_s2, 1  ;;  %s2714_s4 = sld [smem:[#allocation3 + $0x2]]  ;;  %vm196_vm0 = vcmask 179200   ;;  %vm211_vm1 = vcmask 177152   ;;  %vm433_vm2 = vcmask 1046528   ;;  %vm720_vm3 = vcmask 1045504  }
  0x29   : > { %s2717_s7 = sld [smem:[#allocation3 + $0x1]]  ;;  %s2719_s8 = sld [smem:[#allocation3 + $0x3]]  ;;  %vm1007_vm4 = vcmask 1044480   ;;  %vm1294_vm5 = vcmask 1043456   ;;  %vm1581_vm6 = vcmask 1042432   ;;  %vm1868_vm7 = vcmask 1041408  }
  0x2a   : > { %s180_s5 = scalar_select %p179_p11, %s2668_s2, 1  ;;  %vm2236_vm8 = vcmask 130051   ;;  %vm2240_vm9 = vcmask 124928   ;;  %vm2238_vm10 = vcmask 130048  }
  0x2b   : > { %s2744_s12 = sld [smem:[#allocation3 + $0x32]]  ;;  %s2614_s13 = smov 126  }
  0x2c   : > { %s2450_s6 = smul.u32 96, %s180_s5  ;;  %s2615_s18 = smov 127  }
  0x2d   : > { %s2351_s20 = sld [smem:[#allocation3 + $0x33]]  ;;  %s2616_s21 = smov 125  }
  0x2e   : > { %s2724_s11 = scalar_lea.vmem %s3939_s0, %s2450_s6  ;;  %v286_v9 = vstv %s2714_s4  ;;  %s2353_s25 = sld [smem:[#allocation3 + $0x34]] }
  0x2f   : > { %v185_v0 = vld [vmem:[%s2724_s11 + $0x8] sm:$0xff]  ;;  %v187_v1 = vld [vmem:[%s2724_s11 + $0x18] sm:$0xff]  ;;  %v188_v2 = vld [vmem:[%s2724_s11 + $0x20] sm:$0xff]  ;;  %v258_v25 = vstv %s2717_s7  ;;  %s2354_s26 = sld [smem:[#allocation3 + $0x4]]  ;;  %s2355_s27 = sld [smem:[#allocation3 + $0x35]] }
  0x30   : > { %v190_v3 = vld [vmem:[%s2724_s11 + $0x30] sm:$0xff]  ;;  %v191_v4 = vld [vmem:[%s2724_s11 + $0x38] sm:$0xff]  ;;  %v193_v5 = vld [vmem:[%s2724_s11 + $0x48] sm:$0xff]  ;;  %v198_v6 = vsel %vm196_vm0, %v187_v1, -inf  ;;  %v204_v7 = vsel %vm196_vm0, %v185_v0, -inf  ;;  %v205_v8 = vsel %vm196_vm0, %v188_v2, -inf  ;;  %v314_v29 = vstv %s2719_s8 }
  0x31   : > { %v194_v10 = vld [vmem:[%s2724_s11 + $0x50] sm:$0xff]  ;;  %v199_v11 = vsel %vm196_vm0, %v190_v3, -inf  ;;  %v201_v12 = vsel %vm196_vm0, %v193_v5, -inf  ;;  %v206_v13 = vsel %vm196_vm0, %v191_v4, -inf  ;;  %v226_v14 = vsel %vm196_vm0, %v185_v0, 0.0  ;;  %v184_v15 = vld [vmem:[%s2724_s11] sm:$0xff] }
  0x32   : > { %v202_v16 = vmax.f32 %v198_v6, %v201_v12  ;;  %v207_v17 = vmax.f32 %v204_v7, %v206_v13  ;;  %v208_v18 = vsel %vm196_vm0, %v194_v10, -inf  ;;  %v227_v19 = vsel %vm196_vm0, %v188_v2, 0.0  ;;  %s2786_s28 = sld [smem:[#allocation3 + $0x5]]  ;;  %v186_v57 = vld [vmem:[%s2724_s11 + $0x10] sm:$0x3f]  ;;  %s2792_s29 = sld [smem:[#allocation3 + $0x36]] }
  0x33   : > { %v209_v20 = vmax.f32 %v205_v8, %v208_v18  ;;  %v197_v21 = vsel %vm196_vm0, %v184_v15, -inf  ;;  %v219_v22 = vsel %vm196_vm0, %v184_v15, 0.0  ;;  %v220_v23 = vsel %vm196_vm0, %v187_v1, 0.0  ;;  %v189_v58 = vld [vmem:[%s2724_s11 + $0x28] sm:$0x3f]  ;;  %s2617_s30 = smov 124  }
  0x34   : > { %v200_v24 = vmax.f32 %v197_v21, %v199_v11  ;;  %v221_v26 = vadd.f32 %v220_v23, %v219_v22  ;;  %v222_v27 = vsel %vm196_vm0, %v190_v3, 0.0  ;;  %v224_v30 = vsel %vm196_vm0, %v193_v5, 0.0  ;;  %v192_v0 = vld [vmem:[%s2724_s11 + $0x40] sm:$0x3f]  ;;  %v195_v1 = vld [vmem:[%s2724_s11 + $0x58] sm:$0x3f] }
  0x35   : > { %v2751_v28 = vmax.f32 %v207_v17, %v209_v20  ;;  %v228_v31 = vadd.f32 %v227_v19, %v226_v14  ;;  %v229_v34 = vsel %vm196_vm0, %v191_v4, 0.0  ;;  %v231_v35 = vsel %vm196_vm0, %v194_v10, 0.0  ;;  %s2802_s4 = sld [smem:[#allocation3 + $0x6]]  ;;  %s2362_s5 = sld [smem:[#allocation3 + $0x8]] }
  0x36   : > { %v2755_v32 = vmax.f32 %v200_v24, %v202_v16  ;;  %v223_v33 = vadd.f32 %v222_v27, %v221_v26  ;;  %v271_v44 = vstv %s2744_s12  ;;  %v299_v50 = vstv %s2351_s20  ;;  %s2359_s6 = sld [smem:[#allocation3 + $0x37]]  ;;  %s2363_s7 = sld [smem:[#allocation3 + $0x39]] }
  0x37   : > { %v288_v36 = vmul.f32 %v286_v9, %v2751_v28  ;;  %v230_v37 = vadd.f32 %v229_v34, %v228_v31  ;;  %v316_v40 = vmul.f32 %v314_v29, %v2751_v28  ;;  %v260_v42 = vmul.f32 %v258_v25, %v2751_v28  ;;  %s2618_s8 = smov 123   ;;  %s2364_s9 = sld [smem:[#allocation3 + $0x9]] }
  0x38   : > { %v259_v38 = vmul.f32 %v258_v25, %v2755_v32  ;;  %v225_v39 = vadd.f32 %v224_v30, %v223_v33  ;;  %v287_v47 = vmul.f32 %v286_v9, %v2755_v32  ;;  %v315_v49 = vmul.f32 %v314_v29, %v2755_v32  ;;  %s2365_s10 = sld [smem:[#allocation3 + $0x3a]]  ;;  %s2619_s12 = smov 122  }
  0x39   : > { %293 = vrot.lane.b32.xlu1 %v288_v36, %s2614_s13  ;;  %v232_v41 = vadd.f32 %v231_v35, %v230_v37  ;;  %v327_v53 = vstv %s2353_s25  ;;  %v342_v56 = vstv %s2354_s26  ;;  %v355_v61 = vstv %s2355_s27  ;;  %s2366_s20 = sld [smem:[#allocation3 + $0xa]]  ;;  %s2367_s25 = sld [smem:[#allocation3 + $0x3b]] }
  0x3a   : > { %263 = vrot.lane.b32.xlu0 %v259_v38, %s2615_s18  ;;  %v2765_v43 = vmul.f32 0.25, %v225_v39  ;;  %v344_v59 = vmul.f32 %v342_v56, %v2751_v28  ;;  %v343_v60 = vmul.f32 %v342_v56, %v2755_v32  ;;  %v233_v62 = vsel %vm211_vm1, %v186_v57, 0.0  ;;  %s2368_s26 = sld [smem:[#allocation3 + $0xb]]  ;;  %s2369_s27 = sld [smem:[#allocation3 + $0x3c]] }
  0x3b   : > { %v2770_v46 = vmul.f32 0.25, %v232_v41  ;;  %v234_v63 = vsel %vm211_vm1, %v189_v58, 0.0  ;;  %v370_v4 = vstv %s2786_s28  ;;  %v212_v5 = vsel %vm211_vm1, %v186_v57, -inf  ;;  %s2370_s28 = sld [smem:[#allocation3 + $0xc]] }
  0x3c   : > { %v272_v45 = vmul.f32 %v271_v44, %v2765_v43  ;;  %v300_v52 = vmul.f32 %v299_v50, %v2765_v43  ;;  %v328_v55 = vmul.f32 %v327_v53, %v2765_v43  ;;  %v356_v3 = vmul.f32 %v355_v61, %v2765_v43 }
  0x3d   : > { %321 = vrot.lane.b32.xlu1 %v316_v40, %s2616_s21  ;;  %v273_v48 = vmul.f32 %v271_v44, %v2770_v46  ;;  %v301_v51 = vmul.f32 %v299_v50, %v2770_v46  ;;  %v329_v54 = vmul.f32 %v327_v53, %v2770_v46  ;;  %v357_v2 = vmul.f32 %v355_v61, %v2770_v46 }
  0x3e   : > { %265 = vrot.lane.b32.xlu0 %v260_v42, %s2615_s18  ;;  %v235_v6 = vadd.f32 %v234_v63, %v233_v62  ;;  %v213_v7 = vsel %vm211_vm1, %v189_v58, -inf  ;;  %v214_v8 = vsel %vm211_vm1, %v192_v0, -inf  ;;  %v216_v9 = vsel %vm211_vm1, %v195_v1, -inf }
  0x3f   : > { %v236_v10 = vsel %vm211_vm1, %v192_v0, 0.0  ;;  %v372_v11 = vmul.f32 %v370_v4, %v2751_v28  ;;  %v383_v12 = vstv %s2792_s29  ;;  %v371_v13 = vmul.f32 %v370_v4, %v2755_v32  ;;  %s2371_s29 = sld [smem:[#allocation3 + $0x3d]] }
  0x40   : > { %v215_v14 = vmax.f32 %v212_v5, %v214_v8  ;;  %v217_v15 = vmax.f32 %v213_v7, %v216_v9  ;;  %v237_v16 = vadd.f32 %v236_v10, %v235_v6  ;;  %v238_v17 = vsel %vm211_vm1, %v195_v1, 0.0 }
  0x41   : > { %276 = vrot.lane.b32.xlu1 %v272_v45, %s2615_s18  ;;  %v385_v18 = vmul.f32 %v383_v12, %v2770_v46  ;;  %v398_v19 = vstv %s2802_s4  ;;  %v384_v20 = vmul.f32 %v383_v12, %v2765_v43  ;;  %v461_v22 = vstv %s2362_s5  ;;  %s2372_s4 = sld [smem:[#allocation3 + $0xd]]  ;;  %s2373_s5 = sld [smem:[#allocation3 + $0x3e]] }
  0x42   : > { %291 = vrot.lane.b32.xlu0 %v287_v47, %s2614_s13  ;;  %v2823_v21 = vmax.f32 %v215_v14, %v217_v15  ;;  %v239_v23 = vadd.f32 %v238_v17, %v237_v16  ;;  %v400_v24 = vmul.f32 %v398_v19, %v2751_v28  ;;  %v463_v25 = vmul.f32 %v461_v22, %v2751_v28 }
  0x43   : > { %v399_v26 = vmul.f32 %v398_v19, %v2755_v32  ;;  %v411_v27 = vstv %s2359_s6  ;;  %v462_v31 = vmul.f32 %v461_v22, %v2755_v32  ;;  %v481_v33 = vstv %s2363_s7  ;;  %s2376_s6 = sld [smem:[#allocation3 + $0xf]]  ;;  %s2377_s7 = sld [smem:[#allocation3 + $0x40]] }
  0x44   : > { %v464_v29 = vmul.f32 %v461_v22, %v2823_v21  ;;  %v2831_v30 = vmul.f32 0.25, %v239_v23  ;;  %v413_v34 = vmul.f32 %v411_v27, %v2770_v46  ;;  %v412_v35 = vmul.f32 %v411_v27, %v2765_v43 }
  0x45   : > { %278 = vrot.lane.b32.xlu1 %v273_v48, %s2615_s18  ;;  %v469_v36 = vrot.slane %v463_v25, 1  ;;  %v483_v38 = vmul.f32 %v481_v33, %v2770_v46  ;;  %v503_v40 = vstv %s2364_s9  ;;  %v468_v41 = vrot.slane %v462_v31, 1  ;;  %s2378_s9 = sld [smem:[#allocation3 + $0x10]] }
  0x46   : > { %319 = vrot.lane.b32.xlu0 %v315_v49, %s2616_s21  ;;  %v471_v37 = vrot.slane %v464_v29, 1  ;;  %v484_v39 = vmul.f32 %v481_v33, %v2831_v30  ;;  %v482_v42 = vmul.f32 %v481_v33, %v2765_v43  ;;  %v505_v44 = vmul.f32 %v503_v40, %v2751_v28 }
  0x47   : > { %v523_v45 = vstv %s2365_s10  ;;  %v489_v48 = vrot.slane %v483_v38, 1  ;;  %v506_v50 = vmul.f32 %v503_v40, %v2823_v21  ;;  %v504_v53 = vmul.f32 %v503_v40, %v2755_v32  ;;  %s2379_s10 = sld [smem:[#allocation3 + $0x41]] }
  0x48   : > { %v472_v47 = vsel %vm433_vm2, %v469_v36, %v471_v37  ;;  %v491_v49 = vrot.slane %v484_v39, 1  ;;  %v526_v58 = vmul.f32 %v523_v45, %v2831_v30  ;;  %v524_v62 = vmul.f32 %v523_v45, %v2765_v43 }
  0x49   : > { %306 = vrot.lane.b32.xlu1 %v301_v51, %s2614_s13  ;;  %v470_v51 = vsel %vm433_vm2, %v468_v41, %v469_v36  ;;  %v513_v57 = vrot.slane %v506_v50, 1  ;;  %v510_v61 = vrot.slane %v504_v53, 1  ;;  %v565_v7 = vstv %s2367_s25  ;;  %s2381_s25 = sld [smem:[#allocation3 + $0x42]] }
  0x4a   : > { %304 = vrot.lane.b32.xlu0 %v300_v52, %s2614_s13  ;;  %v488_v52 = vrot.slane %v482_v42, 1  ;;  %v492_v56 = vsel %vm433_vm2, %v489_v48, %v491_v49  ;;  %v530_v5 = vrot.slane %v524_v62, 1  ;;  %v587_v9 = vstv %s2368_s26  ;;  %s2382_s26 = sld [smem:[#allocation3 + $0x12]] }
  0x4b   : > { %v567_v12 = vmul.f32 %v565_v7, %v2770_v46  ;;  %v566_v16 = vmul.f32 %v565_v7, %v2765_v43  ;;  %v589_v17 = vmul.f32 %v587_v9, %v2751_v28  ;;  %v590_v22 = vmul.f32 %v587_v9, %v2823_v21 }
  0x4c   : > { %v588_v25 = vmul.f32 %v587_v9, %v2755_v32  ;;  %v629_v29 = vstv %s2370_s28  ;;  %v649_v40 = vstv %s2371_s29  ;;  %s2384_s28 = sld [smem:[#allocation3 + $0x13]]  ;;  %s2385_s29 = sld [smem:[#allocation3 + $0x44]] }
  0x4d   : > { %334 = vrot.lane.b32.xlu1 %v329_v54, %s2616_s21  ;;  %v511_v54 = vrot.slane %v505_v44, 1  ;;  %v573_v19 = vrot.slane %v567_v12, 1  ;;  %v595_v27 = vrot.slane %v589_v17, 1  ;;  %v597_v33 = vrot.slane %v590_v22, 1 }
  0x4e   : > { %332 = vrot.lane.b32.xlu0 %v328_v55, %s2616_s21  ;;  %v525_v55 = vmul.f32 %v523_v45, %v2770_v46  ;;  %v594_v37 = vrot.slane %v588_v25, 1  ;;  %v631_v39 = vmul.f32 %v629_v29, %v2751_v28  ;;  %v632_v45 = vmul.f32 %v629_v29, %v2823_v21 }
  0x4f   : > { %v514_v0 = vsel %vm433_vm2, %v511_v54, %v513_v57  ;;  %v512_v4 = vsel %vm433_vm2, %v510_v61, %v511_v54  ;;  %v598_v41 = vsel %vm433_vm2, %v595_v27, %v597_v33  ;;  %v630_v49 = vmul.f32 %v629_v29, %v2755_v32 }
  0x50   : > { %v531_v1 = vrot.slane %v525_v55, 1  ;;  %v651_v50 = vmul.f32 %v649_v40, %v2770_v46  ;;  %v637_v53 = vrot.slane %v631_v39, 1  ;;  %v639_v54 = vrot.slane %v632_v45, 1 }
  0x51   : > { %349 = vrot.lane.b32.xlu1 %v344_v59, %s2617_s30  ;;  %v545_v59 = vstv %s2366_s20  ;;  %v650_v57 = vmul.f32 %v649_v40, %v2765_v43  ;;  %s2380_s20 = sld [smem:[#allocation3 + $0x11]] }
  0x52   : > { %347 = vrot.lane.b32.xlu0 %v343_v60, %s2617_s30  ;;  %v490_v60 = vsel %vm433_vm2, %v488_v52, %v489_v48  ;;  %v547_v63 = vmul.f32 %v545_v59, %v2751_v28  ;;  %v546_v6 = vmul.f32 %v545_v59, %v2755_v32  ;;  %v532_v14 = vsel %vm433_vm2, %v530_v5, %v531_v1 }
  0x53   : > { %v640_v61 = vsel %vm433_vm2, %v637_v53, %v639_v54  ;;  %v748_v5 = vstv %s2376_s6  ;;  %s2390_s6 = sld [smem:[#allocation3 + $0x16]] }
  0x54   : > { %v553_v8 = vrot.slane %v547_v63, 1  ;;  %v552_v15 = vrot.slane %v546_v6, 1  ;;  %v749_v22 = vmul.f32 %v748_v5, %v2755_v32 }
  0x55   : > { %362 = vrot.lane.b32.xlu1 %v357_v2, %s2617_s30  ;;  %v533_v2 = vrot.slane %v526_v58, 1  ;;  %v671_v58 = vstv %s2372_s4  ;;  %s2386_s4 = sld [smem:[#allocation3 + $0x14]] }
  0x56   : > { %360 = vrot.lane.b32.xlu0 %v356_v3, %s2617_s30  ;;  %v548_v3 = vmul.f32 %v545_v59, %v2823_v21  ;;  %v554_v23 = vsel %vm433_vm2, %v552_v15, %v553_v8  ;;  %v657_v59 = vrot.slane %v651_v50, 1  ;;  %v673_v62 = vmul.f32 %v671_v58, %v2751_v28 }
  0x57   : > { %v534_v10 = vsel %vm433_vm2, %v531_v1, %v533_v2  ;;  %v674_v63 = vmul.f32 %v671_v58, %v2823_v21  ;;  %v656_v1 = vrot.slane %v650_v57, 1  ;;  %v672_v2 = vmul.f32 %v671_v58, %v2755_v32 }
  0x58   : > { %v679_v6 = vrot.slane %v673_v62, 1 }
  0x59   : > { %377 = vrot.lane.b32.xlu1 %v372_v11, %s2618_s8  ;;  %v555_v11 = vrot.slane %v548_v3, 1  ;;  %v691_v3 = vstv %s2373_s5  ;;  %s2387_s5 = sld [smem:[#allocation3 + $0x45]] }
  0x5a   : > { %375 = vrot.lane.b32.xlu0 %v371_v13, %s2618_s8  ;;  %v568_v13 = vmul.f32 %v565_v7, %v2831_v30  ;;  %v681_v7 = vrot.slane %v674_v63, 1  ;;  %v694_v9 = vmul.f32 %v691_v3, %v2831_v30  ;;  %v692_v12 = vmul.f32 %v691_v3, %v2765_v43 }
  0x5c   : > { %v682_v15 = vsel %vm433_vm2, %v679_v6, %v681_v7  ;;  %v701_v17 = vrot.slane %v694_v9, 1 }
  0x5d   : > { %390 = vrot.lane.b32.xlu1 %v385_v18, %s2618_s8  ;;  %v556_v18 = vsel %vm433_vm2, %v553_v8, %v555_v11  ;;  %v693_v8 = vmul.f32 %v691_v3, %v2770_v46  ;;  %v678_v11 = vrot.slane %v672_v2, 1 }
  0x5e   : > { %388 = vrot.lane.b32.xlu0 %v384_v20, %s2618_s8  ;;  %v575_v20 = vrot.slane %v568_v13, 1  ;;  %v750_v13 = vmul.f32 %v748_v5, %v2751_v28 }
  0x60   : > { %v576_v31 = vsel %vm433_vm2, %v573_v19, %v575_v20  ;;  %v698_v20 = vrot.slane %v692_v12, 1 }
  0x61   : > { %405 = vrot.lane.b32.xlu1 %v400_v24, %s2619_s12  ;;  %v572_v24 = vrot.slane %v566_v16, 1  ;;  %v699_v16 = vrot.slane %v693_v8, 1  ;;  %v874_v8 = vstv %s2382_s26  ;;  %s3037_s26 = sld [smem:[#allocation3 + $0x31]] }
  0x62   : > { %403 = vrot.lane.b32.xlu0 %v399_v26, %s2619_s12  ;;  %v607_v26 = vstv %s2369_s27  ;;  %s2383_s27 = sld [smem:[#allocation3 + $0x43]]  ;;  %v876_v12 = vmul.f32 %v874_v8, %v2751_v28 }
  0x63   : > { %v574_v36 = vsel %vm433_vm2, %v572_v24, %v573_v19  ;;  %v608_v38 = vmul.f32 %v607_v26, %v2765_v43  ;;  %v680_v19 = vsel %vm433_vm2, %v678_v11, %v679_v6  ;;  %v702_v25 = vsel %vm433_vm2, %v699_v16, %v701_v17 }
  0x64   : > { %v700_v29 = vsel %vm433_vm2, %v698_v20, %v699_v16  ;;  %v875_v17 = vmul.f32 %v874_v8, %v2755_v32 }
  0x65   : > { %418 = vrot.lane.b32.xlu1 %v413_v34, %s2619_s12  ;;  %v609_v34 = vmul.f32 %v607_v26, %v2770_v46  ;;  %v614_v48 = vrot.slane %v608_v38, 1 }
  0x66   : > { %416 = vrot.lane.b32.xlu0 %v412_v35, %s2619_s12  ;;  %v610_v35 = vmul.f32 %v607_v26, %v2831_v30  ;;  %v756_v26 = vrot.slane %v750_v13, 2  ;;  %v877_v13 = vmul.f32 %v874_v8, %v2823_v21 }
  0x67   : > { %v615_v42 = vrot.slane %v609_v34, 1  ;;  %v790_v34 = vstv %s2378_s9  ;;  %s2392_s9 = sld [smem:[#allocation3 + $0x17]] }
  0x68   : > { %v617_v44 = vrot.slane %v610_v35, 1  ;;  %v792_v38 = vmul.f32 %v790_v34, %v2751_v28  ;;  %v793_v39 = vmul.f32 %v790_v34, %v2823_v21 }
  0x69   : > { %475 = vrot.lane.b32.xlu1 %v472_v47, %s2615_s18  ;;  %v596_v47 = vsel %vm433_vm2, %v594_v37, %v595_v27  ;;  %v616_v55 = vsel %vm433_vm2, %v614_v48, %v615_v42 }
  0x6a   : > { %473 = vrot.lane.b32.xlu0 %v470_v51, %s2615_s18  ;;  %v652_v51 = vmul.f32 %v649_v40, %v2831_v30  ;;  %v618_v52 = vsel %vm433_vm2, %v615_v42, %v617_v44  ;;  %v791_v42 = vmul.f32 %v790_v34, %v2755_v32  ;;  %v810_v44 = vstv %s2379_s10  ;;  %s2393_s10 = sld [smem:[#allocation3 + $0x48]] }
  0x6b   : > { %v798_v48 = vrot.slane %v792_v38, 2  ;;  %v812_v50 = vmul.f32 %v810_v44, %v2770_v46  ;;  %v811_v54 = vmul.f32 %v810_v44, %v2765_v43 }
  0x6d   : > { %495 = vrot.lane.b32.xlu1 %v492_v56, %s2615_s18  ;;  %v636_v56 = vrot.slane %v630_v49, 1  ;;  %v800_v49 = vrot.slane %v793_v39, 2  ;;  %v818_v58 = vrot.slane %v812_v50, 2  ;;  %v817_v62 = vrot.slane %v811_v54, 2 }
  0x6e   : > { %493 = vrot.lane.b32.xlu0 %v490_v60, %s2615_s18  ;;  %v659_v60 = vrot.slane %v652_v51, 1  ;;  %v813_v51 = vmul.f32 %v810_v44, %v2831_v30 }
  0x6f   : > { %v801_v57 = vsel %vm720_vm3, %v798_v48, %v800_v49 }
  0x71   : > { %517 = vrot.lane.b32.xlu1 %v514_v0, %s2614_s13  ;;  %v638_v0 = vsel %vm433_vm2, %v636_v56, %v637_v53  ;;  %v797_v53 = vrot.slane %v791_v42, 2  ;;  %v936_v42 = vstv %s2385_s29  ;;  %s3076_s29 = sld [smem:[#allocation3 + $0x4a]] }
  0x72   : > { %515 = vrot.lane.b32.xlu0 %v512_v4, %s2614_s13  ;;  %v660_v4 = vsel %vm433_vm2, %v657_v59, %v659_v60  ;;  %v852_v60 = vstv %s2381_s25  ;;  %v938_v49 = vmul.f32 %v936_v42, %v2770_v46  ;;  %v939_v50 = vmul.f32 %v936_v42, %v2831_v30  ;;  %s3035_s25 = sld [smem:[#allocation3]] }
  0x73   : > { %v854_v2 = vmul.f32 %v852_v60, %v2770_v46  ;;  %v853_v7 = vmul.f32 %v852_v60, %v2765_v43 }
  0x75   : > { %537 = vrot.lane.b32.xlu1 %v534_v10, %s2614_s13  ;;  %v658_v10 = vsel %vm433_vm2, %v656_v1, %v657_v59  ;;  %v820_v59 = vrot.slane %v813_v51, 2  ;;  %v859_v16 = vrot.slane %v853_v7, 2  ;;  %v958_v51 = vstv %s2386_s4  ;;  %s3092_s4 = sld [smem:[#allocation3 + $0x1a]] }
  0x76   : > { %535 = vrot.lane.b32.xlu0 %v532_v14, %s2614_s13  ;;  %v768_v14 = vstv %s2377_s7  ;;  %s2391_s7 = sld [smem:[#allocation3 + $0x47]] }
  0x77   : > { %v771_v24 = vmul.f32 %v768_v14, %v2831_v30  ;;  %v769_v33 = vmul.f32 %v768_v14, %v2765_v43  ;;  %v821_v3 = vsel %vm720_vm3, %v818_v58, %v820_v59 }
  0x79   : > { %559 = vrot.lane.b32.xlu1 %v556_v18, %s2616_s21  ;;  %v751_v18 = vmul.f32 %v748_v5, %v2823_v21  ;;  %v819_v5 = vsel %vm720_vm3, %v817_v62, %v818_v58  ;;  %v961_v58 = vmul.f32 %v958_v51, %v2823_v21  ;;  %v978_v62 = vstv %s2387_s5  ;;  %s3112_s5 = sld [smem:[#allocation3 + $0x4b]] }
  0x7a   : > { %557 = vrot.lane.b32.xlu0 %v554_v23, %s2616_s21  ;;  %v770_v23 = vmul.f32 %v768_v14, %v2770_v46  ;;  %v894_v14 = vstv %s2383_s27  ;;  %v981_v8 = vmul.f32 %v978_v62, %v2831_v30  ;;  %s3050_s27 = sld [smem:[#allocation3 + $0x49]] }
  0x7b   : > { %v758_v27 = vrot.slane %v751_v18, 2  ;;  %v896_v18 = vmul.f32 %v894_v14, %v2770_v46 }
  0x7c   : > { %v776_v35 = vrot.slane %v770_v23, 2  ;;  %v884_v23 = vrot.slane %v877_v13, 2  ;;  %v1035_v13 = vstv %s2390_s6  ;;  %s3115_s6 = sld [smem:[#allocation3 + $0x7]] }
  0x7d   : > { %579 = vrot.lane.b32.xlu1 %v576_v31, %s2616_s21  ;;  %v755_v31 = vrot.slane %v749_v22, 2  ;;  %v759_v37 = vsel %vm720_vm3, %v756_v26, %v758_v27  ;;  %v882_v22 = vrot.slane %v876_v12, 2  ;;  %v881_v27 = vrot.slane %v875_v17, 2 }
  0x7e   : > { %577 = vrot.lane.b32.xlu0 %v574_v36, %s2616_s21  ;;  %v778_v36 = vrot.slane %v771_v24, 2  ;;  %v916_v24 = vstv %s2384_s28  ;;  %v979_v12 = vmul.f32 %v978_v62, %v2765_v43  ;;  %v988_v17 = vrot.slane %v981_v8, 2  ;;  %s3059_s28 = sld [smem:[#allocation3 + $0x19]] }
  0x7f   : > { %v757_v40 = vsel %vm720_vm3, %v755_v31, %v756_v26  ;;  %v883_v39 = vsel %vm720_vm3, %v881_v27, %v882_v22  ;;  %v246_v8 = vstv %s3035_s25  ;;  %s3183_s25 = sld [smem:[#allocation3 + $0x4e]] }
  0x80   : > { %v779_v45 = vsel %vm720_vm3, %v776_v35, %v778_v36  ;;  %v885_v36 = vsel %vm720_vm3, %v882_v22, %v884_v23 }
  0x81   : > { %601 = vrot.lane.b32.xlu1 %v598_v41, %s2617_s30  ;;  %v775_v41 = vrot.slane %v769_v33, 2  ;;  %v902_v33 = vrot.slane %v896_v18, 2  ;;  %v1037_v18 = vmul.f32 %v1035_v13, %v2751_v28 }
  0x82   : > { %599 = vrot.lane.b32.xlu0 %v596_v47, %s2617_s30  ;;  %v832_v47 = vstv %s2380_s20  ;;  %s2394_s20 = sld [smem:[#allocation3 + $0x18]] }
  0x83   : > { %v835_v56 = vmul.f32 %v832_v47, %v2823_v21  ;;  %v833_v63 = vmul.f32 %v832_v47, %v2755_v32 }
  0x85   : > { %621 = vrot.lane.b32.xlu1 %v618_v52, %s2617_s30  ;;  %v777_v52 = vsel %vm720_vm3, %v775_v41, %v776_v35  ;;  %v842_v1 = vrot.slane %v835_v56, 2  ;;  %v839_v6 = vrot.slane %v833_v63, 2  ;;  %v918_v35 = vmul.f32 %v916_v24, %v2751_v28 }
  0x86   : > { %619 = vrot.lane.b32.xlu0 %v616_v55, %s2617_s30  ;;  %v834_v55 = vmul.f32 %v832_v47, %v2751_v28  ;;  %v917_v41 = vmul.f32 %v916_v24, %v2755_v32 }
  0x87   : > { %v924_v47 = vrot.slane %v918_v35, 2  ;;  %v1043_v35 = vrot.slane %v1037_v18, 3 }
  0x88   : > { %v923_v54 = vrot.slane %v917_v41, 2 }
  0x89   : > { %643 = vrot.lane.b32.xlu1 %v640_v61, %s2618_s8  ;;  %v799_v61 = vsel %vm720_vm3, %v797_v53, %v798_v48 }
  0x8a   : > { %641 = vrot.lane.b32.xlu0 %v638_v0, %s2618_s8  ;;  %v840_v0 = vrot.slane %v834_v55, 2  ;;  %v937_v55 = vmul.f32 %v936_v42, %v2765_v43 }
  0x8c   : > { %v843_v9 = vsel %vm720_vm3, %v840_v0, %v842_v1  ;;  %v943_v1 = vrot.slane %v937_v55, 2 }
  0x8d   : > { %663 = vrot.lane.b32.xlu1 %v660_v4, %s2618_s8  ;;  %v855_v4 = vmul.f32 %v852_v60, %v2831_v30  ;;  %v944_v60 = vrot.slane %v938_v49, 2 }
  0x8e   : > { %661 = vrot.lane.b32.xlu0 %v658_v10, %s2618_s8  ;;  %v860_v10 = vrot.slane %v854_v2, 2  ;;  %v959_v2 = vmul.f32 %v958_v51, %v2755_v32 }
  0x8f   : > { %v862_v11 = vrot.slane %v855_v4, 2 }
  0x90   : > { %v861_v26 = vsel %vm720_vm3, %v859_v16, %v860_v10 }
  0x91   : > { %685 = vrot.lane.b32.xlu1 %v682_v15, %s2619_s12  ;;  %v841_v15 = vsel %vm720_vm3, %v839_v6, %v840_v0  ;;  %v863_v20 = vsel %vm720_vm3, %v860_v10, %v862_v11  ;;  %v925_v0 = vsel %vm720_vm3, %v923_v54, %v924_v47  ;;  %v980_v6 = vmul.f32 %v978_v62, %v2770_v46 }
  0x92   : > { %683 = vrot.lane.b32.xlu0 %v680_v19, %s2619_s12  ;;  %v897_v19 = vmul.f32 %v894_v14, %v2831_v30  ;;  %v945_v10 = vsel %vm720_vm3, %v943_v1, %v944_v60  ;;  %v965_v11 = vrot.slane %v959_v2, 2  ;;  %v1119_v2 = vstv %s2394_s20  ;;  %s3160_s20 = sld [smem:[#allocation3 + $0x1d]] }
  0x93   : > { %v986_v16 = vrot.slane %v980_v6, 2 }
  0x94   : > { %v904_v34 = vrot.slane %v897_v19, 2  ;;  %v1038_v19 = vmul.f32 %v1035_v13, %v2823_v21 }
  0x95   : > { %705 = vrot.lane.b32.xlu1 %v702_v25, %s2619_s12 }
  0x96   : > { %703 = vrot.lane.b32.xlu0 %v700_v29, %s2619_s12  ;;  %v895_v29 = vmul.f32 %v894_v14, %v2765_v43 }
  0x99   : > { %762 = vrot.lane.b32.xlu1 %v759_v37, %s2615_s18  ;;  %v919_v37 = vmul.f32 %v916_v24, %v2823_v21  ;;  %v985_v24 = vrot.slane %v979_v12, 2  ;;  %v248_v12 = vmul.f32 %v246_v8, %v2751_v28 }
  0x9a   : > { %760 = vrot.lane.b32.xlu0 %v757_v40, %s2615_s18  ;;  %v901_v40 = vrot.slane %v895_v29, 2 }
  0x9b   : > { %v926_v48 = vrot.slane %v919_v37, 2  ;;  %v1077_v37 = vstv %s2392_s9  ;;  %s3146_s9 = sld [smem:[#allocation3 + $0x4c]] }
  0x9c   : > { %v903_v53 = vsel %vm720_vm3, %v901_v40, %v902_v33  ;;  %v987_v40 = vsel %vm720_vm3, %v985_v24, %v986_v16  ;;  %v1079_v49 = vmul.f32 %v1077_v37, %v2751_v28 }
  0x9d   : > { %782 = vrot.lane.b32.xlu1 %v779_v45, %s2615_s18  ;;  %v905_v45 = vsel %vm720_vm3, %v902_v33, %v904_v34  ;;  %v927_v59 = vsel %vm720_vm3, %v924_v47, %v926_v48  ;;  %v989_v34 = vsel %vm720_vm3, %v986_v16, %v988_v17  ;;  %v1122_v16 = vmul.f32 %v1119_v2, %v2823_v21 }
  0x9e   : > { %780 = vrot.lane.b32.xlu0 %v777_v52, %s2615_s18 }
  0xa1   : > { %804 = vrot.lane.b32.xlu1 %v801_v57, %s2614_s13  ;;  %v960_v57 = vmul.f32 %v958_v51, %v2751_v28  ;;  %v1080_v51 = vmul.f32 %v1077_v37, %v2823_v21 }
  0xa2   : > { %802 = vrot.lane.b32.xlu0 %v799_v61, %s2614_s13  ;;  %v946_v61 = vrot.slane %v939_v50, 2 }
  0xa3   : > { %v966_v4 = vrot.slane %v960_v57, 2  ;;  %v1078_v57 = vmul.f32 %v1077_v37, %v2755_v32  ;;  %v1087_v62 = vrot.slane %v1080_v51, 3  ;;  %v1129_v37 = vrot.slane %v1122_v16, 3 }
  0xa4   : > { %v947_v7 = vsel %vm720_vm3, %v944_v60, %v946_v61  ;;  %v1085_v61 = vrot.slane %v1079_v49, 3 }
  0xa5   : > { %824 = vrot.lane.b32.xlu1 %v821_v3, %s2614_s13  ;;  %v967_v23 = vsel %vm720_vm3, %v965_v11, %v966_v4  ;;  %v1084_v6 = vrot.slane %v1078_v57, 3 }
  0xa6   : > { %822 = vrot.lane.b32.xlu0 %v819_v5, %s2614_s13  ;;  %v968_v5 = vrot.slane %v961_v58, 2  ;;  %v1097_v58 = vstv %s2393_s10  ;;  %v1088_v17 = vsel %vm1007_vm4, %v1085_v61, %v1087_v62  ;;  %s3149_s10 = sld [smem:[#allocation3 + $0x38]] }
  0xa7   : > { %v1100_v1 = vmul.f32 %v1097_v58, %v2831_v30 }
  0xa9   : > { %846 = vrot.lane.b32.xlu1 %v843_v9, %s2616_s21 }
  0xaa   : > { %844 = vrot.lane.b32.xlu0 %v841_v15, %s2616_s21  ;;  %v969_v15 = vsel %vm720_vm3, %v966_v4, %v968_v5 }
  0xab   : > { %v2965_v25 = vpop.permute.xlu1 %293 }
  0xac   : > { %v2969_v31 = vpop.permute.xlu0 %263 }
  0xad   : > { %866 = vrot.lane.b32.xlu1 %v863_v20, %s2616_s21  ;;  %v1055_v20 = vstv %s2391_s7  ;;  %s3122_s7 = sld [smem:[#allocation3 + $0x1b]] }
  0xae   : > { %864 = vrot.lane.b32.xlu0 %v861_v26, %s2616_s21  ;;  %v1036_v26 = vmul.f32 %v1035_v13, %v2755_v32  ;;  %v1057_v29 = vmul.f32 %v1055_v20, %v2770_v46  ;;  %v1058_v33 = vmul.f32 %v1055_v20, %v2831_v30  ;;  %v1056_v42 = vmul.f32 %v1055_v20, %v2765_v43 }
  0xaf   : > { %v2976_v38 = vpop.permute.xlu1 %321 }
  0xb0   : > { %v2980_v44 = vpop.permute.xlu0 %265  ;;  %v1042_v41 = vrot.slane %v1036_v26, 3  ;;  %v1063_v47 = vrot.slane %v1057_v29, 3  ;;  %v1065_v48 = vrot.slane %v1058_v33, 3  ;;  %v1062_v55 = vrot.slane %v1056_v42, 3 }
  0xb1   : > { %888 = vrot.lane.b32.xlu1 %v885_v36, %s2617_s30  ;;  %v1045_v36 = vrot.slane %v1038_v19, 3  ;;  %v1107_v19 = vrot.slane %v1100_v1, 3  ;;  %v1120_v26 = vmul.f32 %v1119_v2, %v2755_v32  ;;  %v1139_v29 = vstv %s3050_s27  ;;  %s3229_s27 = sld [smem:[#allocation3 + $0x4f]] }
  0xb2   : > { %886 = vrot.lane.b32.xlu0 %v883_v39, %s2617_s30  ;;  %v1044_v54 = vsel %vm1007_vm4, %v1042_v41, %v1043_v35  ;;  %v1066_v60 = vsel %vm1007_vm4, %v1063_v47, %v1065_v48  ;;  %v1064_v5 = vsel %vm1007_vm4, %v1062_v55, %v1063_v47  ;;  %v1141_v41 = vmul.f32 %v1139_v29, %v2770_v46 }
  0xb3   : > { %v2987_v52 = vpop.permute.xlu1 %276  ;;  %v1046_v50 = vsel %vm1007_vm4, %v1043_v35, %v1045_v36  ;;  %v1142_v42 = vmul.f32 %v1139_v29, %v2831_v30  ;;  %v1161_v47 = vstv %s3059_s28  ;;  %v1126_v51 = vrot.slane %v1120_v26, 3  ;;  %s3255_s28 = sld [smem:[#allocation3 + $0x1f]] }
  0xb4   : > { %v2991_v56 = vpop.permute.xlu0 %291  ;;  %v1147_v62 = vrot.slane %v1141_v41, 3  ;;  %v1181_v1 = vstv %s3076_s29  ;;  %s3271_s29 = sld [smem:[#allocation3 + $0x50]] }
  0xb5   : > { %908 = vrot.lane.b32.xlu1 %v905_v45, %s2617_s30  ;;  %v1182_v26 = vmul.f32 %v1181_v1, %v2765_v43 }
  0xb6   : > { %906 = vrot.lane.b32.xlu0 %v903_v53, %s2617_s30 }
  0xb7   : > { %v2998_v63 = vpop.permute.xlu1 %278 }
  0xb8   : > { %v3002_v3 = vpop.permute.xlu0 %319 }
  0xb9   : > { %930 = vrot.lane.b32.xlu1 %v927_v59, %s2618_s8 }
  0xba   : > { %928 = vrot.lane.b32.xlu0 %v925_v0, %s2618_s8  ;;  %v1099_v0 = vmul.f32 %v1097_v58, %v2770_v46 }
  0xbb   : > { %v3009_v9 = vpop.permute.xlu1 %306 }
  0xbc   : > { %v3013_v14 = vpop.permute.xlu0 %304  ;;  %v1105_v18 = vrot.slane %v1099_v0, 3  ;;  %v1149_v0 = vrot.slane %v1142_v42, 3 }
  0xbd   : > { %950 = vrot.lane.b32.xlu1 %v947_v7, %s2618_s8  ;;  %v1098_v7 = vmul.f32 %v1097_v58, %v2765_v43  ;;  %v1163_v58 = vmul.f32 %v1161_v47, %v2751_v28 }
  0xbe   : > { %948 = vrot.lane.b32.xlu0 %v945_v10, %s2618_s8  ;;  %v251_v10 = vstv %s3037_s26  ;;  %s3206_s26 = sld [smem:[#allocation3 + $0x1e]] }
  0xbf   : > { %v3020_v22 = vpop.permute.xlu1 %334  ;;  %v253_v13 = vmul.f32 %v251_v10, %v2770_v46  ;;  %v1104_v24 = vrot.slane %v1098_v7, 3  ;;  %v252_v48 = vmul.f32 %v251_v10, %v2765_v43  ;;  %v1169_v16 = vrot.slane %v1163_v58, 3 }
  0xc0   : > { %v3024_v27 = vpop.permute.xlu0 %332 }
  0xc1   : > { %972 = vrot.lane.b32.xlu1 %v969_v15, %s2619_s12  ;;  %v1121_v15 = vmul.f32 %v1119_v2, %v2751_v28  ;;  %v255_v35 = vadd.f32 %v253_v13, %v248_v12  ;;  %v1183_v12 = vmul.f32 %v1181_v1, %v2770_v46  ;;  %v1184_v13 = vmul.f32 %v1181_v1, %v2831_v30 }
  0xc2   : > { %970 = vrot.lane.b32.xlu0 %v967_v23, %s2619_s12  ;;  %v1086_v23 = vsel %vm1007_vm4, %v1084_v6, %v1085_v61 }
  0xc3   : > { %v3031_v39 = vpop.permute.xlu1 %349  ;;  %v1127_v36 = vrot.slane %v1121_v15, 3  ;;  %v270_v61 = vadd.f32 %v2980_v44, %v255_v35  ;;  %v1150_v15 = vsel %vm1007_vm4, %v1147_v62, %v1149_v0 }
  0xc4   : > { %v3039_v45 = vpop.permute.xlu0 %347 }
  0xc5   : > { %992 = vrot.lane.b32.xlu1 %v989_v34, %s2619_s12  ;;  %v247_v34 = vmul.f32 %v246_v8, %v2755_v32  ;;  %v1130_v57 = vsel %vm1007_vm4, %v1127_v36, %v1129_v37  ;;  %v1128_v6 = vsel %vm1007_vm4, %v1126_v51, %v1127_v36  ;;  %v1162_v8 = vmul.f32 %v1161_v47, %v2755_v32 }
  0xc6   : > { %990 = vrot.lane.b32.xlu0 %v987_v40, %s2619_s12  ;;  %v1108_v40 = vsel %vm1007_vm4, %v1105_v18, %v1107_v19  ;;  %v283_v10 = vadd.f32 %v2998_v63, %v270_v61  ;;  %v1189_v36 = vrot.slane %v1183_v12, 3  ;;  %v1191_v37 = vrot.slane %v1184_v13, 3 }
  0xc7   : > { %v3046_v53 = vpop.permute.xlu1 %362  ;;  %v254_v2 = vadd.f32 %v252_v48, %v247_v34  ;;  %v1223_v48 = vstv %s3112_s5  ;;  %v3152_v51 = vstv %s3115_s6  ;;  %v1245_v61 = vstv %s3122_s7  ;;  %s3301_s5 = sld [smem:[#allocation3 + $0x51]]  ;;  %s3314_s6 = sld [smem:[#allocation3 + $0xe]] }
  0xc8   : > { %v3052_v59 = vpop.permute.xlu0 %360  ;;  %v1192_v58 = vsel %vm1007_vm4, %v1189_v36, %v1191_v37  ;;  %v1225_v0 = vmul.f32 %v1223_v48, %v2770_v46  ;;  %v1226_v1 = vmul.f32 %v1223_v48, %v2831_v30  ;;  %v3175_v12 = vmul.f32 %v3152_v51, %v2751_v28  ;;  %s3316_s7 = sld [smem:[#allocation3 + $0x3f]] }
  0xc9   : > { %1049 = vrot.lane.b32.xlu1 %v1046_v50, %s2615_s18  ;;  %v1106_v50 = vsel %vm1007_vm4, %v1104_v24, %v1105_v18  ;;  %v1203_v18 = vstv %s3092_s4  ;;  %v269_v63 = vadd.f32 %v2969_v31, %v254_v2  ;;  %v1168_v24 = vrot.slane %v1162_v8, 3  ;;  %s3294_s4 = sld [smem:[#allocation3 + $0x20]] }
  0xca   : > { %1047 = vrot.lane.b32.xlu0 %v1044_v54, %s2615_s18  ;;  %v1140_v54 = vmul.f32 %v1139_v29, %v2765_v43  ;;  %v298_v29 = vadd.f32 %v2965_v25, %v283_v10  ;;  %v1205_v31 = vmul.f32 %v1203_v18, %v2751_v28  ;;  %v1206_v41 = vmul.f32 %v1203_v18, %v2823_v21 }
  0xcb   : > { %v3061_v4 = vpop.permute.xlu1 %377  ;;  %v282_v35 = vadd.f32 %v2987_v52, %v269_v63  ;;  %v1204_v25 = vmul.f32 %v1203_v18, %v2755_v32  ;;  %v1170_v52 = vsel %vm1007_vm4, %v1168_v24, %v1169_v16  ;;  %v1248_v13 = vmul.f32 %v1245_v61, %v2823_v21 }
  0xcc   : > { %v3067_v11 = vpop.permute.xlu0 %375  ;;  %v1146_v7 = vrot.slane %v1140_v54, 3  ;;  %v1246_v24 = vmul.f32 %v1245_v61, %v2755_v32 }
  0xcd   : > { %1069 = vrot.lane.b32.xlu1 %v1066_v60, %s2615_s18  ;;  %v1164_v60 = vmul.f32 %v1161_v47, %v2823_v21  ;;  %v1188_v47 = vrot.slane %v1182_v26, 3  ;;  %v1265_v26 = vstv %s3146_s9  ;;  %s3324_s9 = sld [smem:[#allocation3 + $0x21]] }
  0xce   : > { %1067 = vrot.lane.b32.xlu0 %v1064_v5, %s2615_s18 }
  0xcf   : > { %v3078_v20 = vpop.permute.xlu1 %390 }
  0xd0   : > { %v3083_v33 = vpop.permute.xlu0 %388 }
  0xd1   : > { %1091 = vrot.lane.b32.xlu1 %v1088_v17, %s2614_s13  ;;  %v1171_v17 = vrot.slane %v1164_v60, 3  ;;  %v1211_v60 = vrot.slane %v1205_v31, 3  ;;  %v435_v31 = vrot.slane %v3175_v12, 1 }
  0xd2   : > { %1089 = vrot.lane.b32.xlu0 %v1086_v23, %s2614_s13  ;;  %v1148_v23 = vsel %vm1007_vm4, %v1146_v7, %v1147_v62  ;;  %v1213_v62 = vrot.slane %v1206_v41, 3  ;;  %v1224_v7 = vmul.f32 %v1223_v48, %v2765_v43  ;;  %v1322_v41 = vstv %s3160_s20  ;;  %s3365_s20 = sld [smem:[#allocation3 + $0x22]] }
  0xd3   : > { %v3095_v49 = vpop.permute.xlu1 %405 }
  0xd4   : > { %v3099_v55 = vpop.permute.xlu0 %403 }
  0xd5   : > { %1111 = vrot.lane.b32.xlu1 %v1108_v40, %s2614_s13  ;;  %v1172_v40 = vsel %vm1007_vm4, %v1169_v16, %v1171_v17  ;;  %v1231_v16 = vrot.slane %v1225_v0, 3  ;;  %v1233_v17 = vrot.slane %v1226_v1, 3 }
  0xd6   : > { %1109 = vrot.lane.b32.xlu0 %v1106_v50, %s2614_s13  ;;  %v311_v50 = vadd.f32 %v3009_v9, %v298_v29  ;;  %v1210_v9 = vrot.slane %v1204_v25, 3 }
  0xd7   : > { %v3108_v5 = vpop.permute.xlu1 %418 }
  0xd8   : > { %v3117_v44 = vpop.permute.xlu0 %416  ;;  %v326_v8 = vadd.f32 %v2976_v38, %v311_v50  ;;  %v1212_v38 = vsel %vm1007_vm4, %v1210_v9, %v1211_v60 }
  0xd9   : > { %1133 = vrot.lane.b32.xlu1 %v1130_v57, %s2616_s21  ;;  %v297_v57 = vadd.f32 %v2991_v56, %v282_v35  ;;  %v1190_v56 = vsel %vm1007_vm4, %v1188_v47, %v1189_v36  ;;  %v3193_v35 = vmul.f32 %v3152_v51, %v2823_v21  ;;  %v443_v36 = vstv %s3149_s10  ;;  %s3336_s10 = sld [smem:[#allocation3 + $0x52]] }
  0xda   : > { %1131 = vrot.lane.b32.xlu0 %v1128_v6, %s2616_s21  ;;  %v339_v29 = vadd.f32 %v3020_v22, %v326_v8  ;;  %v1234_v22 = vsel %vm1007_vm4, %v1231_v16, %v1233_v17  ;;  %v1268_v47 = vmul.f32 %v1265_v26, %v2831_v30  ;;  %v446_v9 = vmul.f32 %v443_v36, %v2831_v30 }
  0xdb   : > { %v3128_v19 = vpop.permute.xlu1 %475  ;;  %v310_v2 = vadd.f32 %v3013_v14, %v297_v57  ;;  %v1247_v14 = vmul.f32 %v1245_v61, %v2751_v28  ;;  %v437_v61 = vrot.slane %v3193_v35, 1 }
  0xdc   : > { %v3133_v34 = vpop.permute.xlu0 %473  ;;  %v354_v25 = vadd.f32 %v3031_v39, %v339_v29  ;;  %v1266_v39 = vmul.f32 %v1265_v26, %v2765_v43  ;;  %v1275_v8 = vrot.slane %v1268_v47, 3 }
  0xdd   : > { %1153 = vrot.lane.b32.xlu1 %v1150_v15, %s2616_s21  ;;  %v1214_v15 = vsel %vm1007_vm4, %v1211_v60, %v1213_v62  ;;  %v325_v18 = vadd.f32 %v3002_v3, %v310_v2  ;;  %v1253_v3 = vrot.slane %v1247_v14, 3  ;;  %v3216_v62 = vmul.f32 %v443_v36, %v2770_v46 }
  0xde   : > { %1151 = vrot.lane.b32.xlu0 %v1148_v23, %s2616_s21  ;;  %v1230_v23 = vrot.slane %v1224_v7, 3  ;;  %v367_v60 = vadd.f32 %v3046_v53, %v354_v25  ;;  %v1324_v2 = vmul.f32 %v1322_v41, %v2751_v28  ;;  %v1342_v14 = vstv %s3183_s25  ;;  %s3395_s25 = sld [smem:[#allocation3 + $0x53]] }
  0xdf   : > { %v3142_v42 = vpop.permute.xlu1 %495  ;;  %v338_v48 = vadd.f32 %v3024_v27, %v325_v18  ;;  %v444_v18 = vmul.f32 %v443_v36, %v2765_v43  ;;  %v1344_v29 = vmul.f32 %v1342_v14, %v2770_v46  ;;  %v1364_v36 = vstv %s3206_s26  ;;  %s3417_s26 = sld [smem:[#allocation3 + $0x24]] }
  0xe0   : > { %v3154_v54 = vpop.permute.xlu0 %493  ;;  %v1232_v57 = vsel %vm1007_vm4, %v1230_v23, %v1231_v16  ;;  %v382_v53 = vadd.f32 %v3061_v4, %v367_v60  ;;  %v1323_v16 = vmul.f32 %v1322_v41, %v2755_v32  ;;  %v427_v4 = vmul.f32 %v3152_v51, %v2755_v32 }
  0xe1   : > { %1175 = vrot.lane.b32.xlu1 %v1172_v40, %s2617_s30  ;;  %v1255_v40 = vrot.slane %v1248_v13, 3  ;;  %v353_v27 = vadd.f32 %v3039_v45, %v338_v48  ;;  %v1345_v51 = vmul.f32 %v1342_v14, %v2831_v30  ;;  %v1343_v25 = vmul.f32 %v1342_v14, %v2765_v43 }
  0xe2   : > { %1173 = vrot.lane.b32.xlu0 %v1170_v52, %s2617_s30  ;;  %v1267_v52 = vmul.f32 %v1265_v26, %v2770_v46  ;;  %v395_v17 = vadd.f32 %v3078_v20, %v382_v53  ;;  %v434_v47 = vrot.slane %v427_v4, 1 }
  0xe3   : > { %v3166_v6 = vpop.permute.xlu1 %517  ;;  %v1256_v1 = vsel %vm1007_vm4, %v1253_v3, %v1255_v40  ;;  %v366_v13 = vadd.f32 %v3052_v59, %v353_v27 }
  0xe4   : > { %v3171_v10 = vpop.permute.xlu0 %515  ;;  %v1273_v7 = vrot.slane %v1267_v52, 3  ;;  %v410_v35 = vadd.f32 %v3095_v49, %v395_v17  ;;  %v451_v49 = vrot.slane %v3216_v62, 1  ;;  %v1352_v62 = vrot.slane %v1345_v51, 4 }
  0xe5   : > { %1195 = vrot.lane.b32.xlu1 %v1192_v58, %s2617_s30  ;;  %v1252_v58 = vrot.slane %v1246_v24, 3  ;;  %v381_v59 = vadd.f32 %v3067_v11, %v366_v13  ;;  %v1330_v24 = vrot.slane %v1324_v2, 4  ;;  %v1365_v2 = vmul.f32 %v1364_v36, %v2755_v32 }
  0xe6   : > { %1193 = vrot.lane.b32.xlu0 %v1190_v56, %s2617_s30  ;;  %v1325_v56 = vmul.f32 %v1322_v41, %v2823_v21  ;;  %v1276_v20 = vsel %vm1007_vm4, %v1273_v7, %v1275_v8  ;;  %v1329_v41 = vrot.slane %v1323_v16, 4  ;;  %v423_v52 = vadd.f32 %v3108_v5, %v410_v35 }
  0xe7   : > { %v3186_v63 = vpop.permute.xlu1 %537  ;;  %v1350_v5 = vrot.slane %v1344_v29, 4  ;;  %v450_v8 = vrot.slane %v444_v18, 1  ;;  %v1371_v18 = vrot.slane %v1365_v2, 4 }
  0xe8   : > { %v3196_v37 = vpop.permute.xlu0 %535  ;;  %v1332_v26 = vrot.slane %v1325_v56, 4 }
  0xe9   : > { %1217 = vrot.lane.b32.xlu1 %v1214_v15, %s2618_s8  ;;  %v1254_v15 = vsel %vm1007_vm4, %v1252_v58, %v1253_v3  ;;  %v394_v3 = vadd.f32 %v3083_v33, %v381_v59  ;;  %v1366_v58 = vmul.f32 %v1364_v36, %v2751_v28  ;;  %v1353_v16 = vsel %vm1294_vm5, %v1350_v5, %v1352_v62 }
  0xea   : > { %1215 = vrot.lane.b32.xlu0 %v1212_v38, %s2618_s8  ;;  %v1272_v38 = vrot.slane %v1266_v39, 3  ;;  %v1367_v39 = vmul.f32 %v1364_v36, %v2823_v21  ;;  %v1333_v60 = vsel %vm1294_vm5, %v1330_v24, %v1332_v26  ;;  %v1406_v59 = vstv %s3255_s28  ;;  %s3460_s28 = sld [smem:[#allocation3 + $0x25]] }
  0xeb   : > { %v3209_v50 = vpop.permute.xlu1 %559  ;;  %v409_v33 = vadd.f32 %v3099_v55, %v394_v3  ;;  %v452_v26 = vsel %vm433_vm2, %v450_v8, %v451_v49  ;;  %v1408_v3 = vmul.f32 %v1406_v59, %v2751_v28  ;;  %v1468_v8 = vstv %s3301_s5  ;;  %s3503_s5 = sld [smem:[#allocation3 + $0x15]] }
  0xec   : > { %v3219_v0 = vpop.permute.xlu0 %557  ;;  %v1274_v11 = vsel %vm1007_vm4, %v1272_v38, %v1273_v7  ;;  %v436_v7 = vsel %vm433_vm2, %v434_v47, %v435_v31  ;;  %v1374_v13 = vrot.slane %v1367_v39, 4 }
  0xed   : > { %1237 = vrot.lane.b32.xlu1 %v1234_v22, %s2618_s8  ;;  %v453_v22 = vrot.slane %v446_v9, 1  ;;  %v1384_v9 = vstv %s3229_s27  ;;  %v422_v55 = vadd.f32 %v3117_v44, %v409_v33  ;;  %v1372_v44 = vrot.slane %v1366_v58, 4  ;;  %s3445_s27 = sld [smem:[#allocation3 + $0x55]] }
  0xee   : > { %1235 = vrot.lane.b32.xlu0 %v1232_v57, %s2618_s8  ;;  %v438_v57 = vsel %vm433_vm2, %v435_v31, %v437_v61  ;;  %v1331_v61 = vsel %vm1294_vm5, %v1329_v41, %v1330_v24  ;;  %v1387_v38 = vmul.f32 %v1384_v9, %v2831_v30  ;;  %v1385_v12 = vmul.f32 %v1384_v9, %v2765_v43 }
  0xef   : > { %v3232_v45 = vpop.permute.xlu1 %579  ;;  %v454_v56 = vsel %vm433_vm2, %v451_v49, %v453_v22  ;;  %v442_v53 = vadd.f32 %v438_v57, %v423_v52  ;;  %v441_v17 = vadd.f32 %v436_v7, %v422_v55  ;;  %v1375_v35 = vsel %vm1294_vm5, %v1372_v44, %v1374_v13 }
  0xf0   : > { %v3240_v23 = vpop.permute.xlu0 %577  ;;  %v1394_v51 = vrot.slane %v1387_v38, 4  ;;  %v1391_v36 = vrot.slane %v1385_v12, 4  ;;  %v1426_v41 = vstv %s3271_s29  ;;  %v1373_v22 = vsel %vm1294_vm5, %v1371_v18, %v1372_v44  ;;  %s3475_s29 = sld [smem:[#allocation3 + $0x56]] }
  0xf1   : > { %1259 = vrot.lane.b32.xlu1 %v1256_v1, %s2619_s12  ;;  %v1349_v1 = vrot.slane %v1343_v25, 4  ;;  %v458_v24 = vadd.f32 %v454_v56, %v442_v53  ;;  %v457_v25 = vadd.f32 %v452_v26, %v441_v17  ;;  %v1407_v52 = vmul.f32 %v1406_v59, %v2755_v32 }
  0xf2   : > { %1257 = vrot.lane.b32.xlu0 %v1254_v15, %s2619_s12  ;;  %v1386_v15 = vmul.f32 %v1384_v9, %v2770_v46  ;;  %v1428_v57 = vmul.f32 %v1426_v41, %v2770_v46  ;;  %v1429_v58 = vmul.f32 %v1426_v41, %v2831_v30  ;;  %v3353_v18 = vstv %s3316_s7  ;;  %s3523_s7 = sld [smem:[#allocation3 + $0x46]] }
  0xf3   : > { %v3251_v40 = vpop.permute.xlu1 %601  ;;  %v1351_v31 = vsel %vm1294_vm5, %v1349_v1, %v1350_v5  ;;  %v480_v47 = vadd.f32 %v3128_v19, %v458_v24  ;;  %v479_v62 = vadd.f32 %v3133_v34, %v457_v25  ;;  %v1413_v55 = vrot.slane %v1407_v52, 4 }
  0xf4   : > { %v3259_v48 = vpop.permute.xlu0 %599  ;;  %v1448_v1 = vstv %s3294_s4  ;;  %v1434_v53 = vrot.slane %v1428_v57, 4  ;;  %v1436_v7 = vrot.slane %v1429_v58, 4  ;;  %v1470_v26 = vmul.f32 %v1468_v8, %v2770_v46  ;;  %s3494_s4 = sld [smem:[#allocation3 + $0x26]] }
  0xf5   : > { %1279 = vrot.lane.b32.xlu1 %v1276_v20, %s2619_s12  ;;  %v1392_v20 = vrot.slane %v1386_v15, 4  ;;  %v500_v2 = vadd.f32 %v3142_v42, %v480_v47  ;;  %v1450_v13 = vmul.f32 %v1448_v1, %v2751_v28  ;;  %v1451_v42 = vmul.f32 %v1448_v1, %v2823_v21 }
  0xf6   : > { %1277 = vrot.lane.b32.xlu0 %v1274_v11, %s2619_s12  ;;  %v1409_v11 = vmul.f32 %v1406_v59, %v2823_v21  ;;  %v499_v15 = vadd.f32 %v3154_v54, %v479_v62  ;;  %v1449_v17 = vmul.f32 %v1448_v1, %v2755_v32  ;;  %v1437_v54 = vsel %vm1294_vm5, %v1434_v53, %v1436_v7 }
  0xf7   : > { %v3274_v27 = vpop.permute.xlu1 %621  ;;  %v1395_v39 = vsel %vm1294_vm5, %v1392_v20, %v1394_v51  ;;  %v1393_v19 = vsel %vm1294_vm5, %v1391_v36, %v1392_v20  ;;  %v522_v34 = vadd.f32 %v3166_v6, %v500_v2  ;;  %v1458_v51 = vrot.slane %v1451_v42, 4 }
  0xf8   : > { %v3282_v14 = vpop.permute.xlu0 %619  ;;  %v1416_v5 = vrot.slane %v1409_v11, 4  ;;  %v521_v24 = vadd.f32 %v3171_v10, %v499_v15  ;;  %v1490_v36 = vstv %s3324_s9  ;;  %v1469_v25 = vmul.f32 %v1468_v8, %v2765_v43  ;;  %s3530_s9 = sld [smem:[#allocation3 + $0x27]] }
  0xf9   : > { %1336 = vrot.lane.b32.xlu1 %v1333_v60, %s2615_s18  ;;  %v1414_v60 = vrot.slane %v1408_v3, 4  ;;  %v542_v6 = vadd.f32 %v3186_v63, %v522_v34  ;;  %v1456_v63 = vrot.slane %v1450_v13, 4  ;;  %v1493_v58 = vmul.f32 %v1490_v36, %v2823_v21 }
  0xfa   : > { %1334 = vrot.lane.b32.xlu0 %v1331_v61, %s2615_s18  ;;  %v1427_v61 = vmul.f32 %v1426_v41, %v2765_v43  ;;  %v541_v10 = vadd.f32 %v3196_v37, %v521_v24  ;;  %v1455_v41 = vrot.slane %v1449_v17, 4  ;;  %v3383_v37 = vmul.f32 %v3353_v18, %v2770_v46 }
  0xfb   : > { %v3290_v4 = vpop.permute.xlu1 %643  ;;  %v1417_v44 = vsel %vm1294_vm5, %v1414_v60, %v1416_v5  ;;  %v564_v20 = vadd.f32 %v3209_v50, %v542_v6  ;;  %v1476_v5 = vrot.slane %v1470_v26, 4  ;;  %v1475_v1 = vrot.slane %v1469_v25, 4 }
  0xfc   : > { %v3297_v29 = vpop.permute.xlu0 %641  ;;  %v1433_v12 = vrot.slane %v1427_v61, 4  ;;  %v563_v57 = vadd.f32 %v3219_v0, %v541_v10  ;;  %v1457_v61 = vsel %vm1294_vm5, %v1455_v41, %v1456_v63  ;;  %v1491_v2 = vmul.f32 %v1490_v36, %v2755_v32 }
  0xfd   : > { %1356 = vrot.lane.b32.xlu1 %v1353_v16, %s2615_s18  ;;  %v1415_v16 = vsel %vm1294_vm5, %v1413_v55, %v1414_v60  ;;  %v1459_v60 = vsel %vm1294_vm5, %v1456_v63, %v1458_v51  ;;  %v1500_v13 = vrot.slane %v1493_v58, 4  ;;  %v1477_v6 = vsel %vm1294_vm5, %v1475_v1, %v1476_v5 }
  0xfe   : > { %1354 = vrot.lane.b32.xlu0 %v1351_v31, %s2615_s18  ;;  %v3350_v31 = vstv %s3314_s6  ;;  %v1435_v11 = vsel %vm1294_vm5, %v1433_v12, %v1434_v53  ;;  %v583_v55 = vadd.f32 %v3240_v23, %v563_v57  ;;  %v1532_v12 = vstv %s3365_s20  ;;  %s3511_s6 = sld [smem:[#allocation3 + $0x57]]  ;;  %s3563_s20 = sld [smem:[#allocation3 + $0x28]] }
  0xff   : > { %v3307_v49 = vpop.permute.xlu1 %663  ;;  %v3375_v50 = vmul.f32 %v3350_v31, %v2751_v28  ;;  %v3379_v52 = vmul.f32 %v3350_v31, %v2823_v21  ;;  %v1497_v24 = vrot.slane %v1491_v2, 4  ;;  %v738_v26 = vrot.slane %v3383_v37, 2 }
 0x100   : > { %v3312_v33 = vpop.permute.xlu0 %661  ;;  %v605_v23 = vadd.f32 %v3259_v48, %v583_v55  ;;  %v1534_v10 = vmul.f32 %v1532_v12, %v2751_v28  ;;  %v1552_v41 = vstv %s3395_s25  ;;  %s3580_s25 = sld [smem:[#allocation3 + $0x59]] }
 0x101   : > { %1378 = vrot.lane.b32.xlu1 %v1375_v35, %s2614_s13  ;;  %v1471_v35 = vmul.f32 %v1468_v8, %v2831_v30  ;;  %v722_v53 = vrot.slane %v3375_v50, 2  ;;  %v724_v7 = vrot.slane %v3379_v52, 2  ;;  %v1553_v2 = vmul.f32 %v1552_v41, %v2765_v43 }
 0x102   : > { %1376 = vrot.lane.b32.xlu0 %v1373_v22, %s2614_s13  ;;  %v584_v22 = vadd.f32 %v3232_v45, %v564_v20  ;;  %v1492_v45 = vmul.f32 %v1490_v36, %v2751_v28  ;;  %v625_v48 = vadd.f32 %v3282_v14, %v605_v23 }
 0x103   : > { %v3327_v9 = vpop.permute.xlu1 %685  ;;  %v1478_v62 = vrot.slane %v1471_v35, 4  ;;  %v714_v35 = vmul.f32 %v3350_v31, %v2755_v32  ;;  %v1533_v31 = vmul.f32 %v1532_v12, %v2755_v32 }
 0x104   : > { %v3332_v56 = vpop.permute.xlu0 %683  ;;  %v647_v14 = vadd.f32 %v3297_v29, %v625_v48  ;;  %v731_v29 = vmul.f32 %v3353_v18, %v2765_v43 }
 0x105   : > { %1398 = vrot.lane.b32.xlu1 %v1395_v39, %s2614_s13  ;;  %v1510_v39 = vstv %s3336_s10  ;;  %v721_v58 = vrot.slane %v714_v35, 2  ;;  %v1539_v55 = vrot.slane %v1533_v31, 4  ;;  %s3553_s10 = sld [smem:[#allocation3 + $0x58]] }
 0x106   : > { %1396 = vrot.lane.b32.xlu0 %v1393_v19, %s2614_s13  ;;  %v606_v19 = vadd.f32 %v3251_v40, %v584_v22  ;;  %v1512_v34 = vmul.f32 %v1510_v39, %v2770_v46  ;;  %v1513_v42 = vmul.f32 %v1510_v39, %v2831_v30  ;;  %v667_v25 = vadd.f32 %v3312_v33, %v647_v14 }
 0x107   : > { %v3344_v38 = vpop.permute.xlu1 %705 }
 0x108   : > { %v3355_v59 = vpop.permute.xlu0 %703  ;;  %v626_v40 = vadd.f32 %v3274_v27, %v606_v19  ;;  %v733_v27 = vmul.f32 %v3353_v18, %v2831_v30  ;;  %v1518_v63 = vrot.slane %v1512_v34, 4  ;;  %v1520_v36 = vrot.slane %v1513_v42, 4 }
 0x109   : > { %1420 = vrot.lane.b32.xlu1 %v1417_v44, %s2616_s21  ;;  %v1498_v44 = vrot.slane %v1492_v45, 4  ;;  %v689_v18 = vadd.f32 %v3332_v56, %v667_v25  ;;  %v1554_v19 = vmul.f32 %v1552_v41, %v2770_v46  ;;  %v737_v34 = vrot.slane %v731_v29, 2 }
 0x10a   : > { %1418 = vrot.lane.b32.xlu0 %v1415_v16, %s2616_s21  ;;  %v648_v15 = vadd.f32 %v3290_v4, %v626_v40  ;;  %v1479_v16 = vsel %vm1294_vm5, %v1476_v5, %v1478_v62  ;;  %v1511_v4 = vmul.f32 %v1510_v39, %v2765_v43  ;;  %v740_v57 = vrot.slane %v733_v27, 2 }
 0x10b   : > { %v3368_v3 = vpop.permute.xlu1 %762  ;;  %v1501_v51 = vsel %vm1294_vm5, %v1498_v44, %v1500_v13  ;;  %v1499_v52 = vsel %vm1294_vm5, %v1497_v24, %v1498_v44  ;;  %v1521_v39 = vsel %vm1294_vm5, %v1518_v63, %v1520_v36  ;;  %v1540_v5 = vrot.slane %v1534_v10, 4 }
 0x10c   : > { %v3385_v47 = vpop.permute.xlu0 %760  ;;  %v1517_v37 = vrot.slane %v1511_v4, 4  ;;  %v741_v44 = vsel %vm720_vm3, %v738_v26, %v740_v57  ;;  %v739_v4 = vsel %vm720_vm3, %v737_v34, %v738_v26  ;;  %v1651_v10 = vstv %s3460_s28  ;;  %s3625_s28 = sld [smem:[#allocation3 + $0x2b]] }
 0x10d   : > { %1440 = vrot.lane.b32.xlu1 %v1437_v54, %s2616_s21  ;;  %v668_v54 = vadd.f32 %v3307_v49, %v648_v15  ;;  %v1535_v49 = vmul.f32 %v1532_v12, %v2823_v21  ;;  %v1559_v12 = vrot.slane %v1553_v2, 4 }
 0x10e   : > { %1438 = vrot.lane.b32.xlu0 %v1435_v11, %s2616_s21  ;;  %v1519_v56 = vsel %vm1294_vm5, %v1517_v37, %v1518_v63  ;;  %v1654_v37 = vmul.f32 %v1651_v10, %v2823_v21 }
 0x10f   : > { %v3398_v0 = vpop.permute.xlu1 %782  ;;  %v690_v11 = vadd.f32 %v3327_v9, %v668_v54  ;;  %v725_v9 = vsel %vm720_vm3, %v722_v53, %v724_v7  ;;  %v1542_v62 = vrot.slane %v1535_v49, 4  ;;  %v723_v7 = vsel %vm720_vm3, %v721_v58, %v722_v53 }
 0x110   : > { %v3405_v8 = vpop.permute.xlu0 %780  ;;  %v1541_v53 = vsel %vm1294_vm5, %v1539_v55, %v1540_v5 }
 0x111   : > { %1462 = vrot.lane.b32.xlu1 %v1459_v60, %s2617_s30  ;;  %v710_v45 = vadd.f32 %v3344_v38, %v690_v11  ;;  %v1555_v60 = vmul.f32 %v1552_v41, %v2831_v30  ;;  %v709_v38 = vadd.f32 %v3355_v59, %v689_v18  ;;  %v1560_v59 = vrot.slane %v1554_v19, 4 }
 0x112   : > { %1460 = vrot.lane.b32.xlu0 %v1457_v61, %s2617_s30  ;;  %v1609_v61 = vstv %s3417_s26  ;;  %v1543_v50 = vsel %vm1294_vm5, %v1540_v5, %v1542_v62  ;;  %s3603_s26 = sld [smem:[#allocation3 + $0x29]] }
 0x113   : > { %v3420_v17 = vpop.permute.xlu1 %804  ;;  %v729_v40 = vadd.f32 %v725_v9, %v710_v45  ;;  %v1562_v13 = vrot.slane %v1555_v60, 4  ;;  %v1611_v42 = vmul.f32 %v1609_v61, %v2751_v28  ;;  %v1612_v15 = vmul.f32 %v1609_v61, %v2823_v21 }
 0x114   : > { %v3428_v20 = vpop.permute.xlu0 %802  ;;  %v728_v27 = vadd.f32 %v723_v7, %v709_v38  ;;  %v1610_v48 = vmul.f32 %v1609_v61, %v2755_v32  ;;  %v1561_v49 = vsel %vm1294_vm5, %v1559_v12, %v1560_v59  ;;  %v1671_v9 = vstv %s3475_s29  ;;  %s3641_s29 = sld [smem:[#allocation3 + $0x5c]] }
 0x115   : > { %1482 = vrot.lane.b32.xlu1 %v1479_v16, %s2617_s30  ;;  %v745_v24 = vadd.f32 %v741_v44, %v729_v40  ;;  %v1563_v35 = vsel %vm1294_vm5, %v1560_v59, %v1562_v13  ;;  %v1617_v63 = vrot.slane %v1611_v42, 5  ;;  %v1619_v14 = vrot.slane %v1612_v15, 5 }
 0x116   : > { %1480 = vrot.lane.b32.xlu0 %v1477_v6, %s2617_s30  ;;  %v1629_v6 = vstv %s3445_s27  ;;  %v744_v26 = vadd.f32 %v739_v4, %v728_v27  ;;  %v1616_v31 = vrot.slane %v1610_v48, 5  ;;  %v1652_v60 = vmul.f32 %v1651_v10, %v2755_v32  ;;  %s3615_s27 = sld [smem:[#allocation3 + $0x5a]] }
 0x117   : > { %v3442_v22 = vpop.permute.xlu1 %824  ;;  %v1632_v36 = vmul.f32 %v1629_v6, %v2831_v30  ;;  %v1630_v41 = vmul.f32 %v1629_v6, %v2765_v43  ;;  %v767_v25 = vadd.f32 %v3368_v3, %v745_v24  ;;  %v1620_v57 = vsel %vm1581_vm6, %v1617_v63, %v1619_v14 }
 0x118   : > { %v3451_v33 = vpop.permute.xlu0 %822  ;;  %v766_v3 = vadd.f32 %v3385_v47, %v744_v26  ;;  %v1673_v55 = vmul.f32 %v1671_v9, %v2770_v46  ;;  %v1674_v61 = vmul.f32 %v1671_v9, %v2831_v30  ;;  %v1661_v38 = vrot.slane %v1654_v37, 5 }
 0x119   : > { %1504 = vrot.lane.b32.xlu1 %v1501_v51, %s2618_s8  ;;  %v1631_v51 = vmul.f32 %v1629_v6, %v2770_v46  ;;  %v1639_v58 = vrot.slane %v1632_v36, 5  ;;  %v1636_v19 = vrot.slane %v1630_v41, 5  ;;  %v787_v5 = vadd.f32 %v3398_v0, %v767_v25 }
 0x11a   : > { %1502 = vrot.lane.b32.xlu0 %v1499_v52, %s2618_s8  ;;  %v1653_v52 = vmul.f32 %v1651_v10, %v2751_v28  ;;  %v1693_v0 = vstv %s3494_s4  ;;  %v786_v40 = vadd.f32 %v3405_v8, %v766_v3  ;;  %v1658_v44 = vrot.slane %v1652_v60, 5  ;;  %s3649_s4 = sld [smem:[#allocation3 + $0x2c]] }
 0x11b   : > { %v3463_v1 = vpop.permute.xlu1 %846  ;;  %v1637_v45 = vrot.slane %v1631_v51, 5  ;;  %v1672_v59 = vmul.f32 %v1671_v9, %v2765_v43  ;;  %v1695_v27 = vmul.f32 %v1693_v0, %v2751_v28  ;;  %v1694_v48 = vmul.f32 %v1693_v0, %v2755_v32 }
 0x11c   : > { %v3470_v23 = vpop.permute.xlu0 %844  ;;  %v1659_v47 = vrot.slane %v1653_v52, 5  ;;  %v808_v15 = vadd.f32 %v3428_v20, %v786_v40  ;;  %v1713_v6 = vstv %s3511_s6  ;;  %v1017_v10 = vstv %s3523_s7  ;;  %s3672_s6 = sld [smem:[#allocation3 + $0x2d]]  ;;  %s3681_s7 = sld [smem:[#allocation3 + $0x5e]] }
 0x11d   : > { %1524 = vrot.lane.b32.xlu1 %v1521_v39, %s2618_s8  ;;  %v1618_v39 = vsel %vm1581_vm6, %v1616_v31, %v1617_v63  ;;  %v1640_v2 = vsel %vm1581_vm6, %v1637_v45, %v1639_v58  ;;  %v1638_v34 = vsel %vm1581_vm6, %v1636_v19, %v1637_v45  ;;  %v1701_v26 = vrot.slane %v1695_v27, 5 }
 0x11e   : > { %1522 = vrot.lane.b32.xlu0 %v1519_v56, %s2618_s8  ;;  %v809_v56 = vadd.f32 %v3420_v17, %v787_v5  ;;  %v1679_v17 = vrot.slane %v1673_v55, 5  ;;  %v1662_v8 = vsel %vm1581_vm6, %v1659_v47, %v1661_v38  ;;  %v828_v24 = vadd.f32 %v3451_v33, %v808_v15 }
 0x11f   : > { %v3481_v16 = vpop.permute.xlu1 %866  ;;  %v1660_v20 = vsel %vm1581_vm6, %v1658_v44, %v1659_v47  ;;  %v1716_v31 = vmul.f32 %v1713_v6, %v2831_v30  ;;  %v1700_v25 = vrot.slane %v1694_v48, 5  ;;  %v1735_v52 = vstv %s3530_s9  ;;  %s3689_s9 = sld [smem:[#allocation3 + $0x2e]] }
 0x120   : > { %v3486_v54 = vpop.permute.xlu0 %864  ;;  %v829_v13 = vadd.f32 %v3442_v22, %v809_v56  ;;  %v1696_v22 = vmul.f32 %v1693_v0, %v2823_v21  ;;  %v850_v33 = vadd.f32 %v3470_v23, %v828_v24  ;;  %v1714_v45 = vmul.f32 %v1713_v6, %v2765_v43 }
 0x121   : > { %1546 = vrot.lane.b32.xlu1 %v1543_v50, %s2619_s12  ;;  %v1681_v50 = vrot.slane %v1674_v61, 5  ;;  %v1020_v19 = vmul.f32 %v1017_v10, %v2831_v30  ;;  %v1723_v5 = vrot.slane %v1716_v31, 5  ;;  %v1737_v55 = vmul.f32 %v1735_v52, %v2751_v28 }
 0x122   : > { %1544 = vrot.lane.b32.xlu0 %v1541_v53, %s2619_s12  ;;  %v1000_v53 = vstv %s3503_s5  ;;  %v851_v12 = vadd.f32 %v3463_v1, %v829_v13  ;;  %v870_v37 = vadd.f32 %v3486_v54, %v850_v33  ;;  %v1702_v47 = vsel %vm1581_vm6, %v1700_v25, %v1701_v26  ;;  %s3660_s5 = sld [smem:[#allocation3 + $0x5d]] }
 0x123   : > { %v3496_v11 = vpop.permute.xlu1 %888  ;;  %v3551_v63 = vmul.f32 %v1000_v53, %v2751_v28  ;;  %v1682_v51 = vsel %vm1581_vm6, %v1679_v17, %v1681_v50  ;;  %v1003_v36 = vmul.f32 %v1000_v53, %v2823_v21  ;;  %v1738_v38 = vmul.f32 %v1735_v52, %v2823_v21 }
 0x124   : > { %v3501_v29 = vpop.permute.xlu0 %886  ;;  %v871_v1 = vadd.f32 %v3481_v16, %v851_v12  ;;  %v1703_v16 = vrot.slane %v1696_v22, 5  ;;  %v1736_v0 = vmul.f32 %v1735_v52, %v2755_v32  ;;  %v1755_v40 = vstv %s3553_s10  ;;  %s2439_s10 = sld [smem:[#allocation3 + $0x5f]] }
 0x125   : > { %1566 = vrot.lane.b32.xlu1 %v1563_v35, %s2619_s12  ;;  %v1678_v35 = vrot.slane %v1672_v59, 5  ;;  %v892_v60 = vadd.f32 %v3501_v29, %v870_v37  ;;  %v1001_v59 = vmul.f32 %v1000_v53, %v2755_v32  ;;  %v1743_v50 = vrot.slane %v1737_v55, 5 }
 0x126   : > { %1564 = vrot.lane.b32.xlu0 %v1561_v49, %s2619_s12  ;;  %v1715_v49 = vmul.f32 %v1713_v6, %v2770_v46  ;;  %v893_v41 = vadd.f32 %v3496_v11, %v871_v1  ;;  %v3574_v11 = vmul.f32 %v1017_v10, %v2770_v46  ;;  %v1777_v15 = vstv %s3563_s20  ;;  %s2441_s20 = sld [smem:[#allocation3 + $0x60]] }
 0x127   : > { %v3514_v18 = vpop.permute.xlu1 %908  ;;  %v1680_v23 = vsel %vm1581_vm6, %v1678_v35, %v1679_v17  ;;  %v1745_v27 = vrot.slane %v1738_v38, 5  ;;  %v1757_v12 = vmul.f32 %v1755_v40, %v2770_v46  ;;  %v1758_v22 = vmul.f32 %v1755_v40, %v2831_v30 }
 0x128   : > { %v3519_v62 = vpop.permute.xlu0 %906  ;;  %v913_v58 = vadd.f32 %v3514_v18, %v893_v41  ;;  %v1721_v54 = vrot.slane %v1715_v49, 5  ;;  %v1704_v18 = vsel %vm1581_vm6, %v1701_v26, %v1703_v16  ;;  %v1025_v44 = vrot.slane %v3574_v11, 3 }
 0x129   : > { %1623 = vrot.lane.b32.xlu1 %v1620_v57, %s2615_s18  ;;  %v1009_v57 = vrot.slane %v3551_v63, 3  ;;  %v912_v29 = vadd.f32 %v3519_v62, %v892_v60  ;;  %v1756_v24 = vmul.f32 %v1755_v40, %v2765_v43  ;;  %v1008_v35 = vrot.slane %v1001_v59, 3 }
 0x12a   : > { %1621 = vrot.lane.b32.xlu0 %v1618_v39, %s2615_s18  ;;  %v1011_v39 = vrot.slane %v1003_v36, 3  ;;  %v1724_v62 = vsel %vm1581_vm6, %v1721_v54, %v1723_v5  ;;  %v1018_v1 = vmul.f32 %v1017_v10, %v2765_v43  ;;  %v1780_v33 = vmul.f32 %v1777_v15, %v2823_v21 }
 0x12b   : > { %v931_v7 = vpop.permute.xlu1 %930  ;;  %v1797_v26 = vstv %s3580_s25  ;;  %v1746_v49 = vsel %vm1581_vm6, %v1743_v50, %v1745_v27  ;;  %v1763_v31 = vrot.slane %v1757_v12, 5  ;;  %v1765_v41 = vrot.slane %v1758_v22, 5  ;;  %s2443_s25 = sld [smem:[#allocation3 + $0x61]] }
 0x12c   : > { %v3536_v42 = vpop.permute.xlu0 %928  ;;  %v935_v61 = vadd.f32 %v931_v7, %v913_v58  ;;  %v1012_v7 = vsel %vm1007_vm4, %v1009_v57, %v1011_v39  ;;  %v1778_v16 = vmul.f32 %v1777_v15, %v2755_v32  ;;  %v1762_v37 = vrot.slane %v1756_v24, 5 }
 0x12d   : > { %1643 = vrot.lane.b32.xlu1 %v1640_v2, %s2615_s18  ;;  %v1720_v2 = vrot.slane %v1714_v45, 5  ;;  %v934_v17 = vadd.f32 %v3536_v42, %v912_v29  ;;  %v1742_v42 = vrot.slane %v1736_v0, 5  ;;  %v1010_v45 = vsel %vm1007_vm4, %v1008_v35, %v1009_v57 }
 0x12e   : > { %1641 = vrot.lane.b32.xlu0 %v1638_v34, %s2615_s18  ;;  %v1024_v58 = vrot.slane %v1018_v1, 3  ;;  %v1787_v11 = vrot.slane %v1780_v33, 5  ;;  %v1800_v60 = vmul.f32 %v1797_v26, %v2831_v30  ;;  %v1784_v63 = vrot.slane %v1778_v16, 5 }
 0x12f   : > { %v951_v4 = vpop.permute.xlu1 %950  ;;  %v1722_v6 = vsel %vm1581_vm6, %v1720_v2, %v1721_v54  ;;  %v1744_v52 = vsel %vm1581_vm6, %v1742_v42, %v1743_v50  ;;  %v1766_v54 = vsel %vm1581_vm6, %v1763_v31, %v1765_v41  ;;  %v1764_v55 = vsel %vm1581_vm6, %v1762_v37, %v1763_v31 }
 0x130   : > { %v949_v14 = vpop.permute.xlu0 %948  ;;  %v955_v34 = vadd.f32 %v951_v4, %v935_v61  ;;  %v1027_v4 = vrot.slane %v1020_v19, 3  ;;  %v1799_v19 = vmul.f32 %v1797_v26, %v2770_v46  ;;  %v1798_v61 = vmul.f32 %v1797_v26, %v2765_v43 }
 0x131   : > { %1665 = vrot.lane.b32.xlu1 %v1662_v8, %s2614_s13  ;;  %v954_v48 = vadd.f32 %v949_v14, %v934_v17  ;;  %v1779_v14 = vmul.f32 %v1777_v15, %v2751_v28  ;;  %v1026_v38 = vsel %vm1007_vm4, %v1024_v58, %v1025_v44  ;;  %v1807_v0 = vrot.slane %v1800_v60, 5 }
 0x132   : > { %1663 = vrot.lane.b32.xlu0 %v1660_v20, %s2614_s13  ;;  %v1805_v2 = vrot.slane %v1799_v19, 5  ;;  %v1839_v59 = vstv %s3615_s27  ;;  %v1896_v12 = vstv %s3625_s28  ;;  %v1938_v60 = vstv %s3649_s4  ;;  %s2430_s27 = sld [smem:[#allocation3 + $0x2a]]  ;;  %s2431_s28 = sld [smem:[#allocation3 + $0x5b]] }
 0x133   : > { %v973_v9 = vpop.permute.xlu1 %972  ;;  %v1785_v39 = vrot.slane %v1779_v14, 5  ;;  %v1842_v27 = vmul.f32 %v1839_v59, %v2831_v30  ;;  %v1899_v14 = vmul.f32 %v1896_v12, %v2823_v21  ;;  %s2620_s4 = smov 3  }
 0x134   : > { %v971_v3 = vpop.permute.xlu0 %970  ;;  %v977_v8 = vadd.f32 %v973_v9, %v955_v34  ;;  %v1028_v9 = vsel %vm1007_vm4, %v1025_v44, %v1027_v4  ;;  %v1808_v22 = vsel %vm1581_vm6, %v1805_v2, %v1807_v0 }
 0x135   : > { %1685 = vrot.lane.b32.xlu1 %v1682_v51, %s2614_s13  ;;  %v976_v36 = vadd.f32 %v971_v3, %v954_v48  ;;  %v1786_v44 = vsel %vm1581_vm6, %v1784_v63, %v1785_v39  ;;  %v1849_v26 = vrot.slane %v1842_v27, 5 }
 0x136   : > { %1683 = vrot.lane.b32.xlu0 %v1680_v23, %s2614_s13 }
 0x137   : > { %v993_v56 = vpop.permute.xlu1 %992 }
 0x138   : > { %v991_v13 = vpop.permute.xlu0 %990  ;;  %v997_v20 = vadd.f32 %v993_v56, %v977_v8  ;;  %v1788_v56 = vsel %vm1581_vm6, %v1785_v39, %v1787_v11  ;;  %v1841_v8 = vmul.f32 %v1839_v59, %v2770_v46 }
 0x139   : > { %1707 = vrot.lane.b32.xlu1 %v1704_v18, %s2616_s21  ;;  %v996_v10 = vadd.f32 %v991_v13, %v976_v36  ;;  %v1819_v18 = vstv %s3603_s26  ;;  %v1898_v36 = vmul.f32 %v1896_v12, %v2751_v28  ;;  %s2403_s26 = sld [smem:[#allocation3 + $0x4d]] }
 0x13a   : > { %1705 = vrot.lane.b32.xlu0 %v1702_v47, %s2616_s21  ;;  %v1016_v23 = vadd.f32 %v1012_v7, %v997_v20  ;;  %v1821_v40 = vmul.f32 %v1819_v18, %v2751_v28  ;;  %v1822_v34 = vmul.f32 %v1819_v18, %v2823_v21  ;;  %v1820_v7 = vmul.f32 %v1819_v18, %v2755_v32 }
 0x13b   : > { %v1050_v53 = vpop.permute.xlu1 %1049  ;;  %v1015_v5 = vadd.f32 %v1010_v45, %v996_v10  ;;  %v1840_v20 = vmul.f32 %v1839_v59, %v2765_v43  ;;  %v1847_v33 = vrot.slane %v1841_v8, 5  ;;  %v1906_v45 = vrot.slane %v1899_v14, 6 }
 0x13c   : > { %v3606_v51 = vpop.permute.xlu0 %1047  ;;  %v1032_v47 = vadd.f32 %v1028_v9, %v1016_v23  ;;  %v1827_v48 = vrot.slane %v1821_v40, 5  ;;  %v1826_v42 = vrot.slane %v1820_v7, 5  ;;  %v1904_v23 = vrot.slane %v1898_v36, 6 }
 0x13d   : > { %1727 = vrot.lane.b32.xlu1 %v1724_v62, %s2616_s21  ;;  %v1031_v13 = vadd.f32 %v1026_v38, %v1015_v5  ;;  %v1804_v62 = vrot.slane %v1798_v61, 5  ;;  %v1846_v10 = vrot.slane %v1840_v20, 5  ;;  %v1850_v39 = vsel %vm1581_vm6, %v1847_v33, %v1849_v26 }
 0x13e   : > { %1725 = vrot.lane.b32.xlu0 %v1722_v6, %s2616_s21  ;;  %v1054_v50 = vadd.f32 %v1050_v53, %v1032_v47  ;;  %v1829_v6 = vrot.slane %v1822_v34, 5  ;;  %v1828_v31 = vsel %vm1581_vm6, %v1826_v42, %v1827_v48  ;;  %v1907_v47 = vsel %vm1868_vm7, %v1904_v23, %v1906_v45 }
 0x13f   : > { %v1070_v25 = vpop.permute.xlu1 %1069  ;;  %v1053_v24 = vadd.f32 %v3606_v51, %v1031_v13  ;;  %v1806_v4 = vsel %vm1581_vm6, %v1804_v62, %v1805_v2  ;;  %v1848_v5 = vsel %vm1581_vm6, %v1846_v10, %v1847_v33  ;;  %v1939_v2 = vmul.f32 %v1938_v60, %v2755_v32 }
 0x140   : > { %v1068_v3 = vpop.permute.xlu0 %1067  ;;  %v1074_v35 = vadd.f32 %v1070_v25, %v1054_v50  ;;  %v1830_v51 = vsel %vm1581_vm6, %v1827_v48, %v1829_v6  ;;  %v1897_v25 = vmul.f32 %v1896_v12, %v2755_v32  ;;  %v1958_v7 = vstv %s3660_s5  ;;  %s176_s5 = sand.u32 1, %s2603_s15  }
 0x141   : > { %1749 = vrot.lane.b32.xlu1 %v1746_v49, %s2617_s30  ;;  %v1073_v41 = vadd.f32 %v1068_v3, %v1053_v24  ;;  %v1960_v8 = vmul.f32 %v1958_v7, %v2770_v46  ;;  %v1961_v27 = vmul.f32 %v1958_v7, %v2831_v30  ;;  %v1945_v6 = vrot.slane %v1939_v2, 6 }
 0x142   : > { %1747 = vrot.lane.b32.xlu0 %v1744_v52, %s2617_s30  ;;  %v1916_v52 = vstv %s3641_s29  ;;  %v1980_v20 = vstv %s3672_s6  ;;  %s2146_s29 = sld [smem:[#allocation2]]  ;;  %s2345_s6 = sshll.u32 %s176_s5, 6 }
 0x143   : > { %v1092_v57 = vpop.permute.xlu1 %1091  ;;  %v1918_v3 = vmul.f32 %v1916_v52, %v2770_v46  ;;  %v1919_v19 = vmul.f32 %v1916_v52, %v2831_v30  ;;  %v1966_v14 = vrot.slane %v1960_v8, 6  ;;  %v1968_v33 = vrot.slane %v1961_v27, 6 }
 0x144   : > { %v1090_v29 = vpop.permute.xlu0 %1089  ;;  %v1096_v49 = vadd.f32 %v1092_v57, %v1074_v35  ;;  %v1903_v57 = vrot.slane %v1897_v25, 6  ;;  %v1981_v25 = vmul.f32 %v1980_v20, %v2755_v32 }
 0x145   : > { %1769 = vrot.lane.b32.xlu1 %v1766_v54, %s2617_s30  ;;  %v1095_v58 = vadd.f32 %v1090_v29, %v1073_v41  ;;  %v1940_v29 = vmul.f32 %v1938_v60, %v2751_v28  ;;  %v1924_v40 = vrot.slane %v1918_v3, 6  ;;  %v1926_v34 = vrot.slane %v1919_v19, 6 }
 0x146   : > { %1767 = vrot.lane.b32.xlu0 %v1764_v55, %s2617_s30  ;;  %v1917_v55 = vmul.f32 %v1916_v52, %v2765_v43  ;;  %v2022_v3 = vstv %s3689_s9 }
 0x147   : > { %v1112_v17 = vpop.permute.xlu1 %1111  ;;  %v1927_v12 = vsel %vm1868_vm7, %v1924_v40, %v1926_v34  ;;  %v2023_v2 = vmul.f32 %v2022_v3, %v2755_v32 }
 0x148   : > { %v1110_v15 = vpop.permute.xlu0 %1109  ;;  %v1116_v37 = vadd.f32 %v1112_v17, %v1096_v49  ;;  %v1905_v17 = vsel %vm1868_vm7, %v1903_v57, %v1904_v23  ;;  %v1982_v49 = vmul.f32 %v1980_v20, %v2751_v28  ;;  %v1969_v23 = vsel %vm1868_vm7, %v1966_v14, %v1968_v33 }
 0x149   : > { %1791 = vrot.lane.b32.xlu1 %v1788_v56, %s2618_s8  ;;  %v1115_v54 = vadd.f32 %v1110_v15, %v1095_v58  ;;  %v1941_v56 = vmul.f32 %v1938_v60, %v2823_v21  ;;  %v2024_v57 = vmul.f32 %v2022_v3, %v2751_v28 }
 0x14a   : > { %1789 = vrot.lane.b32.xlu0 %v1786_v44, %s2618_s8  ;;  %v1923_v44 = vrot.slane %v1917_v55, 6  ;;  %v1988_v58 = vrot.slane %v1982_v49, 6  ;;  %v2025_v55 = vmul.f32 %v2022_v3, %v2823_v21 }
 0x14b   : > { %v1134_v53 = vpop.permute.xlu1 %1133  ;;  %v1948_v48 = vrot.slane %v1941_v56, 6  ;;  %v2030_v34 = vrot.slane %v2024_v57, 6 }
 0x14c   : > { %v1132_v1 = vpop.permute.xlu0 %1131  ;;  %v1138_v11 = vadd.f32 %v1134_v53, %v1116_v37  ;;  %v1925_v53 = vsel %vm1868_vm7, %v1923_v44, %v1924_v40 }
 0x14d   : > { %1811 = vrot.lane.b32.xlu1 %v1808_v22, %s2618_s8  ;;  %v1137_v38 = vadd.f32 %v1132_v1, %v1115_v54  ;;  %v1946_v22 = vrot.slane %v1940_v29, 6  ;;  %v1987_v54 = vrot.slane %v1981_v25, 6 }
 0x14e   : > { %1809 = vrot.lane.b32.xlu0 %v1806_v4, %s2618_s8  ;;  %v1959_v4 = vmul.f32 %v1958_v7, %v2765_v43  ;;  %v2032_v7 = vrot.slane %v2025_v55, 6 }
 0x14f   : > { %v1154_v16 = vpop.permute.xlu1 %1153  ;;  %v1949_v26 = vsel %vm1868_vm7, %v1946_v22, %v1948_v48  ;;  %v1989_v29 = vsel %vm1868_vm7, %v1987_v54, %v1988_v58 }
 0x150   : > { %v1152_v9 = vpop.permute.xlu0 %1151  ;;  %v1158_v61 = vadd.f32 %v1154_v16, %v1138_v11  ;;  %v1947_v16 = vsel %vm1868_vm7, %v1945_v6, %v1946_v22  ;;  %v1965_v10 = vrot.slane %v1959_v4, 6  ;;  %v2084_v22 = vstv %s2441_s20 }
 0x151   : > { %1833 = vrot.lane.b32.xlu1 %v1830_v51, %s2619_s12  ;;  %v1157_v59 = vadd.f32 %v1152_v9, %v1137_v38  ;;  %v1983_v51 = vmul.f32 %v1980_v20, %v2823_v21 }
 0x152   : > { %1831 = vrot.lane.b32.xlu0 %v1828_v31, %s2619_s12  ;;  %v2000_v31 = vstv %s3681_s7  ;;  %v1967_v60 = vsel %vm1868_vm7, %v1965_v10, %v1966_v14  ;;  %v2087_v14 = vmul.f32 %v2084_v22, %v2831_v30  ;;  %s178_s7 = scalar_lea.vmem [#allocation6], %s2345_s6 }
 0x153   : > { %v1176_v63 = vpop.permute.xlu1 %1175  ;;  %v2002_v45 = vmul.f32 %v2000_v31, %v2770_v46  ;;  %v2003_v11 = vmul.f32 %v2000_v31, %v2831_v30 }
 0x154   : > { %v1174_v18 = vpop.permute.xlu0 %1173  ;;  %v1180_v0 = vadd.f32 %v1176_v63, %v1158_v61  ;;  %v2001_v63 = vmul.f32 %v2000_v31, %v2765_v43 }
 0x155   : > { %1853 = vrot.lane.b32.xlu1 %v1850_v39, %s2619_s12  ;;  %v1179_v15 = vadd.f32 %v1174_v18, %v1157_v59  ;;  %v1990_v39 = vrot.slane %v1983_v51, 6  ;;  %v2008_v18 = vrot.slane %v2002_v45, 6 }
 0x156   : > { %1851 = vrot.lane.b32.xlu0 %v1848_v5, %s2619_s12  ;;  %v2007_v56 = vrot.slane %v2001_v63, 6  ;;  %v2126_v63 = vstv %s2443_s25 }
 0x157   : > { %v1196_v13 = vpop.permute.xlu1 %1195  ;;  %v1991_v61 = vsel %vm1868_vm7, %v1988_v58, %v1990_v39 }
 0x158   : > { %v1200_v62 = vadd.f32 %v1196_v13, %v1180_v0  ;;  %v1194_v50 = vpop.permute.xlu0 %1193  ;;  %v2042_v0 = vstv %s2439_s10 }
 0x159   : > { %1910 = vrot.lane.b32.xlu1 %v1907_v47, %s2615_s18  ;;  %v1199_v42 = vadd.f32 %v1194_v50, %v1179_v15  ;;  %v2010_v47 = vrot.slane %v2003_v11, 6  ;;  %v2044_v13 = vmul.f32 %v2042_v0, %v2770_v46  ;;  %v2029_v50 = vrot.slane %v2023_v2, 6 }
 0x15a   : > { %1908 = vrot.lane.b32.xlu0 %v1905_v17, %s2615_s18  ;;  %v2045_v17 = vmul.f32 %v2042_v0, %v2831_v30  ;;  %v2043_v15 = vmul.f32 %v2042_v0, %v2765_v43 }
 0x15b   : > { %v1218_v24 = vpop.permute.xlu1 %1217  ;;  %v2011_v59 = vsel %vm1868_vm7, %v2008_v18, %v2010_v47  ;;  %v2050_v48 = vrot.slane %v2044_v13, 6  ;;  %v2031_v4 = vsel %vm1868_vm7, %v2029_v50, %v2030_v34  ;;  %v2128_v47 = vmul.f32 %v2126_v63, %v2770_v46 }
 0x15c   : > { %v1222_v35 = vadd.f32 %v1218_v24, %v1200_v62  ;;  %v1216_v1 = vpop.permute.xlu0 %1215  ;;  %v2009_v62 = vsel %vm1868_vm7, %v2007_v56, %v2008_v18  ;;  %v2052_v6 = vrot.slane %v2045_v17, 6  ;;  %v2049_v20 = vrot.slane %v2043_v15, 6 }
 0x15d   : > { %v1221_v36 = vadd.f32 %v1216_v1, %v1199_v42  ;;  %1930 = vrot.lane.b32.xlu1 %v1927_v12, %s2615_s18  ;;  %v2033_v12 = vsel %vm1868_vm7, %v2030_v34, %v2032_v7  ;;  %v2127_v34 = vmul.f32 %v2126_v63, %v2765_v43  ;;  %v2134_v13 = vrot.slane %v2128_v47, 6 }
 0x15e   : > { %1928 = vrot.lane.b32.xlu0 %v1925_v53, %s2615_s18  ;;  %s2440_s18 = sld [smem:[#allocation3 + $0x2f]]  ;;  %v2053_v33 = vsel %vm1868_vm7, %v2050_v48, %v2052_v6  ;;  %v2051_v31 = vsel %vm1868_vm7, %v2049_v20, %v2050_v48  ;;  %v1304_v20 = vstv %s2403_s26 }
 0x15f   : > { %v1238_v41 = vpop.permute.xlu1 %1237  ;;  %v2133_v15 = vrot.slane %v2127_v34, 6 }
 0x160   : > { %v3702_v52 = vadd.f32 %v1238_v41, %v1222_v35  ;;  %v1236_v37 = vpop.permute.xlu0 %1235 }
 0x161   : > { %v3704_v9 = vadd.f32 %v1236_v37, %v1221_v36  ;;  %1952 = vrot.lane.b32.xlu1 %v1949_v26, %s2614_s13  ;;  %v2086_v36 = vmul.f32 %v2084_v22, %v2770_v46  ;;  %v2135_v6 = vsel %vm1868_vm7, %v2133_v15, %v2134_v13 }
 0x162   : > { %1950 = vrot.lane.b32.xlu0 %v1947_v16, %s2614_s13  ;;  %v2085_v16 = vmul.f32 %v2084_v22, %v2765_v43 }
 0x163   : > { %v3712_v19 = vpop.permute.xlu1 %1259  ;;  %v2092_v37 = vrot.slane %v2086_v36, 6 }
 0x164   : > { %v3716_v5 = vpop.permute.xlu0 %1257  ;;  %v2064_v8 = vstv %s2440_s18 }
 0x165   : > { %1972 = vrot.lane.b32.xlu1 %v1969_v23, %s2614_s13  ;;  %v2066_v42 = vmul.f32 %v2064_v8, %v2751_v28  ;;  %v2067_v24 = vmul.f32 %v2064_v8, %v2823_v21  ;;  %v2065_v35 = vmul.f32 %v2064_v8, %v2755_v32  ;;  %v2094_v23 = vrot.slane %v2087_v14, 6 }
 0x166   : > { %1970 = vrot.lane.b32.xlu0 %v1967_v60, %s2614_s13  ;;  %s2442_s13 = sld [smem:[#allocation3 + $0x30]]  ;;  %v2091_v60 = vrot.slane %v2085_v16, 6 }
 0x167   : > { %v3723_v38 = vpop.permute.xlu1 %1279  ;;  %v2072_v26 = vrot.slane %v2066_v42, 6  ;;  %v2074_v49 = vrot.slane %v2067_v24, 6  ;;  %v2071_v41 = vrot.slane %v2065_v35, 6  ;;  %v2095_v55 = vsel %vm1868_vm7, %v2092_v37, %v2094_v23 }
 0x168   : > { %v3727_v40 = vpop.permute.xlu0 %1277  ;;  %v2093_v2 = vsel %vm1868_vm7, %v2091_v60, %v2092_v37  ;;  %v1263_v37 = vadd.f32 %v3716_v5, %v3704_v9 }
 0x169   : > { %1994 = vrot.lane.b32.xlu1 %v1991_v61, %s2616_s21  ;;  %v2075_v45 = vsel %vm1868_vm7, %v2072_v26, %v2074_v49  ;;  %v2073_v3 = vsel %vm1868_vm7, %v2071_v41, %v2072_v26  ;;  %v1306_v49 = vmul.f32 %v1304_v20, %v2770_v46  ;;  %v1264_v41 = vadd.f32 %v3712_v19, %v3702_v52 }
 0x16a   : > { %1992 = vrot.lane.b32.xlu0 %v1989_v29, %s2616_s21  ;;  %v2129_v29 = vmul.f32 %v2126_v63, %v2831_v30 }
 0x16b   : > { %v3734_v44 = vpop.permute.xlu1 %1336 }
 0x16c   : > { %v3738_v27 = vpop.permute.xlu0 %1334  ;;  %v2106_v10 = vstv %s2442_s13  ;;  %v2136_v17 = vrot.slane %v2129_v29, 6  ;;  %s2621_s13 = smov [#allocation6]  }
 0x16d   : > { %2014 = vrot.lane.b32.xlu1 %v2011_v59, %s2616_s21  ;;  %v2108_v58 = vmul.f32 %v2106_v10, %v2751_v28  ;;  %v2109_v39 = vmul.f32 %v2106_v10, %v2823_v21  ;;  %v2107_v54 = vmul.f32 %v2106_v10, %v2755_v32  ;;  %v1305_v10 = vmul.f32 %v1304_v20, %v2765_v43  ;;  %s2549_s25 = sshll.u32 %s2621_s13, 4  ;;  %s2550_s25 = int_to_ptr.vmem [resolvable:$false] %s2549_s25 }
 0x16e   : > { %2012 = vrot.lane.b32.xlu0 %v2009_v62, %s2616_s21  ;;  %v2137_v22 = vsel %vm1868_vm7, %v2134_v13, %v2136_v17 }
 0x16f   : > { %v3745_v53 = vpop.permute.xlu1 %1356  ;;  %v2114_v61 = vrot.slane %v2108_v58, 6  ;;  %v2116_v18 = vrot.slane %v2109_v39, 6  ;;  %v2113_v0 = vrot.slane %v2107_v54, 6  ;;  %v1283_v54 = vadd.f32 %v3727_v40, %v1263_v37 }
 0x170   : > { %v3749_v1 = vpop.permute.xlu0 %1354 }
 0x171   : > { %2036 = vrot.lane.b32.xlu1 %v2033_v12, %s2617_s30  ;;  %v2117_v59 = vsel %vm1868_vm7, %v2114_v61, %v2116_v18  ;;  %v2115_v50 = vsel %vm1868_vm7, %v2113_v0, %v2114_v61 }
 0x172   : > { %2034 = vrot.lane.b32.xlu0 %v2031_v4, %s2617_s30 }
 0x173   : > { %v3756_v51 = vpop.permute.xlu1 %1378 }
 0x174   : > { %v3760_v25 = vpop.permute.xlu0 %1376 }
 0x175   : > { %2056 = vrot.lane.b32.xlu1 %v2053_v33, %s2617_s30 }
 0x176   : > { %2054 = vrot.lane.b32.xlu0 %v2051_v31, %s2617_s30  ;;  %s2402_s30 = sld [smem:[#allocation3 + $0x1c]]  ;;  %v1307_v31 = vmul.f32 %v1304_v20, %v2831_v30 }
 0x177   : > { %v3767_v11 = vpop.permute.xlu1 %1398 }
 0x178   : > { %v3771_v57 = vpop.permute.xlu0 %1396  ;;  %v1314_v60 = vrot.slane %v1307_v31, 4 }
 0x179   : > { %2078 = vrot.lane.b32.xlu1 %v2075_v45, %s2618_s8  ;;  %v1284_v45 = vadd.f32 %v3723_v38, %v1264_v41 }
 0x17a   : > { %2076 = vrot.lane.b32.xlu0 %v2073_v3, %s2618_s8  ;;  %v1312_v3 = vrot.slane %v1306_v49, 4 }
 0x17b   : > { %v3778_v56 = vpop.permute.xlu1 %1420 }
 0x17c   : > { %v3782_v7 = vpop.permute.xlu0 %1418  ;;  %v1287_v12 = vstv %s2402_s30  ;;  %v1315_v18 = vsel %vm1294_vm5, %v1312_v3, %v1314_v60  ;;  %s2551_s30 = scalar_lea.vmem %s2550_s25, 2048 }
 0x17d   : > { %2098 = vrot.lane.b32.xlu1 %v2095_v55, %s2618_s8  ;;  %v1289_v24 = vmul.f32 %v1287_v12, %v2751_v28  ;;  %v1290_v4 = vmul.f32 %v1287_v12, %v2823_v21  ;;  %v1288_v35 = vmul.f32 %v1287_v12, %v2755_v32  ;;  %v1311_v55 = vrot.slane %v1305_v10, 4 }
 0x17e   : > { %2096 = vrot.lane.b32.xlu0 %v2093_v2, %s2618_s8  ;;  %s2416_s8 = sld [smem:[#allocation3 + $0x23]] }
 0x17f   : > { %v3787_v62 = vpop.permute.xlu1 %1440  ;;  %v1296_v33 = vrot.slane %v1289_v24, 4  ;;  %v1298_v26 = vrot.slane %v1290_v4, 4  ;;  %v1295_v16 = vrot.slane %v1288_v35, 4  ;;  %v1313_v9 = vsel %vm1294_vm5, %v1311_v55, %v1312_v3 }
 0x180   : > { %v3790_v8 = vpop.permute.xlu0 %1438 }
 0x181   : > { %2120 = vrot.lane.b32.xlu1 %v2117_v59, %s2619_s12  ;;  %v1299_v39 = vsel %vm1294_vm5, %v1296_v33, %v1298_v26  ;;  %v1297_v63 = vsel %vm1294_vm5, %v1295_v16, %v1296_v33 }
 0x182   : > { %2118 = vrot.lane.b32.xlu0 %v2115_v50, %s2619_s12  ;;  %v1303_v19 = vadd.f32 %v1299_v39, %v1284_v45  ;;  %v1302_v47 = vadd.f32 %v1297_v63, %v1283_v54 }
 0x183   : > { %v1463_v48 = vpop.permute.xlu1 %1462 }
 0x184   : > { %v1461_v42 = vpop.permute.xlu0 %1460  ;;  %v1319_v38 = vadd.f32 %v1315_v18, %v1303_v19  ;;  %v1318_v2 = vadd.f32 %v1313_v9, %v1302_v47 }
 0x185   : > { %2140 = vrot.lane.b32.xlu1 %v2137_v22, %s2619_s12 }
 0x186   : > { %2138 = vrot.lane.b32.xlu0 %v2135_v6, %s2619_s12  ;;  %v1341_v34 = vadd.f32 %v3734_v44, %v1319_v38  ;;  %v1340_v40 = vadd.f32 %v3738_v27, %v1318_v2  ;;  %s2417_s12 = sld [smem:[#allocation3 + $0x54]] }
 0x187   : > { %v1483_v36 = vpop.permute.xlu1 %1482 }
 0x188   : > { %v1481_v14 = vpop.permute.xlu0 %1480  ;;  %v1361_v17 = vadd.f32 %v3745_v53, %v1341_v34  ;;  %v1360_v15 = vadd.f32 %v3749_v1, %v1340_v40 }
 0x18a   : > { %v1383_v12 = vadd.f32 %v3756_v51, %v1361_v17  ;;  %v1382_v22 = vadd.f32 %v3760_v25, %v1360_v15  ;;  %v1574_v51 = vstv %s2416_s8 }
 0x18b   : > { %v1505_v23 = vpop.permute.xlu1 %1504 }
 0x18c   : > { %v1503_v58 = vpop.permute.xlu0 %1502  ;;  %v1403_v24 = vadd.f32 %v3767_v11, %v1383_v12  ;;  %v1402_v4 = vadd.f32 %v3771_v57, %v1382_v22  ;;  %v1576_v11 = vmul.f32 %v1574_v51, %v2751_v28  ;;  %v1591_v10 = vstv %s2417_s12 }
 0x18e   : > { %v1425_v27 = vadd.f32 %v3778_v56, %v1403_v24  ;;  %v1424_v53 = vadd.f32 %v3782_v7, %v1402_v4  ;;  %v1577_v56 = vmul.f32 %v1574_v51, %v2823_v21  ;;  %v1575_v7 = vmul.f32 %v1574_v51, %v2755_v32 }
 0x18f   : > { %v1525_v52 = vpop.permute.xlu1 %1524  ;;  %v1583_v39 = vrot.slane %v1576_v11, 5 }
 0x190   : > { %v1523_v61 = vpop.permute.xlu0 %1522  ;;  %v1445_v35 = vadd.f32 %v3787_v62, %v1425_v27  ;;  %v1444_v33 = vadd.f32 %v3790_v8, %v1424_v53  ;;  %v1582_v54 = vrot.slane %v1575_v7, 5 }
 0x192   : > { %v1467_v26 = vadd.f32 %v1463_v48, %v1445_v35  ;;  %v1466_v25 = vadd.f32 %v1461_v42, %v1444_v33  ;;  %v1585_v48 = vrot.slane %v1577_v56, 5  ;;  %v1593_v42 = vmul.f32 %v1591_v10, %v2770_v46 }
 0x193   : > { %v1547_v5 = vpop.permute.xlu1 %1546 }
 0x194   : > { %v1545_v29 = vpop.permute.xlu0 %1544  ;;  %v1487_v31 = vadd.f32 %v1483_v36, %v1467_v26  ;;  %v1486_v57 = vadd.f32 %v1481_v14, %v1466_v25  ;;  %v1594_v36 = vmul.f32 %v1591_v10, %v2831_v30  ;;  %v1592_v14 = vmul.f32 %v1591_v10, %v2765_v43 }
 0x196   : > { %v1509_v16 = vadd.f32 %v1505_v23, %v1487_v31  ;;  %v1508_v37 = vadd.f32 %v1503_v58, %v1486_v57  ;;  %v1586_v58 = vsel %vm1581_vm6, %v1583_v39, %v1585_v48  ;;  %v1601_v47 = vrot.slane %v1594_v36, 5 }
 0x197   : > { %v1567_v0 = vpop.permute.xlu1 %1566  ;;  %v1598_v9 = vrot.slane %v1592_v14, 5 }
 0x198   : > { %v1565_v59 = vpop.permute.xlu0 %1564  ;;  %v1529_v45 = vadd.f32 %v1525_v52, %v1509_v16  ;;  %v1528_v3 = vadd.f32 %v1523_v61, %v1508_v37  ;;  %v1599_v52 = vrot.slane %v1593_v42, 5  ;;  %v1584_v61 = vsel %vm1581_vm6, %v1582_v54, %v1583_v39 }
 0x19a   : > { %v1551_v60 = vadd.f32 %v1547_v5, %v1529_v45  ;;  %v1550_v63 = vadd.f32 %v1545_v29, %v1528_v3  ;;  %v1602_v5 = vsel %vm1581_vm6, %v1599_v52, %v1601_v47  ;;  %v1600_v17 = vsel %vm1581_vm6, %v1598_v9, %v1599_v52 }
 0x19b   : > { %v3816_v13 = vpop.permute.xlu1 %1623  ;;  %v1861_v45 = vstv %s2430_s27 }
 0x19c   : > { %v3819_v50 = vpop.permute.xlu0 %1621  ;;  %v1571_v55 = vadd.f32 %v1567_v0, %v1551_v60  ;;  %v1570_v18 = vadd.f32 %v1565_v59, %v1550_v63 }
 0x19e   : > { %v1590_v2 = vadd.f32 %v1586_v58, %v1571_v55  ;;  %v1589_v40 = vadd.f32 %v1584_v61, %v1570_v18 }
 0x19f   : > { %v1644_v6 = vpop.permute.xlu1 %1643 }
 0x1a0   : > { %v1642_v44 = vpop.permute.xlu0 %1641  ;;  %v1606_v15 = vadd.f32 %v1602_v5, %v1590_v2  ;;  %v1605_v12 = vadd.f32 %v1600_v17, %v1589_v40 }
 0x1a2   : > { %v1628_v59 = vadd.f32 %v3816_v13, %v1606_v15  ;;  %v1627_v4 = vadd.f32 %v3819_v50, %v1605_v12 }
 0x1a3   : > { %v1666_v20 = vpop.permute.xlu1 %1665 }
 0x1a4   : > { %v1664_v1 = vpop.permute.xlu0 %1663  ;;  %v1648_v53 = vadd.f32 %v1644_v6, %v1628_v59  ;;  %v1647_v33 = vadd.f32 %v1642_v44, %v1627_v4  ;;  %v1863_v44 = vmul.f32 %v1861_v45, %v2751_v28 }
 0x1a6   : > { %v1670_v51 = vadd.f32 %v1666_v20, %v1648_v53  ;;  %v1669_v26 = vadd.f32 %v1664_v1, %v1647_v33  ;;  %v1870_v60 = vrot.slane %v1863_v44, 6 }
 0x1a7   : > { %v1686_v49 = vpop.permute.xlu1 %1685 }
 0x1a8   : > { %v1684_v41 = vpop.permute.xlu0 %1683  ;;  %v1690_v31 = vadd.f32 %v1686_v49, %v1670_v51  ;;  %v1864_v49 = vmul.f32 %v1861_v45, %v2823_v21 }
 0x1a9   : > { %v1689_v57 = vadd.f32 %v1684_v41, %v1669_v26  ;;  %v1862_v41 = vmul.f32 %v1861_v45, %v2755_v32 }
 0x1aa   : > { %v1872_v63 = vrot.slane %v1864_v49, 6 }
 0x1ab   : > { %v1708_v62 = vpop.permute.xlu1 %1707 }
 0x1ac   : > { %v1706_v8 = vpop.permute.xlu0 %1705  ;;  %v1712_v56 = vadd.f32 %v1708_v62, %v1690_v31  ;;  %v1878_v62 = vstv %s2431_s28  ;;  %v1873_v47 = vsel %vm1868_vm7, %v1870_v60, %v1872_v63 }
 0x1ad   : > { %v1711_v16 = vadd.f32 %v1706_v8, %v1689_v57  ;;  %v1881_v55 = vmul.f32 %v1878_v62, %v2831_v30  ;;  %v1879_v58 = vmul.f32 %v1878_v62, %v2765_v43 }
 0x1af   : > { %v1728_v23 = vpop.permute.xlu1 %1727 }
 0x1b0   : > { %v1726_v19 = vpop.permute.xlu0 %1725  ;;  %v1732_v10 = vadd.f32 %v1728_v23, %v1712_v56  ;;  %v1880_v23 = vmul.f32 %v1878_v62, %v2770_v46 }
 0x1b1   : > { %v1731_v37 = vadd.f32 %v1726_v19, %v1711_v16  ;;  %v1869_v19 = vrot.slane %v1862_v41, 6 }
 0x1b2   : > { %v1886_v9 = vrot.slane %v1880_v23, 6 }
 0x1b3   : > { %v1750_v38 = vpop.permute.xlu1 %1749  ;;  %v1871_v2 = vsel %vm1868_vm7, %v1869_v19, %v1870_v60 }
 0x1b4   : > { %v1748_v34 = vpop.permute.xlu0 %1747  ;;  %v1754_v50 = vadd.f32 %v1750_v38, %v1732_v10  ;;  %v1888_v38 = vrot.slane %v1881_v55, 6 }
 0x1b5   : > { %v1753_v39 = vadd.f32 %v1748_v34, %v1731_v37  ;;  %v1885_v34 = vrot.slane %v1879_v58, 6 }
 0x1b6   : > { %v1889_v17 = vsel %vm1868_vm7, %v1886_v9, %v1888_v38 }
 0x1b7   : > { %v1770_v29 = vpop.permute.xlu1 %1769  ;;  %v1887_v43 = vsel %vm1868_vm7, %v1885_v34, %v1886_v9 }
 0x1b8   : > { %v1768_v0 = vpop.permute.xlu0 %1767  ;;  %v1774_v3 = vadd.f32 %v1770_v29, %v1754_v50 }
 0x1b9   : > { %v1773_v1 = vadd.f32 %v1768_v0, %v1753_v39 }
 0x1bb   : > { %v1792_v22 = vpop.permute.xlu1 %1791 }
 0x1bc   : > { %v1790_v24 = vpop.permute.xlu0 %1789  ;;  %v1796_v48 = vadd.f32 %v1792_v22, %v1774_v3 }
 0x1bd   : > { %v1795_v8 = vadd.f32 %v1790_v24, %v1773_v1 }
 0x1bf   : > { %v1812_v27 = vpop.permute.xlu1 %1811 }
 0x1c0   : > { %v1810_v35 = vpop.permute.xlu0 %1809  ;;  %v1816_v36 = vadd.f32 %v1812_v27, %v1796_v48 }
 0x1c1   : > { %v1815_v14 = vadd.f32 %v1810_v35, %v1795_v8 }
 0x1c3   : > { %v1834_v25 = vpop.permute.xlu1 %1833 }
 0x1c4   : > { %v1832_v11 = vpop.permute.xlu0 %1831  ;;  %v1838_v28 = vadd.f32 %v1834_v25, %v1816_v36  ;;  %v2147_v36 = vstv %s2146_s29 }
 0x1c5   : > { %v1837_v21 = vadd.f32 %v1832_v11, %v1815_v14 }
 0x1c7   : > { %v1854_v7 = vpop.permute.xlu1 %1853 }
 0x1c8   : > { %v1852_v13 = vpop.permute.xlu0 %1851  ;;  %v1858_v52 = vadd.f32 %v1854_v7, %v1838_v28 }
 0x1c9   : > { %v1857_v61 = vadd.f32 %v1852_v13, %v1837_v21 }
 0x1ca   : > { %v1877_v46 = vadd.f32 %v1873_v47, %v1858_v52 }
 0x1cb   : > { %v1911_v6 = vpop.permute.xlu1 %1910  ;;  %v1876_v30 = vadd.f32 %v1871_v2, %v1857_v61 }
 0x1cc   : > { %v1909_v20 = vpop.permute.xlu0 %1908  ;;  %v1893_v15 = vadd.f32 %v1889_v17, %v1877_v46  ;;  %v2518_v46 = vld [vmem:[%s2724_s11] sm:$0xff] }
 0x1cd   : > { %v1892_v12 = vadd.f32 %v1887_v43, %v1876_v30  ;;  %v2519_v30 = vld [vmem:[%s2724_s11 + $0x18] sm:$0xff] }
 0x1ce   : > { %v1915_v59 = vadd.f32 %v1911_v6, %v1893_v15 }
 0x1cf   : > { %v1931_v42 = vpop.permute.xlu1 %1930  ;;  %v1914_v4 = vadd.f32 %v1909_v20, %v1892_v12 }
 0x1d0   : > { %v1929_v54 = vpop.permute.xlu0 %1928  ;;  %v1935_v53 = vadd.f32 %v1931_v42, %v1915_v59 }
 0x1d1   : > { %v1934_v33 = vadd.f32 %v1929_v54, %v1914_v4 }
 0x1d3   : > { %v1953_v18 = vpop.permute.xlu1 %1952 }
 0x1d4   : > { %v1951_v32 = vpop.permute.xlu0 %1950  ;;  %v1957_v51 = vadd.f32 %v1953_v18, %v1935_v53  ;;  %v2524_v53 = vld [vmem:[%s2724_s11 + $0x8] sm:$0xff] }
 0x1d5   : > { %v1956_v26 = vadd.f32 %v1951_v32, %v1934_v33  ;;  %v2525_v33 = vld [vmem:[%s2724_s11 + $0x40] sm:$0x3f] }
 0x1d7   : > { %v1973_v40 = vpop.permute.xlu1 %1972 }
 0x1d8   : > { %v1971_v5 = vpop.permute.xlu0 %1970  ;;  %v1977_v31 = vadd.f32 %v1973_v40, %v1957_v51 }
 0x1d9   : > { %v1976_v57 = vadd.f32 %v1971_v5, %v1956_v26  ;;  %v2526_v26 = vld [vmem:[%s2724_s11 + $0x20] sm:$0xff] }
 0x1db   : > { %v1995_v29 = vpop.permute.xlu1 %1994 }
 0x1dc   : > { %v1993_v0 = vpop.permute.xlu0 %1992  ;;  %v1999_v56 = vadd.f32 %v1995_v29, %v1977_v31  ;;  %v2520_v29 = vld [vmem:[%s2724_s11 + $0x10] sm:$0x3f]  ;;  %v2527_v31 = vld [vmem:[%s2724_s11 + $0x38] sm:$0xff] }
 0x1dd   : > { %v1998_v16 = vadd.f32 %v1993_v0, %v1976_v57  ;;  %v2521_v0 = vld [vmem:[%s2724_s11 + $0x28] sm:$0x3f]  ;;  %v2528_v57 = vld [vmem:[%s2724_s11 + $0x50] sm:$0xff] }
 0x1df   : > { %v2015_v22 = vpop.permute.xlu1 %2014 }
 0x1e0   : > { %v2013_v24 = vpop.permute.xlu0 %2012  ;;  %v2019_v10 = vadd.f32 %v2015_v22, %v1999_v56  ;;  %v2522_v22 = vld [vmem:[%s2724_s11 + $0x30] sm:$0xff] }
 0x1e1   : > { %v2018_v37 = vadd.f32 %v2013_v24, %v1998_v16  ;;  %v2523_v24 = vld [vmem:[%s2724_s11 + $0x48] sm:$0xff]  ;;  %v2529_v16 = vld [vmem:[%s2724_s11 + $0x58] sm:$0x3f]  ;;  %s2449_s11 = sshll.u32 %s2668_s2, 10  ;;  %s3898_s2 = scalar_lea.sflag [#allocation4], %s176_s5 }
 0x1e2   : > { %s3890_s18 = scalar_lea.hbm %s3942_s3, %s2449_s11 }
 0x1e3   : > { %v2037_v27 = vpop.permute.xlu1 %2036 }
 0x1e4   : > { %v2035_v35 = vpop.permute.xlu0 %2034  ;;  %v2041_v45 = vadd.f32 %v2037_v27, %v2019_v10 }
 0x1e5   : > { %v2040_v50 = vadd.f32 %v2035_v35, %v2018_v37 }
 0x1e7   : > { %v2057_v25 = vpop.permute.xlu1 %2056 }
 0x1e8   : > { %v2055_v11 = vpop.permute.xlu0 %2054  ;;  %v2061_v6 = vadd.f32 %v2057_v25, %v2041_v45 }
 0x1e9   : > { %v2060_v44 = vadd.f32 %v2055_v11, %v2040_v50 }
 0x1eb   : > { %v2079_v7 = vpop.permute.xlu1 %2078 }
 0x1ec   : > { %v2077_v13 = vpop.permute.xlu0 %2076  ;;  %v2083_v20 = vadd.f32 %v2079_v7, %v2061_v6 }
 0x1ed   : > { %v2082_v1 = vadd.f32 %v2077_v13, %v2060_v44 }
 0x1ef   : > { %v2099_v39 = vpop.permute.xlu1 %2098 }
 0x1f0   : > { %v2097_v3 = vpop.permute.xlu0 %2096  ;;  %v2103_v48 = vadd.f32 %v2099_v39, %v2083_v20 }
 0x1f1   : > { %v2102_v62 = vadd.f32 %v2097_v3, %v2082_v1 }
 0x1f3   : > { %v2121_v49 = vpop.permute.xlu1 %2120 }
 0x1f4   : > { %v2119_v41 = vpop.permute.xlu0 %2118  ;;  %v2125_v8 = vadd.f32 %v2121_v49, %v2103_v48 }
 0x1f5   : > { %v2124_v42 = vadd.f32 %v2119_v41, %v2102_v62 }
 0x1f7   : > { %v2141_v60 = vpop.permute.xlu1 %2140 }
 0x1f8   : > { %v2145_v54 = vadd.f32 %v2141_v60, %v2125_v8  ;;  %v2139_v14 = vpop.permute.xlu0 %2138 }
 0x1f9   : > { %v2144_v63 = vadd.f32 %v2139_v14, %v2124_v42 }
 0x1fa   : > { %v2149_v23 = vadd.f32 %v2147_v36, %v2145_v54 }
 0x1fb   : > { %v2148_v55 = vadd.f32 %v2147_v36, %v2144_v63 }
 0x1fc   : > { %v2151_v28 = vsub.f32 0.0, %v2149_v23 }
 0x1fd   : > { %v2150_v19 = vsub.f32 0.0, %v2148_v55 }
 0x1fe   : > { %v2154_v58 = vmul.f32 1.442695, %v2151_v28 }
 0x1ff   : > { %v2152_v21 = vmul.f32 1.442695, %v2150_v19 }
 0x200   : > { %2510 = vpow2.f32 %v2154_v58 }
 0x201   : > { %2512 = vpow2.f32 %v2152_v21 }
 0x20a   : > { %v2511_v18 = vpop.eup %2510 }
 0x20b   : > { %v2513_v52 = vpop.eup %2512  ;;  %v2157_v32 = vadd.f32 1.0, %v2511_v18 }
 0x20c   : > { %v2156_v47 = vadd.f32 1.0, %v2513_v52 }
 0x20d   : > { %2514 = vrcp.f32 %v2157_v32 }
 0x20e   : > { %2516 = vrcp.f32 %v2156_v47 }
 0x217   : > { %v2515_v61 = vpop.eup %2514 }
 0x218   : > { %v2517_v9 = vpop.eup %2516  ;;  %v2165_v38 = vrot.slane %v2515_v61, 5 }
 0x219   : > { %v2164_v2 = vrot.slane %v2517_v9, 5 }
 0x21b   : > { %2167 = vrot.lane.b32.xlu0 %v2164_v2, %s2620_s4  ;;  %v2166_v34 = vsel %vm1581_vm6, %v2164_v2, %v2165_v38 }
 0x21c   : > { %2169 = vrot.lane.b32.xlu1 %v2166_v34, %s2620_s4 }
 0x21f   : > { %2171 = vrot.lane.b32.xlu0 %v2165_v38, %s2620_s4 }
 0x28d   : > { %v2168_v40 = vpop.permute.xlu0 %2167 }
 0x28e   : > { %v2176_v5 = vmul.f32 %v2518_v46, %v2168_v40  ;;  %v2179_v17 = vmul.f32 %v2519_v30, %v2168_v40  ;;  %v2182_v59 = vmul.f32 %v2522_v22, %v2168_v40  ;;  %v2185_v4 = vmul.f32 %v2523_v24, %v2168_v40  ;;  %v2170_v27 = vpop.permute.xlu1 %2169 }
 0x28f   : > { %v2177_v35 = vmul.f32 %v2524_v53, %v2170_v27  ;;  %v2180_v25 = vmul.f32 %v2526_v26, %v2170_v27  ;;  %v2183_v11 = vmul.f32 %v2527_v31, %v2170_v27  ;;  %v2186_v56 = vmul.f32 %v2528_v57, %v2170_v27 }
 0x290   : > { %2206 = vrot.lane.b32.xlu0 %v2179_v17, %s2616_s21  ;;  %2200 = vrot.lane.b32.xlu1 %v2176_v5, %s2616_s21 }
 0x291   : > { %v2172_v43 = vpop.permute.xlu0 %2171 }
 0x292   : > { %v2178_v15 = vmul.f32 %v2520_v29, %v2172_v43  ;;  %v2181_v12 = vmul.f32 %v2521_v0, %v2172_v43  ;;  %v2184_v51 = vmul.f32 %v2525_v33, %v2172_v43  ;;  %v2187_v7 = vmul.f32 %v2529_v16, %v2172_v43 }
 0x294   : > { %2210 = vrot.lane.b32.xlu0 %v2181_v12, %s2616_s21  ;;  %2204 = vrot.lane.b32.xlu1 %v2178_v15, %s2616_s21 }
 0x298   : > { %2218 = vrot.lane.b32.xlu0 %v2185_v4, %s2616_s21  ;;  %2212 = vrot.lane.b32.xlu1 %v2182_v59, %s2616_s21 }
 0x29c   : > { %2216 = vrot.lane.b32.xlu1 %v2184_v51, %s2616_s21  ;;  %2202 = vrot.lane.b32.xlu0 %v2177_v35, %s2616_s21 }
 0x2a0   : > { %2208 = vrot.lane.b32.xlu1 %v2180_v25, %s2616_s21  ;;  %2214 = vrot.lane.b32.xlu0 %v2183_v11, %s2616_s21 }
 0x2a4   : > { %2220 = vrot.lane.b32.xlu1 %v2186_v56, %s2616_s21  ;;  %2222 = vrot.lane.b32.xlu0 %v2187_v7, %s2616_s21  ;;  %s2265_s21 = sshll.u32 %s178_s7, 4  ;;  %s3892_s21 = int_to_ptr.vmem [resolvable:$true] %s2265_s21 }
 0x2a5   : > { %s2545_s20 = scalar_lea.vmem %s3892_s21, 1024  ;;  %p2552_p13 = scmp.lt.s32.totalorder %s3892_s21, %s2550_s25 }
 0x2a6   : > { %p2546_p9 = scmp.ne.s32.totalorder %s3892_s21, %s2545_s20  ;;  %p2553_p0 = scmp.lt.s32.totalorder %s2551_s30, %s2545_s20 }
 0x2a8   : > { %p2547_p10 = pnand %p2546_p9, %p2685_p5  ;;  %p2554_p1 = por %p2553_p0, %p2552_p13 }
 0x2aa   : > { %p2548_p12 = pneg %p2547_p10 }
 0x2ac   : > { %p2555_p2 = pnand %p2554_p1, %p2548_p12 }
 0x302   : > { %v2207_v10 = vpop.permute.xlu0 %2206  ;;  %v2201_v13 = vpop.permute.xlu1 %2200 }
 0x303   : > { %2242 = vst.msk [vmem:[%s178_s7 + $0xd] sm:$0xf8] %vm2236_vm8, %v2207_v10  ;;  %2237 = vst.msk [vmem:[%s178_s7 - $0x3] sm:$0xf8] %vm2236_vm8, %v2201_v13 }
 0x306   : > { %v2211_v37 = vpop.permute.xlu0 %2210  ;;  %v2205_v45 = vpop.permute.xlu1 %2204 }
 0x307   : > { %2244 = vst.msk [vmem:[%s178_s7 + $0x1d] sm:$0x7] %vm2240_vm9, %v2211_v37  ;;  %2241 = vst.msk [vmem:[%s178_s7 + $0xd] sm:$0x7] %vm2240_vm9, %v2205_v45 }
 0x30a   : > { %v2219_v50 = vpop.permute.xlu0 %2218  ;;  %v2213_v39 = vpop.permute.xlu1 %2212 }
 0x30b   : > { %2248 = vst.msk [vmem:[%s178_s7 + $0x2d] sm:$0xf8] %vm2236_vm8, %v2219_v50  ;;  %2245 = vst.msk [vmem:[%s178_s7 + $0x1d] sm:$0xf8] %vm2236_vm8, %v2213_v39 }
 0x30e   : > { %v2203_v6 = vpop.permute.xlu0 %2202  ;;  %v2217_v3 = vpop.permute.xlu1 %2216 }
 0x30f   : > { %2239 = vst.msk [vmem:[%s178_s7 + $0x5] sm:$0xff] %vm2238_vm10, %v2203_v6 }
 0x310   : > { %2247 = vst.msk [vmem:[%s178_s7 + $0x2d] sm:$0x7] %vm2240_vm9, %v2217_v3 }
 0x312   : > { %v2215_v44 = vpop.permute.xlu0 %2214  ;;  %v2209_v20 = vpop.permute.xlu1 %2208 }
 0x313   : > { %2246 = vst.msk [vmem:[%s178_s7 + $0x25] sm:$0xff] %vm2238_vm10, %v2215_v44  ;;  %2243 = vst.msk [vmem:[%s178_s7 + $0x15] sm:$0xff] %vm2238_vm10, %v2209_v20 }
 0x316   : > { %v2223_v1 = vpop.permute.xlu0 %2222  ;;  %v2221_v49 = vpop.permute.xlu1 %2220 }
 0x317   : > { %2250 = vst.msk [vmem:[%s178_s7 + $0x3d] sm:$0x7] %vm2240_vm9, %v2223_v1 }
 0x318   : > { %2249 = vst.msk [vmem:[%s178_s7 + $0x35] sm:$0xff] %vm2238_vm10, %v2221_v49 }
 0x319   : > { %2558 = shalt.err (!%p2555_p2)
}
 0x31a   : > { %s2559_s26 = scalar_lea.hbm %s3890_s18, 1024  ;;  %s2563_s27 = scalar_lea.hbm %s3942_s3, 2048 }
 0x31b   : > { %p2560_p3 = scmp.ne.s32.totalorder %s3890_s18, %s2559_s26  ;;  %p2564_p8 = scmp.lt.u32.totalorder %s3890_s18, %s3942_s3 }
 0x31c   : > { %p2565_p11 = scmp.lt.u32.totalorder %s2563_s27, %s2559_s26  ;;  %p2567_p10 = scmp.lt.u32.totalorder %s2559_s26, %s3890_s18 }
 0x31d   : > { %p2561_p4 = pnand %p2560_p3, %p2685_p5 }
 0x31e   : > { %p2566_p9 = por %p2565_p11, %p2564_p8 }
 0x31f   : > { %p2562_p7 = pneg %p2561_p4 }
 0x320   : > { %p2568_p12 = por %p2567_p10, %p2566_p9 }
 0x322   : > { %p2569_p13 = pnand %p2568_p12, %p2562_p7 }
 0x324   : > { %2572 = shalt.err (!%p2569_p13)
}
 0x325   : > { %s2622_s4 = smov 128   ;;  %s2623_s5 = smov 8  }
 0x326   : > { %2455 = dma.vmem_to_hbm [thread:$0]  (%p2685_p5), %s3892_s21, 1024, %s3890_s18, %s3898_s2, %s2622_s4, %s2622_s4, %s2623_s5  }
 0x327 PF: > { %p2467_p0 = scmp.ge.s32.totalorder %s2611_s17, 2  ;;  %s2280_s6 = sand.u32 1, %s2599_s14  }
 0x328   : > { %s2281_s7 = scalar_lea.sflag [#allocation4], %s2280_s6 }
 0x329   : > { %p2462_p1 = pnand %p2467_p0, %p2689_p6 }
 0x32b   : > { %2594 = dma.done.wait (!%p2462_p1), %s2281_s7, 1024  }
 0x32c   : > { %2596 = vsyncadd (!%p2462_p1), %s2281_s7, 4294966272  ;;  %p15_p2 = scmp.ge.s32.totalorder %s2672_s19, 4   ;;  %s3946_s14 = smov %s2603_s15 }
 0x32d   : > { %s3947_s15 = smov %s2607_s16  ;;  %s3948_s16 = smov %s2683_s22 }
 0x32e   : > { %s3949_s17 = smov %s2672_s19  ;;  %17 = sbr.rel (!%p15_p2) target bundleno = 6 (0x6), region = 72 }
 0x335   :  { %2286 = vsyncpa [#allocation4], 1 }
 0x336   :  { %2288 = vsyncpa [#allocation4 + $0x1], 1 }
 0x337   :  { %2289 = vsyncpa [#allocation5], 1 }
 0x338   :  { %2291 = vsyncpa [#allocation5 + $0x1], 1 }

</bundles_post_ra>
